<compile_context>
chip_gen: v7x
topology: tpu7x:2x2x1
jax: 0.10.0
libtpu: 0.0.40
codegen_flags: <defaults>
</compile_context>

<pallas_src>
import functools

import jax
import jax.numpy as jnp
from jax.experimental import pallas as pl
from jax.experimental.pallas import tpu as pltpu

EPS = 1e-5      # PyTorch BatchNorm2d default eps
LANE = 128      # TPU lane width


def _round_up(x, m):
    return ((x + m - 1) // m) * m


def _pick_th(ho, wo, cout_p, acc_budget_bytes=128 * 1024):
    """Largest divisor of Ho whose f32 accumulator tile stays register-friendly."""
    th = 1
    for cand in range(1, ho + 1):
        if ho % cand == 0 and cand * wo * cout_p * 4 <= acc_budget_bytes:
            th = cand
    return th


def _vmem_limit(working_set_bytes):
    # Need-based scoped-VMEM limit.  Generous vs. the 32 MiB default on 128 MiB parts
    # (v5e/v6e); capped at 48 MiB so it also stays inside v7x's 64 MiB physical VMEM.
    return int(min(48 << 20, max(32 << 20, 2 * working_set_bytes)))


# ------------------ Kernel 1: on-the-fly im2col conv + batch stats ------------------ #
def _conv_stats_kernel(x_ref, w_ref, y_ref, sum_ref, sumsq_ref, *, k, th, wo):
    # x_ref : (4, Hq, Wq, Cin)      phase-split padded input image (bf16), VMEM-resident
    # w_ref : (k, k, Cin, Cout_p)   per-tap weight slabs (bf16)
    # y_ref : (1, th, Wo, Cout_p)   conv output tile (bf16)
    # sum_ref / sumsq_ref : (1, 1, Cout_p) per-image f32 stat accumulators
    cin = x_ref.shape[-1]
    cout_p = y_ref.shape[-1]
    h0 = pl.program_id(1) * th

    acc = jnp.zeros((th * wo, cout_p), jnp.float32)
    # Static unroll over the k*k taps: each tap is a contiguous slab of the phase-split
    # input (the stride-2 gather became unit-stride), i.e. the im2col patch block is
    # built on the fly in VMEM/registers -- nothing k^2-inflated ever touches HBM.
    for kh in range(k):
        for kw in range(k):
            a = x_ref[2 * (kh % 2) + (kw % 2),            # phase (kh%2, kw%2)
                      pl.ds(h0 + kh // 2, th),            # output rows of this tile
                      pl.ds(kw // 2, wo), :]              # all output cols
            acc = acc + jnp.dot(a.reshape(th * wo, cin), w_ref[kh, kw],
                                preferred_element_type=jnp.float32)

    y_ref[0] = acc.reshape(th, wo, cout_p).astype(y_ref.dtype)

    # Single-pass batch statistics (per-image slots; combined in JAX glue).  The
    # cross-row reduction runs on the XLU, not the MXU (review item).
    @pl.when(pl.program_id(1) == 0)
    def _init():
        sum_ref[...] = jnp.zeros_like(sum_ref)
        sumsq_ref[...] = jnp.zeros_like(sumsq_ref)

    sum_ref[...] += jnp.sum(acc, axis=0).reshape(1, 1, cout_p)
    sumsq_ref[...] += jnp.sum(acc * acc, axis=0).reshape(1, 1, cout_p)


def conv_stats(xq, w_q, *, n, ho, wo, hq, wq, cin, cout_p, k, th, out_dtype):
    work = 2 * (4 * hq * wq * cin * xq.dtype.itemsize
                + k * k * cin * cout_p * w_q.dtype.itemsize
                + th * wo * cout_p * jnp.dtype(out_dtype).itemsize
                + 2 * cout_p * 4)
    kern = functools.partial(_conv_stats_kernel, k=k, th=th, wo=wo)
    return pl.pallas_call(
        kern,
        out_shape=(
            jax.ShapeDtypeStruct((n, ho, wo, cout_p), out_dtype),
            jax.ShapeDtypeStruct((n, 1, cout_p), jnp.float32),
            jax.ShapeDtypeStruct((n, 1, cout_p), jnp.float32),
        ),
        grid_spec=pltpu.PrefetchScalarGridSpec(
            num_scalar_prefetch=0,
            grid=(n, ho // th),
            in_specs=[
                pl.BlockSpec((4, hq, wq, cin), lambda i, h: (i, 0, 0, 0)),       # image-resident
                pl.BlockSpec((k, k, cin, cout_p), lambda i, h: (0, 0, 0, 0)),    # weights
            ],
            out_specs=[
                pl.BlockSpec((1, th, wo, cout_p), lambda i, h: (i, h, 0, 0)),    # y (lane-dense)
                pl.BlockSpec((1, 1, cout_p), lambda i, h: (i, 0, 0)),            # per-image sum
                pl.BlockSpec((1, 1, cout_p), lambda i, h: (i, 0, 0)),            # per-image sumsq
            ],
        ),
        compiler_params=pltpu.CompilerParams(
            # batch axis parallel (megacore on v7x); row-tile axis carries the stats
            # accumulation so it stays "arbitrary".
            dimension_semantics=("parallel", "arbitrary"),
            vmem_limit_bytes=_vmem_limit(work),
        ),
    )(xq, w_q)


# --------------------- Kernel 2: folded BN affine + ReLU (in place) ----------------- #
def _bn_relu_kernel(y_ref, scale_ref, shift_ref, o_ref):
    y = y_ref[...].astype(jnp.float32)
    o_ref[...] = jnp.maximum(y * scale_ref[...] + shift_ref[...], 0.0).astype(o_ref.dtype)


def bn_relu(y, scale, shift):
    n, ho, wo, cp = y.shape
    work = 4 * ho * wo * cp * y.dtype.itemsize + 4 * cp * 4
    return pl.pallas_call(
        _bn_relu_kernel,
        out_shape=jax.ShapeDtypeStruct(y.shape, y.dtype),
        grid_spec=pltpu.PrefetchScalarGridSpec(
            num_scalar_prefetch=0,
            grid=(n,),                                        # whole-image blocks: big,
            in_specs=[                                        # lane-dense, mem-bound tiles
                pl.BlockSpec((1, ho, wo, cp), lambda i: (i, 0, 0, 0)),
                pl.BlockSpec((1, 1, 1, cp), lambda i: (0, 0, 0, 0)),
                pl.BlockSpec((1, 1, 1, cp), lambda i: (0, 0, 0, 0)),
            ],
            out_specs=pl.BlockSpec((1, ho, wo, cp), lambda i: (i, 0, 0, 0)),
        ),
        compiler_params=pltpu.CompilerParams(
            dimension_semantics=("parallel",),
            vmem_limit_bytes=_vmem_limit(work),
        ),
        input_output_aliases={0: 0},                          # write back in place over y
    )(y, scale, shift)


# ----------------------------------- JAX glue ---------------------------------------- #
def _phase_pad(act, pad, hq, wq):
    """act (N, H, W, C) -> phase-split padded (N*4, Hq, Wq, C).

    xq[n*4 + ph*2 + pw, i, j, c] == zero-padded act[n, 2*i + ph - pad, 2*j + pw - pad, c],
    so every conv tap becomes a contiguous slab inside the kernel (no strided gathers).
    Same footprint as the activation itself -- no k^2 inflation in HBM.
    """
    n, h, w, c = act.shape
    xpad = jnp.pad(act, ((0, 0), (pad, 2 * hq - h - pad), (pad, 2 * wq - w - pad), (0, 0)))
    xq = xpad.reshape(n, hq, 2, wq, 2, c).transpose(0, 2, 4, 1, 3, 5)
    return xq.reshape(n * 4, hq, wq, c)


def _layer_apply(act, arrs, meta, compute_dtype):
    """Conv2d(stride=2, pad=(k-1)//2, bias dropped) + BatchNorm2d(train) + ReLU; NHWC."""
    w_q, g_p, beta_p = arrs                      # (k,k,Cin,Cout_p), (Cout_p,), (Cout_p,)
    cout, cout_p, cin_sz, k = meta
    n, h, w, _ = act.shape
    pad = (k - 1) // 2
    ho = (h + 2 * pad - k) // 2 + 1
    wo = (w + 2 * pad - k) // 2 + 1
    hq, wq = ho + pad, wo + pad
    th = _pick_th(ho, wo, cout_p)

    xq = _phase_pad(act, pad, hq, wq)

    # Pass 1: on-the-fly-im2col conv + single-pass batch statistics.
    y, s_i, ss_i = conv_stats(xq, w_q, n=n, ho=ho, wo=wo, hq=hq, wq=wq,
                              cin=cin_sz, cout_p=cout_p, k=k, th=th,
                              out_dtype=compute_dtype)

    # Tiny per-channel math: combine per-image partial sums; conv bias cancels (dropped).
    cnt = float(n * ho * wo)
    s = jnp.sum(s_i, axis=0).reshape(cout_p)
    ss = jnp.sum(ss_i, axis=0).reshape(cout_p)
    mean = s / cnt
    # Biased batch variance (training-mode BN).  E[y^2]-E[y]^2 with f32 accumulators is
    # fine at these (BN-scale) magnitudes; use shifted sums if means ever get large.
    var = jnp.maximum(ss / cnt - mean * mean, 0.0)
    scale = g_p * jax.lax.rsqrt(var + EPS)       # zero on padded channels (g_p padding=0)
    shift = beta_p - mean * scale

    # Pass 2: folded affine + ReLU, in place over y, bf16 out for the next layer.
    return bn_relu(y,
                   scale.reshape(1, 1, 1, cout_p).astype(jnp.float32),
                   shift.reshape(1, 1, 1, cout_p).astype(jnp.float32))


class DCGANDiscriminatorPallas:
    def __init__(self, key, in_size=3, base_channels=64, channel_factors=None,
                 kernel_size=5, compute_dtype=jnp.bfloat16):
        # bf16 operands halve HBM traffic and double MXU rate on v6e/v7x; accumulation
        # and batch statistics stay f32.
        self.kernel_size = kernel_size
        self.compute_dtype = compute_dtype
        chans = [in_size] + [base_channels * f for f in channel_factors]

        self.params = []                 # raw PyTorch-style (w, b, g, beta) for the reference
        layer_arrays = []
        layers_meta = []
        cin_sz = in_size                 # stored (possibly lane-padded) channel count of input
        for cin, cout in zip(chans[:-1], chans[1:]):
            key, kw_, kb_ = jax.random.split(key, 3)
            fan_in = cin * kernel_size * kernel_size
            w = jax.random.normal(kw_, (cout, cin, kernel_size, kernel_size),
                                  jnp.float32) / jnp.sqrt(fan_in)
            b = jax.random.normal(kb_, (cout,), jnp.float32) * 0.01  # cancels in train-BN
            g = jnp.ones((cout,), jnp.float32)
            beta = jnp.zeros((cout,), jnp.float32)
            self.params.append((w, b, g, beta))

            cout_p = _round_up(cout, LANE)
            # OIHW -> (kh, kw, cin, cout), zero-padded to the stored channel counts.
            w_tap = jnp.zeros((kernel_size, kernel_size, cin_sz, cout_p), jnp.float32)
            w_tap = w_tap.at[:, :, :cin, :cout].set(w.transpose(2, 3, 1, 0))
            g_p = jnp.zeros((cout_p,), jnp.float32).at[:cout].set(g)
            beta_p = jnp.zeros((cout_p,), jnp.float32).at[:cout].set(beta)
            layer_arrays.append((w_tap.astype(compute_dtype), g_p, beta_p))
            layers_meta.append((cout, cout_p, cin_sz, kernel_size))
            cin_sz = cout_p              # next layer consumes the lane-padded channels

        self._layer_arrays = tuple(layer_arrays)
        layers_meta = tuple(layers_meta)
        cdt = compute_dtype
        final_cout = chans[-1]

        def forward(x, layer_arrays):
            act = jnp.transpose(x, (0, 2, 3, 1)).astype(cdt)   # NCHW -> NHWC once
            for meta, arrs in zip(layers_meta, layer_arrays):
                act = _layer_apply(act, arrs, meta, cdt)
            out = act[..., :final_cout]
            return jnp.transpose(out, (0, 3, 1, 2)).astype(jnp.float32)  # NHWC -> NCHW once

        self._forward = jax.jit(forward)

    def __call__(self, x):
        return self._forward(x, self._layer_arrays)


# -------------------------------- JAX reference -------------------------------------- #
def _reference_layer(x, params, k, stride=2):
    w, b, g, beta = params
    pad = (k - 1) // 2
    y = jax.lax.conv_general_dilated(
        x, w, (stride, stride), [(pad, pad), (pad, pad)],
        dimension_numbers=("NCHW", "OIHW", "NCHW"))
    y = y + b[None, :, None, None]
    mean = y.mean(axis=(0, 2, 3), keepdims=True)
    var = ((y - mean) ** 2).mean(axis=(0, 2, 3), keepdims=True)
    yhat = (y - mean) / jnp.sqrt(var + EPS)
    return jnp.maximum(g[None, :, None, None] * yhat + beta[None, :, None, None], 0.0)


def _reference_forward(x, model):
    out = x
    for p in model.params:
        out = _reference_layer(out, p, model.kernel_size)
    return out


# ------------------------------------- main ------------------------------------------ #
if __name__ == "__main__":
    key = jax.random.PRNGKey(0)
    k_in, k_model = jax.random.split(key)

    # Small shapes consistent with the module: NCHW input (2, 4, 16, 16).
    x = jax.random.normal(k_in, (2, 4, 16, 16), jnp.float32)

    model = DCGANDiscriminatorPallas(
        k_model, in_size=4, base_channels=8, channel_factors=[1, 2], kernel_size=5)

    out = jax.block_until_ready(model(x))
    assert out.shape == (2, 16, 4, 4), out.shape

    ref = jax.block_until_ready(_reference_forward(x, model))
    max_err = float(jnp.max(jnp.abs(out - ref)))
    # bf16 activations/weights/stored conv output (f32 accumulation + stats) vs the f32
    # reference across two BN-normalized layers: tolerance sized accordingly.
    assert bool(jnp.allclose(out, ref, atol=1e-1, rtol=1e-1)), max_err

    print("KERNEL_OK")
</pallas_src>

<mosaic_0001>
module attributes {stable_mosaic.version = 11 : i64} {
  func.func @_bn_relu_kernel(%arg0: i32, %arg1: memref<1x8x8x128xbf16, #tpu.memory_space<vmem>>, %arg2: memref<1x1x1x128xf32, #tpu.memory_space<vmem>>, %arg3: memref<1x1x1x128xf32, #tpu.memory_space<vmem>>, %arg4: memref<1x8x8x128xbf16, #tpu.memory_space<vmem>>) attributes {dimension_semantics = [#tpu.dimension_semantics<parallel>], iteration_bounds = array<i64: 2>, scalar_prefetch = 0 : i64, scratch_operands = 0 : i64, tpu.core_type = #tpu.core_type<tc>, window_params = [{transform_indices = @transform_0, window_bounds = array<i64: 1, 8, 8, 128>}, {pipeline_mode = #tpu.pipeline_mode<synchronous>, transform_indices = @transform_1, window_bounds = array<i64: 1, 1, 1, 128>}, {pipeline_mode = #tpu.pipeline_mode<synchronous>, transform_indices = @transform_2, window_bounds = array<i64: 1, 1, 1, 128>}, {transform_indices = @transform_3, window_bounds = array<i64: 1, 8, 8, 128>}]} {
    %c0 = arith.constant 0 : index
    %c0_0 = arith.constant 0 : index
    %c0_1 = arith.constant 0 : index
    %c0_2 = arith.constant 0 : index
    %0 = vector.load %arg1[%c0, %c0_0, %c0_1, %c0_2] : memref<1x8x8x128xbf16, #tpu.memory_space<vmem>>, vector<1x8x8x128xbf16>
    %1 = arith.extf %0 : vector<1x8x8x128xbf16> to vector<1x8x8x128xf32>
    %c0_3 = arith.constant 0 : index
    %c0_4 = arith.constant 0 : index
    %c0_5 = arith.constant 0 : index
    %c0_6 = arith.constant 0 : index
    %2 = vector.load %arg2[%c0_3, %c0_4, %c0_5, %c0_6] : memref<1x1x1x128xf32, #tpu.memory_space<vmem>>, vector<1x1x1x128xf32>
    %3 = vector.broadcast %2 : vector<1x1x1x128xf32> to vector<1x8x8x128xf32>
    %4 = arith.mulf %1, %3 : vector<1x8x8x128xf32>
    %c0_7 = arith.constant 0 : index
    %c0_8 = arith.constant 0 : index
    %c0_9 = arith.constant 0 : index
    %c0_10 = arith.constant 0 : index
    %5 = vector.load %arg3[%c0_7, %c0_8, %c0_9, %c0_10] : memref<1x1x1x128xf32, #tpu.memory_space<vmem>>, vector<1x1x1x128xf32>
    %6 = vector.broadcast %5 : vector<1x1x1x128xf32> to vector<1x8x8x128xf32>
    %7 = arith.addf %4, %6 : vector<1x8x8x128xf32>
    %cst = arith.constant 0.000000e+00 : f32
    %8 = vector.broadcast %cst : f32 to vector<1x8x8x128xf32>
    %9 = arith.maximumf %7, %8 : vector<1x8x8x128xf32>
    %10 = arith.truncf %9 : vector<1x8x8x128xf32> to vector<1x8x8x128xbf16>
    %c0_11 = arith.constant 0 : index
    %c0_12 = arith.constant 0 : index
    %c0_13 = arith.constant 0 : index
    %c0_14 = arith.constant 0 : index
    %11 = vector.load %arg4[%c0_11, %c0_12, %c0_13, %c0_14] : memref<1x8x8x128xbf16, #tpu.memory_space<vmem>>, vector<1x8x8x128xbf16>
    tpu.vector_store %arg4[%c0_11, %c0_12, %c0_13, %c0_14], %10 {strides = array<i32>} : memref<1x8x8x128xbf16, #tpu.memory_space<vmem>>, vector<1x8x8x128xbf16>,
    return
  }
  func.func @transform_0(%arg0: i32) -> (i32, i32, i32, i32) {
    %c0_i32 = arith.constant 0 : i32
    %c0_i32_0 = arith.constant 0 : i32
    %c0_i32_1 = arith.constant 0 : i32
    %c0_i32_2 = arith.constant 0 : i32
    return %arg0, %c0_i32, %c0_i32_0, %c0_i32_1 : i32, i32, i32, i32
  }
  func.func @transform_1(%arg0: i32) -> (i32, i32, i32, i32) {
    %c0_i32 = arith.constant 0 : i32
    %c0_i32_0 = arith.constant 0 : i32
    %c0_i32_1 = arith.constant 0 : i32
    %c0_i32_2 = arith.constant 0 : i32
    %c0_i32_3 = arith.constant 0 : i32
    return %c0_i32, %c0_i32_0, %c0_i32_1, %c0_i32_2 : i32, i32, i32, i32
  }
  func.func @transform_2(%arg0: i32) -> (i32, i32, i32, i32) {
    %c0_i32 = arith.constant 0 : i32
    %c0_i32_0 = arith.constant 0 : i32
    %c0_i32_1 = arith.constant 0 : i32
    %c0_i32_2 = arith.constant 0 : i32
    %c0_i32_3 = arith.constant 0 : i32
    return %c0_i32, %c0_i32_0, %c0_i32_1, %c0_i32_2 : i32, i32, i32, i32
  }
  func.func @transform_3(%arg0: i32) -> (i32, i32, i32, i32) {
    %c0_i32 = arith.constant 0 : i32
    %c0_i32_0 = arith.constant 0 : i32
    %c0_i32_1 = arith.constant 0 : i32
    %c0_i32_2 = arith.constant 0 : i32
    return %arg0, %c0_i32, %c0_i32_0, %c0_i32_1 : i32, i32, i32, i32
  }
}

module attributes {stable_mosaic.version = 11 : i64} {
  func.func @_conv_stats_kernel(%arg0: i32, %arg1: i32, %arg2: memref<4x10x10x4xbf16, #tpu.memory_space<vmem>>, %arg3: memref<5x5x4x128xbf16, #tpu.memory_space<vmem>>, %arg4: memref<1x8x8x128xbf16, #tpu.memory_space<vmem>>, %arg5: memref<1x1x128xf32, #tpu.memory_space<vmem>>, %arg6: memref<1x1x128xf32, #tpu.memory_space<vmem>>) attributes {dimension_semantics = [#tpu.dimension_semantics<parallel>, #tpu.dimension_semantics<arbitrary>], iteration_bounds = array<i64: 2, 1>, scalar_prefetch = 0 : i64, scratch_operands = 0 : i64, tpu.core_type = #tpu.core_type<tc>, window_params = [{transform_indices = @transform_0, window_bounds = array<i64: 4, 10, 10, 4>}, {pipeline_mode = #tpu.pipeline_mode<synchronous>, transform_indices = @transform_1, window_bounds = array<i64: 5, 5, 4, 128>}, {transform_indices = @transform_2, window_bounds = array<i64: 1, 8, 8, 128>}, {transform_indices = @transform_3, window_bounds = array<i64: 1, 1, 128>}, {transform_indices = @transform_4, window_bounds = array<i64: 1, 1, 128>}]} {
    %c8_i32 = arith.constant 8 : i32
    %0 = arith.muli %arg1, %c8_i32 : i32
    %cst = arith.constant 0.000000e+00 : f32
    %1 = vector.broadcast %cst : f32 to vector<64x128xf32>
    %c0_i32 = arith.constant 0 : i32
    %2 = arith.addi %0, %c0_i32 : i32
    %c0 = arith.constant 0 : index
    %3 = arith.index_cast %2 : i32 to index
    %c0_0 = arith.constant 0 : index
    %c0_1 = arith.constant 0 : index
    %4 = vector.load %arg2[%c0, %3, %c0_0, %c0_1] : memref<4x10x10x4xbf16, #tpu.memory_space<vmem>>, vector<1x8x8x4xbf16>
    %5 = vector.shape_cast %4 : vector<1x8x8x4xbf16> to vector<8x8x4xbf16>
    %6 = vector.shape_cast %5 : vector<8x8x4xbf16> to vector<64x4xbf16>
    %c0_2 = arith.constant 0 : index
    %c0_3 = arith.constant 0 : index
    %c0_4 = arith.constant 0 : index
    %c0_5 = arith.constant 0 : index
    %7 = vector.load %arg3[%c0_2, %c0_3, %c0_4, %c0_5] : memref<5x5x4x128xbf16, #tpu.memory_space<vmem>>, vector<1x1x4x128xbf16>
    %8 = vector.shape_cast %7 : vector<1x1x4x128xbf16> to vector<4x128xbf16>
    %cst_6 = arith.constant dense<0.000000e+00> : vector<64x128xf32>
    %9 = tpu.matmul %6, %8, %cst_6 {dimension_numbers = #tpu.dot_dimension_numbers<[1], [0], [0], [1], [0, 0, 1, 1], [], []>} : vector<64x4xbf16>, vector<4x128xbf16>, vector<64x128xf32> -> vector<64x128xf32>
    %10 = arith.addf %1, %9 : vector<64x128xf32>
    %c0_i32_7 = arith.constant 0 : i32
    %11 = arith.addi %0, %c0_i32_7 : i32
    %c1 = arith.constant 1 : index
    %12 = arith.index_cast %11 : i32 to index
    %c0_8 = arith.constant 0 : index
    %c0_9 = arith.constant 0 : index
    %13 = vector.load %arg2[%c1, %12, %c0_8, %c0_9] : memref<4x10x10x4xbf16, #tpu.memory_space<vmem>>, vector<1x8x8x4xbf16>
    %14 = vector.shape_cast %13 : vector<1x8x8x4xbf16> to vector<8x8x4xbf16>
    %15 = vector.shape_cast %14 : vector<8x8x4xbf16> to vector<64x4xbf16>
    %c0_10 = arith.constant 0 : index
    %c1_11 = arith.constant 1 : index
    %c0_12 = arith.constant 0 : index
    %c0_13 = arith.constant 0 : index
    %16 = vector.load %arg3[%c0_10, %c1_11, %c0_12, %c0_13] : memref<5x5x4x128xbf16, #tpu.memory_space<vmem>>, vector<1x1x4x128xbf16>
    %17 = vector.shape_cast %16 : vector<1x1x4x128xbf16> to vector<4x128xbf16>
    %cst_14 = arith.constant dense<0.000000e+00> : vector<64x128xf32>
    %18 = tpu.matmul %15, %17, %cst_14 {dimension_numbers = #tpu.dot_dimension_numbers<[1], [0], [0], [1], [0, 0, 1, 1], [], []>} : vector<64x4xbf16>, vector<4x128xbf16>, vector<64x128xf32> -> vector<64x128xf32>
    %19 = arith.addf %10, %18 : vector<64x128xf32>
    %c0_i32_15 = arith.constant 0 : i32
    %20 = arith.addi %0, %c0_i32_15 : i32
    %c0_16 = arith.constant 0 : index
    %21 = arith.index_cast %20 : i32 to index
    %c1_17 = arith.constant 1 : index
    %c0_18 = arith.constant 0 : index
    %22 = vector.load %arg2[%c0_16, %21, %c1_17, %c0_18] : memref<4x10x10x4xbf16, #tpu.memory_space<vmem>>, vector<1x8x8x4xbf16>
    %23 = vector.shape_cast %22 : vector<1x8x8x4xbf16> to vector<8x8x4xbf16>
    %24 = vector.shape_cast %23 : vector<8x8x4xbf16> to vector<64x4xbf16>
    %c0_19 = arith.constant 0 : index
    %c2 = arith.constant 2 : index
    %c0_20 = arith.constant 0 : index
    %c0_21 = arith.constant 0 : index
    %25 = vector.load %arg3[%c0_19, %c2, %c0_20, %c0_21] : memref<5x5x4x128xbf16, #tpu.memory_space<vmem>>, vector<1x1x4x128xbf16>
    %26 = vector.shape_cast %25 : vector<1x1x4x128xbf16> to vector<4x128xbf16>
    %cst_22 = arith.constant dense<0.000000e+00> : vector<64x128xf32>
    %27 = tpu.matmul %24, %26, %cst_22 {dimension_numbers = #tpu.dot_dimension_numbers<[1], [0], [0], [1], [0, 0, 1, 1], [], []>} : vector<64x4xbf16>, vector<4x128xbf16>, vector<64x128xf32> -> vector<64x128xf32>
    %28 = arith.addf %19, %27 : vector<64x128xf32>
    %c0_i32_23 = arith.constant 0 : i32
    %29 = arith.addi %0, %c0_i32_23 : i32
    %c1_24 = arith.constant 1 : index
    %30 = arith.index_cast %29 : i32 to index
    %c1_25 = arith.constant 1 : index
    %c0_26 = arith.constant 0 : index
    %31 = vector.load %arg2[%c1_24, %30, %c1_25, %c0_26] : memref<4x10x10x4xbf16, #tpu.memory_space<vmem>>, vector<1x8x8x4xbf16>
    %32 = vector.shape_cast %31 : vector<1x8x8x4xbf16> to vector<8x8x4xbf16>
    %33 = vector.shape_cast %32 : vector<8x8x4xbf16> to vector<64x4xbf16>
    %c0_27 = arith.constant 0 : index
    %c3 = arith.constant 3 : index
    %c0_28 = arith.constant 0 : index
    %c0_29 = arith.constant 0 : index
    %34 = vector.load %arg3[%c0_27, %c3, %c0_28, %c0_29] : memref<5x5x4x128xbf16, #tpu.memory_space<vmem>>, vector<1x1x4x128xbf16>
    %35 = vector.shape_cast %34 : vector<1x1x4x128xbf16> to vector<4x128xbf16>
    %cst_30 = arith.constant dense<0.000000e+00> : vector<64x128xf32>
    %36 = tpu.matmul %33, %35, %cst_30 {dimension_numbers = #tpu.dot_dimension_numbers<[1], [0], [0], [1], [0, 0, 1, 1], [], []>} : vector<64x4xbf16>, vector<4x128xbf16>, vector<64x128xf32> -> vector<64x128xf32>
    %37 = arith.addf %28, %36 : vector<64x128xf32>
    %c0_i32_31 = arith.constant 0 : i32
    %38 = arith.addi %0, %c0_i32_31 : i32
    %c0_32 = arith.constant 0 : index
    %39 = arith.index_cast %38 : i32 to index
    %c2_33 = arith.constant 2 : index
    %c0_34 = arith.constant 0 : index
    %40 = vector.load %arg2[%c0_32, %39, %c2_33, %c0_34] : memref<4x10x10x4xbf16, #tpu.memory_space<vmem>>, vector<1x8x8x4xbf16>
    %41 = vector.shape_cast %40 : vector<1x8x8x4xbf16> to vector<8x8x4xbf16>
    %42 = vector.shape_cast %41 : vector<8x8x4xbf16> to vector<64x4xbf16>
    %c0_35 = arith.constant 0 : index
    %c4 = arith.constant 4 : index
    %c0_36 = arith.constant 0 : index
    %c0_37 = arith.constant 0 : index
    %43 = vector.load %arg3[%c0_35, %c4, %c0_36, %c0_37] : memref<5x5x4x128xbf16, #tpu.memory_space<vmem>>, vector<1x1x4x128xbf16>
    %44 = vector.shape_cast %43 : vector<1x1x4x128xbf16> to vector<4x128xbf16>
    %cst_38 = arith.constant dense<0.000000e+00> : vector<64x128xf32>
    %45 = tpu.matmul %42, %44, %cst_38 {dimension_numbers = #tpu.dot_dimension_numbers<[1], [0], [0], [1], [0, 0, 1, 1], [], []>} : vector<64x4xbf16>, vector<4x128xbf16>, vector<64x128xf32> -> vector<64x128xf32>
    %46 = arith.addf %37, %45 : vector<64x128xf32>
    %c0_i32_39 = arith.constant 0 : i32
    %47 = arith.addi %0, %c0_i32_39 : i32
    %c2_40 = arith.constant 2 : index
    %48 = arith.index_cast %47 : i32 to index
    %c0_41 = arith.constant 0 : index
    %c0_42 = arith.constant 0 : index
    %49 = vector.load %arg2[%c2_40, %48, %c0_41, %c0_42] : memref<4x10x10x4xbf16, #tpu.memory_space<vmem>>, vector<1x8x8x4xbf16>
    %50 = vector.shape_cast %49 : vector<1x8x8x4xbf16> to vector<8x8x4xbf16>
    %51 = vector.shape_cast %50 : vector<8x8x4xbf16> to vector<64x4xbf16>
    %c1_43 = arith.constant 1 : index
    %c0_44 = arith.constant 0 : index
    %c0_45 = arith.constant 0 : index
    %c0_46 = arith.constant 0 : index
    %52 = vector.load %arg3[%c1_43, %c0_44, %c0_45, %c0_46] : memref<5x5x4x128xbf16, #tpu.memory_space<vmem>>, vector<1x1x4x128xbf16>
    %53 = vector.shape_cast %52 : vector<1x1x4x128xbf16> to vector<4x128xbf16>
    %cst_47 = arith.constant dense<0.000000e+00> : vector<64x128xf32>
    %54 = tpu.matmul %51, %53, %cst_47 {dimension_numbers = #tpu.dot_dimension_numbers<[1], [0], [0], [1], [0, 0, 1, 1], [], []>} : vector<64x4xbf16>, vector<4x128xbf16>, vector<64x128xf32> -> vector<64x128xf32>
    %55 = arith.addf %46, %54 : vector<64x128xf32>
    %c0_i32_48 = arith.constant 0 : i32
    %56 = arith.addi %0, %c0_i32_48 : i32
    %c3_49 = arith.constant 3 : index
    %57 = arith.index_cast %56 : i32 to index
    %c0_50 = arith.constant 0 : index
    %c0_51 = arith.constant 0 : index
    %58 = vector.load %arg2[%c3_49, %57, %c0_50, %c0_51] : memref<4x10x10x4xbf16, #tpu.memory_space<vmem>>, vector<1x8x8x4xbf16>
    %59 = vector.shape_cast %58 : vector<1x8x8x4xbf16> to vector<8x8x4xbf16>
    %60 = vector.shape_cast %59 : vector<8x8x4xbf16> to vector<64x4xbf16>
    %c1_52 = arith.constant 1 : index
    %c1_53 = arith.constant 1 : index
    %c0_54 = arith.constant 0 : index
    %c0_55 = arith.constant 0 : index
    %61 = vector.load %arg3[%c1_52, %c1_53, %c0_54, %c0_55] : memref<5x5x4x128xbf16, #tpu.memory_space<vmem>>, vector<1x1x4x128xbf16>
    %62 = vector.shape_cast %61 : vector<1x1x4x128xbf16> to vector<4x128xbf16>
    %cst_56 = arith.constant dense<0.000000e+00> : vector<64x128xf32>
    %63 = tpu.matmul %60, %62, %cst_56 {dimension_numbers = #tpu.dot_dimension_numbers<[1], [0], [0], [1], [0, 0, 1, 1], [], []>} : vector<64x4xbf16>, vector<4x128xbf16>, vector<64x128xf32> -> vector<64x128xf32>
    %64 = arith.addf %55, %63 : vector<64x128xf32>
    %c0_i32_57 = arith.constant 0 : i32
    %65 = arith.addi %0, %c0_i32_57 : i32
    %c2_58 = arith.constant 2 : index
    %66 = arith.index_cast %65 : i32 to index
    %c1_59 = arith.constant 1 : index
    %c0_60 = arith.constant 0 : index
    %67 = vector.load %arg2[%c2_58, %66, %c1_59, %c0_60] : memref<4x10x10x4xbf16, #tpu.memory_space<vmem>>, vector<1x8x8x4xbf16>
    %68 = vector.shape_cast %67 : vector<1x8x8x4xbf16> to vector<8x8x4xbf16>
    %69 = vector.shape_cast %68 : vector<8x8x4xbf16> to vector<64x4xbf16>
    %c1_61 = arith.constant 1 : index
    %c2_62 = arith.constant 2 : index
    %c0_63 = arith.constant 0 : index
    %c0_64 = arith.constant 0 : index
    %70 = vector.load %arg3[%c1_61, %c2_62, %c0_63, %c0_64] : memref<5x5x4x128xbf16, #tpu.memory_space<vmem>>, vector<1x1x4x128xbf16>
    %71 = vector.shape_cast %70 : vector<1x1x4x128xbf16> to vector<4x128xbf16>
    %cst_65 = arith.constant dense<0.000000e+00> : vector<64x128xf32>
    %72 = tpu.matmul %69, %71, %cst_65 {dimension_numbers = #tpu.dot_dimension_numbers<[1], [0], [0], [1], [0, 0, 1, 1], [], []>} : vector<64x4xbf16>, vector<4x128xbf16>, vector<64x128xf32> -> vector<64x128xf32>
    %73 = arith.addf %64, %72 : vector<64x128xf32>
    %c0_i32_66 = arith.constant 0 : i32
    %74 = arith.addi %0, %c0_i32_66 : i32
    %c3_67 = arith.constant 3 : index
    %75 = arith.index_cast %74 : i32 to index
    %c1_68 = arith.constant 1 : index
    %c0_69 = arith.constant 0 : index
    %76 = vector.load %arg2[%c3_67, %75, %c1_68, %c0_69] : memref<4x10x10x4xbf16, #tpu.memory_space<vmem>>, vector<1x8x8x4xbf16>
    %77 = vector.shape_cast %76 : vector<1x8x8x4xbf16> to vector<8x8x4xbf16>
    %78 = vector.shape_cast %77 : vector<8x8x4xbf16> to vector<64x4xbf16>
    %c1_70 = arith.constant 1 : index
    %c3_71 = arith.constant 3 : index
    %c0_72 = arith.constant 0 : index
    %c0_73 = arith.constant 0 : index
    %79 = vector.load %arg3[%c1_70, %c3_71, %c0_72, %c0_73] : memref<5x5x4x128xbf16, #tpu.memory_space<vmem>>, vector<1x1x4x128xbf16>
    %80 = vector.shape_cast %79 : vector<1x1x4x128xbf16> to vector<4x128xbf16>
    %cst_74 = arith.constant dense<0.000000e+00> : vector<64x128xf32>
    %81 = tpu.matmul %78, %80, %cst_74 {dimension_numbers = #tpu.dot_dimension_numbers<[1], [0], [0], [1], [0, 0, 1, 1], [], []>} : vector<64x4xbf16>, vector<4x128xbf16>, vector<64x128xf32> -> vector<64x128xf32>
    %82 = arith.addf %73, %81 : vector<64x128xf32>
    %c0_i32_75 = arith.constant 0 : i32
    %83 = arith.addi %0, %c0_i32_75 : i32
    %c2_76 = arith.constant 2 : index
    %84 = arith.index_cast %83 : i32 to index
    %c2_77 = arith.constant 2 : index
    %c0_78 = arith.constant 0 : index
    %85 = vector.load %arg2[%c2_76, %84, %c2_77, %c0_78] : memref<4x10x10x4xbf16, #tpu.memory_space<vmem>>, vector<1x8x8x4xbf16>
    %86 = vector.shape_cast %85 : vector<1x8x8x4xbf16> to vector<8x8x4xbf16>
    %87 = vector.shape_cast %86 : vector<8x8x4xbf16> to vector<64x4xbf16>
    %c1_79 = arith.constant 1 : index
    %c4_80 = arith.constant 4 : index
    %c0_81 = arith.constant 0 : index
    %c0_82 = arith.constant 0 : index
    %88 = vector.load %arg3[%c1_79, %c4_80, %c0_81, %c0_82] : memref<5x5x4x128xbf16, #tpu.memory_space<vmem>>, vector<1x1x4x128xbf16>
    %89 = vector.shape_cast %88 : vector<1x1x4x128xbf16> to vector<4x128xbf16>
    %cst_83 = arith.constant dense<0.000000e+00> : vector<64x128xf32>
    %90 = tpu.matmul %87, %89, %cst_83 {dimension_numbers = #tpu.dot_dimension_numbers<[1], [0], [0], [1], [0, 0, 1, 1], [], []>} : vector<64x4xbf16>, vector<4x128xbf16>, vector<64x128xf32> -> vector<64x128xf32>
    %91 = arith.addf %82, %90 : vector<64x128xf32>
    %c1_i32 = arith.constant 1 : i32
    %92 = arith.addi %0, %c1_i32 : i32
    %c0_84 = arith.constant 0 : index
    %93 = arith.index_cast %92 : i32 to index
    %c0_85 = arith.constant 0 : index
    %c0_86 = arith.constant 0 : index
    %94 = vector.load %arg2[%c0_84, %93, %c0_85, %c0_86] : memref<4x10x10x4xbf16, #tpu.memory_space<vmem>>, vector<1x8x8x4xbf16>
    %95 = vector.shape_cast %94 : vector<1x8x8x4xbf16> to vector<8x8x4xbf16>
    %96 = vector.shape_cast %95 : vector<8x8x4xbf16> to vector<64x4xbf16>
    %c2_87 = arith.constant 2 : index
    %c0_88 = arith.constant 0 : index
    %c0_89 = arith.constant 0 : index
    %c0_90 = arith.constant 0 : index
    %97 = vector.load %arg3[%c2_87, %c0_88, %c0_89, %c0_90] : memref<5x5x4x128xbf16, #tpu.memory_space<vmem>>, vector<1x1x4x128xbf16>
    %98 = vector.shape_cast %97 : vector<1x1x4x128xbf16> to vector<4x128xbf16>
    %cst_91 = arith.constant dense<0.000000e+00> : vector<64x128xf32>
    %99 = tpu.matmul %96, %98, %cst_91 {dimension_numbers = #tpu.dot_dimension_numbers<[1], [0], [0], [1], [0, 0, 1, 1], [], []>} : vector<64x4xbf16>, vector<4x128xbf16>, vector<64x128xf32> -> vector<64x128xf32>
    %100 = arith.addf %91, %99 : vector<64x128xf32>
    %c1_i32_92 = arith.constant 1 : i32
    %101 = arith.addi %0, %c1_i32_92 : i32
    %c1_93 = arith.constant 1 : index
    %102 = arith.index_cast %101 : i32 to index
    %c0_94 = arith.constant 0 : index
    %c0_95 = arith.constant 0 : index
    %103 = vector.load %arg2[%c1_93, %102, %c0_94, %c0_95] : memref<4x10x10x4xbf16, #tpu.memory_space<vmem>>, vector<1x8x8x4xbf16>
    %104 = vector.shape_cast %103 : vector<1x8x8x4xbf16> to vector<8x8x4xbf16>
    %105 = vector.shape_cast %104 : vector<8x8x4xbf16> to vector<64x4xbf16>
    %c2_96 = arith.constant 2 : index
    %c1_97 = arith.constant 1 : index
    %c0_98 = arith.constant 0 : index
    %c0_99 = arith.constant 0 : index
    %106 = vector.load %arg3[%c2_96, %c1_97, %c0_98, %c0_99] : memref<5x5x4x128xbf16, #tpu.memory_space<vmem>>, vector<1x1x4x128xbf16>
    %107 = vector.shape_cast %106 : vector<1x1x4x128xbf16> to vector<4x128xbf16>
    %cst_100 = arith.constant dense<0.000000e+00> : vector<64x128xf32>
    %108 = tpu.matmul %105, %107, %cst_100 {dimension_numbers = #tpu.dot_dimension_numbers<[1], [0], [0], [1], [0, 0, 1, 1], [], []>} : vector<64x4xbf16>, vector<4x128xbf16>, vector<64x128xf32> -> vector<64x128xf32>
    %109 = arith.addf %100, %108 : vector<64x128xf32>
    %c1_i32_101 = arith.constant 1 : i32
    %110 = arith.addi %0, %c1_i32_101 : i32
    %c0_102 = arith.constant 0 : index
    %111 = arith.index_cast %110 : i32 to index
    %c1_103 = arith.constant 1 : index
    %c0_104 = arith.constant 0 : index
    %112 = vector.load %arg2[%c0_102, %111, %c1_103, %c0_104] : memref<4x10x10x4xbf16, #tpu.memory_space<vmem>>, vector<1x8x8x4xbf16>
    %113 = vector.shape_cast %112 : vector<1x8x8x4xbf16> to vector<8x8x4xbf16>
    %114 = vector.shape_cast %113 : vector<8x8x4xbf16> to vector<64x4xbf16>
    %c2_105 = arith.constant 2 : index
    %c2_106 = arith.constant 2 : index
    %c0_107 = arith.constant 0 : index
    %c0_108 = arith.constant 0 : index
    %115 = vector.load %arg3[%c2_105, %c2_106, %c0_107, %c0_108] : memref<5x5x4x128xbf16, #tpu.memory_space<vmem>>, vector<1x1x4x128xbf16>
    %116 = vector.shape_cast %115 : vector<1x1x4x128xbf16> to vector<4x128xbf16>
    %cst_109 = arith.constant dense<0.000000e+00> : vector<64x128xf32>
    %117 = tpu.matmul %114, %116, %cst_109 {dimension_numbers = #tpu.dot_dimension_numbers<[1], [0], [0], [1], [0, 0, 1, 1], [], []>} : vector<64x4xbf16>, vector<4x128xbf16>, vector<64x128xf32> -> vector<64x128xf32>
    %118 = arith.addf %109, %117 : vector<64x128xf32>
    %c1_i32_110 = arith.constant 1 : i32
    %119 = arith.addi %0, %c1_i32_110 : i32
    %c1_111 = arith.constant 1 : index
    %120 = arith.index_cast %119 : i32 to index
    %c1_112 = arith.constant 1 : index
    %c0_113 = arith.constant 0 : index
    %121 = vector.load %arg2[%c1_111, %120, %c1_112, %c0_113] : memref<4x10x10x4xbf16, #tpu.memory_space<vmem>>, vector<1x8x8x4xbf16>
    %122 = vector.shape_cast %121 : vector<1x8x8x4xbf16> to vector<8x8x4xbf16>
    %123 = vector.shape_cast %122 : vector<8x8x4xbf16> to vector<64x4xbf16>
    %c2_114 = arith.constant 2 : index
    %c3_115 = arith.constant 3 : index
    %c0_116 = arith.constant 0 : index
    %c0_117 = arith.constant 0 : index
    %124 = vector.load %arg3[%c2_114, %c3_115, %c0_116, %c0_117] : memref<5x5x4x128xbf16, #tpu.memory_space<vmem>>, vector<1x1x4x128xbf16>
    %125 = vector.shape_cast %124 : vector<1x1x4x128xbf16> to vector<4x128xbf16>
    %cst_118 = arith.constant dense<0.000000e+00> : vector<64x128xf32>
    %126 = tpu.matmul %123, %125, %cst_118 {dimension_numbers = #tpu.dot_dimension_numbers<[1], [0], [0], [1], [0, 0, 1, 1], [], []>} : vector<64x4xbf16>, vector<4x128xbf16>, vector<64x128xf32> -> vector<64x128xf32>
    %127 = arith.addf %118, %126 : vector<64x128xf32>
    %c1_i32_119 = arith.constant 1 : i32
    %128 = arith.addi %0, %c1_i32_119 : i32
    %c0_120 = arith.constant 0 : index
    %129 = arith.index_cast %128 : i32 to index
    %c2_121 = arith.constant 2 : index
    %c0_122 = arith.constant 0 : index
    %130 = vector.load %arg2[%c0_120, %129, %c2_121, %c0_122] : memref<4x10x10x4xbf16, #tpu.memory_space<vmem>>, vector<1x8x8x4xbf16>
    %131 = vector.shape_cast %130 : vector<1x8x8x4xbf16> to vector<8x8x4xbf16>
    %132 = vector.shape_cast %131 : vector<8x8x4xbf16> to vector<64x4xbf16>
    %c2_123 = arith.constant 2 : index
    %c4_124 = arith.constant 4 : index
    %c0_125 = arith.constant 0 : index
    %c0_126 = arith.constant 0 : index
    %133 = vector.load %arg3[%c2_123, %c4_124, %c0_125, %c0_126] : memref<5x5x4x128xbf16, #tpu.memory_space<vmem>>, vector<1x1x4x128xbf16>
    %134 = vector.shape_cast %133 : vector<1x1x4x128xbf16> to vector<4x128xbf16>
    %cst_127 = arith.constant dense<0.000000e+00> : vector<64x128xf32>
    %135 = tpu.matmul %132, %134, %cst_127 {dimension_numbers = #tpu.dot_dimension_numbers<[1], [0], [0], [1], [0, 0, 1, 1], [], []>} : vector<64x4xbf16>, vector<4x128xbf16>, vector<64x128xf32> -> vector<64x128xf32>
    %136 = arith.addf %127, %135 : vector<64x128xf32>
    %c1_i32_128 = arith.constant 1 : i32
    %137 = arith.addi %0, %c1_i32_128 : i32
    %c2_129 = arith.constant 2 : index
    %138 = arith.index_cast %137 : i32 to index
    %c0_130 = arith.constant 0 : index
    %c0_131 = arith.constant 0 : index
    %139 = vector.load %arg2[%c2_129, %138, %c0_130, %c0_131] : memref<4x10x10x4xbf16, #tpu.memory_space<vmem>>, vector<1x8x8x4xbf16>
    %140 = vector.shape_cast %139 : vector<1x8x8x4xbf16> to vector<8x8x4xbf16>
    %141 = vector.shape_cast %140 : vector<8x8x4xbf16> to vector<64x4xbf16>
    %c3_132 = arith.constant 3 : index
    %c0_133 = arith.constant 0 : index
    %c0_134 = arith.constant 0 : index
    %c0_135 = arith.constant 0 : index
    %142 = vector.load %arg3[%c3_132, %c0_133, %c0_134, %c0_135] : memref<5x5x4x128xbf16, #tpu.memory_space<vmem>>, vector<1x1x4x128xbf16>
    %143 = vector.shape_cast %142 : vector<1x1x4x128xbf16> to vector<4x128xbf16>
    %cst_136 = arith.constant dense<0.000000e+00> : vector<64x128xf32>
    %144 = tpu.matmul %141, %143, %cst_136 {dimension_numbers = #tpu.dot_dimension_numbers<[1], [0], [0], [1], [0, 0, 1, 1], [], []>} : vector<64x4xbf16>, vector<4x128xbf16>, vector<64x128xf32> -> vector<64x128xf32>
    %145 = arith.addf %136, %144 : vector<64x128xf32>
    %c1_i32_137 = arith.constant 1 : i32
    %146 = arith.addi %0, %c1_i32_137 : i32
    %c3_138 = arith.constant 3 : index
    %147 = arith.index_cast %146 : i32 to index
    %c0_139 = arith.constant 0 : index
    %c0_140 = arith.constant 0 : index
    %148 = vector.load %arg2[%c3_138, %147, %c0_139, %c0_140] : memref<4x10x10x4xbf16, #tpu.memory_space<vmem>>, vector<1x8x8x4xbf16>
    %149 = vector.shape_cast %148 : vector<1x8x8x4xbf16> to vector<8x8x4xbf16>
    %150 = vector.shape_cast %149 : vector<8x8x4xbf16> to vector<64x4xbf16>
    %c3_141 = arith.constant 3 : index
    %c1_142 = arith.constant 1 : index
    %c0_143 = arith.constant 0 : index
    %c0_144 = arith.constant 0 : index
    %151 = vector.load %arg3[%c3_141, %c1_142, %c0_143, %c0_144] : memref<5x5x4x128xbf16, #tpu.memory_space<vmem>>, vector<1x1x4x128xbf16>
    %152 = vector.shape_cast %151 : vector<1x1x4x128xbf16> to vector<4x128xbf16>
    %cst_145 = arith.constant dense<0.000000e+00> : vector<64x128xf32>
    %153 = tpu.matmul %150, %152, %cst_145 {dimension_numbers = #tpu.dot_dimension_numbers<[1], [0], [0], [1], [0, 0, 1, 1], [], []>} : vector<64x4xbf16>, vector<4x128xbf16>, vector<64x128xf32> -> vector<64x128xf32>
    %154 = arith.addf %145, %153 : vector<64x128xf32>
    %c1_i32_146 = arith.constant 1 : i32
    %155 = arith.addi %0, %c1_i32_146 : i32
    %c2_147 = arith.constant 2 : index
    %156 = arith.index_cast %155 : i32 to index
    %c1_148 = arith.constant 1 : index
    %c0_149 = arith.constant 0 : index
    %157 = vector.load %arg2[%c2_147, %156, %c1_148, %c0_149] : memref<4x10x10x4xbf16, #tpu.memory_space<vmem>>, vector<1x8x8x4xbf16>
    %158 = vector.shape_cast %157 : vector<1x8x8x4xbf16> to vector<8x8x4xbf16>
    %159 = vector.shape_cast %158 : vector<8x8x4xbf16> to vector<64x4xbf16>
    %c3_150 = arith.constant 3 : index
    %c2_151 = arith.constant 2 : index
    %c0_152 = arith.constant 0 : index
    %c0_153 = arith.constant 0 : index
    %160 = vector.load %arg3[%c3_150, %c2_151, %c0_152, %c0_153] : memref<5x5x4x128xbf16, #tpu.memory_space<vmem>>, vector<1x1x4x128xbf16>
    %161 = vector.shape_cast %160 : vector<1x1x4x128xbf16> to vector<4x128xbf16>
    %cst_154 = arith.constant dense<0.000000e+00> : vector<64x128xf32>
    %162 = tpu.matmul %159, %161, %cst_154 {dimension_numbers = #tpu.dot_dimension_numbers<[1], [0], [0], [1], [0, 0, 1, 1], [], []>} : vector<64x4xbf16>, vector<4x128xbf16>, vector<64x128xf32> -> vector<64x128xf32>
    %163 = arith.addf %154, %162 : vector<64x128xf32>
    %c1_i32_155 = arith.constant 1 : i32
    %164 = arith.addi %0, %c1_i32_155 : i32
    %c3_156 = arith.constant 3 : index
    %165 = arith.index_cast %164 : i32 to index
    %c1_157 = arith.constant 1 : index
    %c0_158 = arith.constant 0 : index
    %166 = vector.load %arg2[%c3_156, %165, %c1_157, %c0_158] : memref<4x10x10x4xbf16, #tpu.memory_space<vmem>>, vector<1x8x8x4xbf16>
    %167 = vector.shape_cast %166 : vector<1x8x8x4xbf16> to vector<8x8x4xbf16>
    %168 = vector.shape_cast %167 : vector<8x8x4xbf16> to vector<64x4xbf16>
    %c3_159 = arith.constant 3 : index
    %c3_160 = arith.constant 3 : index
    %c0_161 = arith.constant 0 : index
    %c0_162 = arith.constant 0 : index
    %169 = vector.load %arg3[%c3_159, %c3_160, %c0_161, %c0_162] : memref<5x5x4x128xbf16, #tpu.memory_space<vmem>>, vector<1x1x4x128xbf16>
    %170 = vector.shape_cast %169 : vector<1x1x4x128xbf16> to vector<4x128xbf16>
    %cst_163 = arith.constant dense<0.000000e+00> : vector<64x128xf32>
    %171 = tpu.matmul %168, %170, %cst_163 {dimension_numbers = #tpu.dot_dimension_numbers<[1], [0], [0], [1], [0, 0, 1, 1], [], []>} : vector<64x4xbf16>, vector<4x128xbf16>, vector<64x128xf32> -> vector<64x128xf32>
    %172 = arith.addf %163, %171 : vector<64x128xf32>
    %c1_i32_164 = arith.constant 1 : i32
    %173 = arith.addi %0, %c1_i32_164 : i32
    %c2_165 = arith.constant 2 : index
    %174 = arith.index_cast %173 : i32 to index
    %c2_166 = arith.constant 2 : index
    %c0_167 = arith.constant 0 : index
    %175 = vector.load %arg2[%c2_165, %174, %c2_166, %c0_167] : memref<4x10x10x4xbf16, #tpu.memory_space<vmem>>, vector<1x8x8x4xbf16>
    %176 = vector.shape_cast %175 : vector<1x8x8x4xbf16> to vector<8x8x4xbf16>
    %177 = vector.shape_cast %176 : vector<8x8x4xbf16> to vector<64x4xbf16>
    %c3_168 = arith.constant 3 : index
    %c4_169 = arith.constant 4 : index
    %c0_170 = arith.constant 0 : index
    %c0_171 = arith.constant 0 : index
    %178 = vector.load %arg3[%c3_168, %c4_169, %c0_170, %c0_171] : memref<5x5x4x128xbf16, #tpu.memory_space<vmem>>, vector<1x1x4x128xbf16>
    %179 = vector.shape_cast %178 : vector<1x1x4x128xbf16> to vector<4x128xbf16>
    %cst_172 = arith.constant dense<0.000000e+00> : vector<64x128xf32>
    %180 = tpu.matmul %177, %179, %cst_172 {dimension_numbers = #tpu.dot_dimension_numbers<[1], [0], [0], [1], [0, 0, 1, 1], [], []>} : vector<64x4xbf16>, vector<4x128xbf16>, vector<64x128xf32> -> vector<64x128xf32>
    %181 = arith.addf %172, %180 : vector<64x128xf32>
    %c2_i32 = arith.constant 2 : i32
    %182 = arith.addi %0, %c2_i32 : i32
    %c0_173 = arith.constant 0 : index
    %183 = arith.index_cast %182 : i32 to index
    %c0_174 = arith.constant 0 : index
    %c0_175 = arith.constant 0 : index
    %184 = vector.load %arg2[%c0_173, %183, %c0_174, %c0_175] : memref<4x10x10x4xbf16, #tpu.memory_space<vmem>>, vector<1x8x8x4xbf16>
    %185 = vector.shape_cast %184 : vector<1x8x8x4xbf16> to vector<8x8x4xbf16>
    %186 = vector.shape_cast %185 : vector<8x8x4xbf16> to vector<64x4xbf16>
    %c4_176 = arith.constant 4 : index
    %c0_177 = arith.constant 0 : index
    %c0_178 = arith.constant 0 : index
    %c0_179 = arith.constant 0 : index
    %187 = vector.load %arg3[%c4_176, %c0_177, %c0_178, %c0_179] : memref<5x5x4x128xbf16, #tpu.memory_space<vmem>>, vector<1x1x4x128xbf16>
    %188 = vector.shape_cast %187 : vector<1x1x4x128xbf16> to vector<4x128xbf16>
    %cst_180 = arith.constant dense<0.000000e+00> : vector<64x128xf32>
    %189 = tpu.matmul %186, %188, %cst_180 {dimension_numbers = #tpu.dot_dimension_numbers<[1], [0], [0], [1], [0, 0, 1, 1], [], []>} : vector<64x4xbf16>, vector<4x128xbf16>, vector<64x128xf32> -> vector<64x128xf32>
    %190 = arith.addf %181, %189 : vector<64x128xf32>
    %c2_i32_181 = arith.constant 2 : i32
    %191 = arith.addi %0, %c2_i32_181 : i32
    %c1_182 = arith.constant 1 : index
    %192 = arith.index_cast %191 : i32 to index
    %c0_183 = arith.constant 0 : index
    %c0_184 = arith.constant 0 : index
    %193 = vector.load %arg2[%c1_182, %192, %c0_183, %c0_184] : memref<4x10x10x4xbf16, #tpu.memory_space<vmem>>, vector<1x8x8x4xbf16>
    %194 = vector.shape_cast %193 : vector<1x8x8x4xbf16> to vector<8x8x4xbf16>
    %195 = vector.shape_cast %194 : vector<8x8x4xbf16> to vector<64x4xbf16>
    %c4_185 = arith.constant 4 : index
    %c1_186 = arith.constant 1 : index
    %c0_187 = arith.constant 0 : index
    %c0_188 = arith.constant 0 : index
    %196 = vector.load %arg3[%c4_185, %c1_186, %c0_187, %c0_188] : memref<5x5x4x128xbf16, #tpu.memory_space<vmem>>, vector<1x1x4x128xbf16>
    %197 = vector.shape_cast %196 : vector<1x1x4x128xbf16> to vector<4x128xbf16>
    %cst_189 = arith.constant dense<0.000000e+00> : vector<64x128xf32>
    %198 = tpu.matmul %195, %197, %cst_189 {dimension_numbers = #tpu.dot_dimension_numbers<[1], [0], [0], [1], [0, 0, 1, 1], [], []>} : vector<64x4xbf16>, vector<4x128xbf16>, vector<64x128xf32> -> vector<64x128xf32>
    %199 = arith.addf %190, %198 : vector<64x128xf32>
    %c2_i32_190 = arith.constant 2 : i32
    %200 = arith.addi %0, %c2_i32_190 : i32
    %c0_191 = arith.constant 0 : index
    %201 = arith.index_cast %200 : i32 to index
    %c1_192 = arith.constant 1 : index
    %c0_193 = arith.constant 0 : index
    %202 = vector.load %arg2[%c0_191, %201, %c1_192, %c0_193] : memref<4x10x10x4xbf16, #tpu.memory_space<vmem>>, vector<1x8x8x4xbf16>
    %203 = vector.shape_cast %202 : vector<1x8x8x4xbf16> to vector<8x8x4xbf16>
    %204 = vector.shape_cast %203 : vector<8x8x4xbf16> to vector<64x4xbf16>
    %c4_194 = arith.constant 4 : index
    %c2_195 = arith.constant 2 : index
    %c0_196 = arith.constant 0 : index
    %c0_197 = arith.constant 0 : index
    %205 = vector.load %arg3[%c4_194, %c2_195, %c0_196, %c0_197] : memref<5x5x4x128xbf16, #tpu.memory_space<vmem>>, vector<1x1x4x128xbf16>
    %206 = vector.shape_cast %205 : vector<1x1x4x128xbf16> to vector<4x128xbf16>
    %cst_198 = arith.constant dense<0.000000e+00> : vector<64x128xf32>
    %207 = tpu.matmul %204, %206, %cst_198 {dimension_numbers = #tpu.dot_dimension_numbers<[1], [0], [0], [1], [0, 0, 1, 1], [], []>} : vector<64x4xbf16>, vector<4x128xbf16>, vector<64x128xf32> -> vector<64x128xf32>
    %208 = arith.addf %199, %207 : vector<64x128xf32>
    %c2_i32_199 = arith.constant 2 : i32
    %209 = arith.addi %0, %c2_i32_199 : i32
    %c1_200 = arith.constant 1 : index
    %210 = arith.index_cast %209 : i32 to index
    %c1_201 = arith.constant 1 : index
    %c0_202 = arith.constant 0 : index
    %211 = vector.load %arg2[%c1_200, %210, %c1_201, %c0_202] : memref<4x10x10x4xbf16, #tpu.memory_space<vmem>>, vector<1x8x8x4xbf16>
    %212 = vector.shape_cast %211 : vector<1x8x8x4xbf16> to vector<8x8x4xbf16>
    %213 = vector.shape_cast %212 : vector<8x8x4xbf16> to vector<64x4xbf16>
    %c4_203 = arith.constant 4 : index
    %c3_204 = arith.constant 3 : index
    %c0_205 = arith.constant 0 : index
    %c0_206 = arith.constant 0 : index
    %214 = vector.load %arg3[%c4_203, %c3_204, %c0_205, %c0_206] : memref<5x5x4x128xbf16, #tpu.memory_space<vmem>>, vector<1x1x4x128xbf16>
    %215 = vector.shape_cast %214 : vector<1x1x4x128xbf16> to vector<4x128xbf16>
    %cst_207 = arith.constant dense<0.000000e+00> : vector<64x128xf32>
    %216 = tpu.matmul %213, %215, %cst_207 {dimension_numbers = #tpu.dot_dimension_numbers<[1], [0], [0], [1], [0, 0, 1, 1], [], []>} : vector<64x4xbf16>, vector<4x128xbf16>, vector<64x128xf32> -> vector<64x128xf32>
    %217 = arith.addf %208, %216 : vector<64x128xf32>
    %c2_i32_208 = arith.constant 2 : i32
    %218 = arith.addi %0, %c2_i32_208 : i32
    %c0_209 = arith.constant 0 : index
    %219 = arith.index_cast %218 : i32 to index
    %c2_210 = arith.constant 2 : index
    %c0_211 = arith.constant 0 : index
    %220 = vector.load %arg2[%c0_209, %219, %c2_210, %c0_211] : memref<4x10x10x4xbf16, #tpu.memory_space<vmem>>, vector<1x8x8x4xbf16>
    %221 = vector.shape_cast %220 : vector<1x8x8x4xbf16> to vector<8x8x4xbf16>
    %222 = vector.shape_cast %221 : vector<8x8x4xbf16> to vector<64x4xbf16>
    %c4_212 = arith.constant 4 : index
    %c4_213 = arith.constant 4 : index
    %c0_214 = arith.constant 0 : index
    %c0_215 = arith.constant 0 : index
    %223 = vector.load %arg3[%c4_212, %c4_213, %c0_214, %c0_215] : memref<5x5x4x128xbf16, #tpu.memory_space<vmem>>, vector<1x1x4x128xbf16>
    %224 = vector.shape_cast %223 : vector<1x1x4x128xbf16> to vector<4x128xbf16>
    %cst_216 = arith.constant dense<0.000000e+00> : vector<64x128xf32>
    %225 = tpu.matmul %222, %224, %cst_216 {dimension_numbers = #tpu.dot_dimension_numbers<[1], [0], [0], [1], [0, 0, 1, 1], [], []>} : vector<64x4xbf16>, vector<4x128xbf16>, vector<64x128xf32> -> vector<64x128xf32>
    %226 = arith.addf %217, %225 : vector<64x128xf32>
    %227 = vector.shape_cast %226 : vector<64x128xf32> to vector<8x8x128xf32>
    %228 = arith.truncf %227 : vector<8x8x128xf32> to vector<8x8x128xbf16>
    %c0_217 = arith.constant 0 : index
    %c0_218 = arith.constant 0 : index
    %c0_219 = arith.constant 0 : index
    %c0_220 = arith.constant 0 : index
    %229 = vector.load %arg4[%c0_217, %c0_218, %c0_219, %c0_220] : memref<1x8x8x128xbf16, #tpu.memory_space<vmem>>, vector<1x8x8x128xbf16>
    %230 = vector.shape_cast %229 : vector<1x8x8x128xbf16> to vector<8x8x128xbf16>
    %231 = vector.shape_cast %228 : vector<8x8x128xbf16> to vector<1x8x8x128xbf16>
    tpu.vector_store %arg4[%c0_217, %c0_218, %c0_219, %c0_220], %231 {strides = array<i32>} : memref<1x8x8x128xbf16, #tpu.memory_space<vmem>>, vector<1x8x8x128xbf16>,
    %c0_i32_221 = arith.constant 0 : i32
    %232 = arith.cmpi eq, %arg1, %c0_i32_221 : i32
    %233 = arith.extui %232 : i1 to i32
    %c0_i32_222 = arith.constant 0 : i32
    %234 = arith.cmpi ne, %233, %c0_i32_222 : i32
    scf.if %234 {
      %cst_237 = arith.constant 0.000000e+00 : f32
      %246 = vector.broadcast %cst_237 : f32 to vector<1x1x128xf32>
      %c0_238 = arith.constant 0 : index
      %c0_239 = arith.constant 0 : index
      %c0_240 = arith.constant 0 : index
      %247 = vector.load %arg5[%c0_238, %c0_239, %c0_240] : memref<1x1x128xf32, #tpu.memory_space<vmem>>, vector<1x1x128xf32>
      tpu.vector_store %arg5[%c0_238, %c0_239, %c0_240], %246 {strides = array<i32>} : memref<1x1x128xf32, #tpu.memory_space<vmem>>, vector<1x1x128xf32>,
      %cst_241 = arith.constant 0.000000e+00 : f32
      %248 = vector.broadcast %cst_241 : f32 to vector<1x1x128xf32>
      %c0_242 = arith.constant 0 : index
      %c0_243 = arith.constant 0 : index
      %c0_244 = arith.constant 0 : index
      %249 = vector.load %arg6[%c0_242, %c0_243, %c0_244] : memref<1x1x128xf32, #tpu.memory_space<vmem>>, vector<1x1x128xf32>
      tpu.vector_store %arg6[%c0_242, %c0_243, %c0_244], %248 {strides = array<i32>} : memref<1x1x128xf32, #tpu.memory_space<vmem>>, vector<1x1x128xf32>,
    } else {
    }
    %c0_223 = arith.constant 0 : index
    %c0_224 = arith.constant 0 : index
    %c0_225 = arith.constant 0 : index
    %235 = vector.load %arg5[%c0_223, %c0_224, %c0_225] : memref<1x1x128xf32, #tpu.memory_space<vmem>>, vector<1x1x128xf32>
    %cst_226 = arith.constant dense<0.000000e+00> : vector<128xf32>
    %236 = vector.multi_reduction <add>, %226, %cst_226 [0] : vector<64x128xf32> to vector<128xf32>
    %237 = vector.shape_cast %236 : vector<128xf32> to vector<1x1x128xf32>
    %238 = arith.addf %235, %237 : vector<1x1x128xf32>
    %c0_227 = arith.constant 0 : index
    %c0_228 = arith.constant 0 : index
    %c0_229 = arith.constant 0 : index
    %239 = vector.load %arg5[%c0_227, %c0_228, %c0_229] : memref<1x1x128xf32, #tpu.memory_space<vmem>>, vector<1x1x128xf32>
    tpu.vector_store %arg5[%c0_227, %c0_228, %c0_229], %238 {strides = array<i32>} : memref<1x1x128xf32, #tpu.memory_space<vmem>>, vector<1x1x128xf32>,
    %c0_230 = arith.constant 0 : index
    %c0_231 = arith.constant 0 : index
    %c0_232 = arith.constant 0 : index
    %240 = vector.load %arg6[%c0_230, %c0_231, %c0_232] : memref<1x1x128xf32, #tpu.memory_space<vmem>>, vector<1x1x128xf32>
    %241 = arith.mulf %226, %226 : vector<64x128xf32>
    %cst_233 = arith.constant dense<0.000000e+00> : vector<128xf32>
    %242 = vector.multi_reduction <add>, %241, %cst_233 [0] : vector<64x128xf32> to vector<128xf32>
    %243 = vector.shape_cast %242 : vector<128xf32> to vector<1x1x128xf32>
    %244 = arith.addf %240, %243 : vector<1x1x128xf32>
    %c0_234 = arith.constant 0 : index
    %c0_235 = arith.constant 0 : index
    %c0_236 = arith.constant 0 : index
    %245 = vector.load %arg6[%c0_234, %c0_235, %c0_236] : memref<1x1x128xf32, #tpu.memory_space<vmem>>, vector<1x1x128xf32>
    tpu.vector_store %arg6[%c0_234, %c0_235, %c0_236], %244 {strides = array<i32>} : memref<1x1x128xf32, #tpu.memory_space<vmem>>, vector<1x1x128xf32>,
    return
  }
  func.func @transform_0(%arg0: i32, %arg1: i32) -> (i32, i32, i32, i32) {
    %c0_i32 = arith.constant 0 : i32
    %c0_i32_0 = arith.constant 0 : i32
    %c0_i32_1 = arith.constant 0 : i32
    %c0_i32_2 = arith.constant 0 : i32
    return %arg0, %c0_i32, %c0_i32_0, %c0_i32_1 : i32, i32, i32, i32
  }
  func.func @transform_1(%arg0: i32, %arg1: i32) -> (i32, i32, i32, i32) {
    %c0_i32 = arith.constant 0 : i32
    %c0_i32_0 = arith.constant 0 : i32
    %c0_i32_1 = arith.constant 0 : i32
    %c0_i32_2 = arith.constant 0 : i32
    %c0_i32_3 = arith.constant 0 : i32
    return %c0_i32, %c0_i32_0, %c0_i32_1, %c0_i32_2 : i32, i32, i32, i32
  }
  func.func @transform_2(%arg0: i32, %arg1: i32) -> (i32, i32, i32, i32) {
    %c0_i32 = arith.constant 0 : i32
    %c0_i32_0 = arith.constant 0 : i32
    %c0_i32_1 = arith.constant 0 : i32
    return %arg0, %arg1, %c0_i32, %c0_i32_0 : i32, i32, i32, i32
  }
  func.func @transform_3(%arg0: i32, %arg1: i32) -> (i32, i32, i32) {
    %c0_i32 = arith.constant 0 : i32
    %c0_i32_0 = arith.constant 0 : i32
    %c0_i32_1 = arith.constant 0 : i32
    return %arg0, %c0_i32, %c0_i32_0 : i32, i32, i32
  }
  func.func @transform_4(%arg0: i32, %arg1: i32) -> (i32, i32, i32) {
    %c0_i32 = arith.constant 0 : i32
    %c0_i32_0 = arith.constant 0 : i32
    %c0_i32_1 = arith.constant 0 : i32
    return %arg0, %c0_i32, %c0_i32_0 : i32, i32, i32
  }
}

module attributes {stable_mosaic.version = 11 : i64} {
  func.func @_conv_stats_kernel(%arg0: i32, %arg1: i32, %arg2: memref<4x6x6x128xbf16, #tpu.memory_space<vmem>>, %arg3: memref<5x5x128x128xbf16, #tpu.memory_space<vmem>>, %arg4: memref<1x4x4x128xbf16, #tpu.memory_space<vmem>>, %arg5: memref<1x1x128xf32, #tpu.memory_space<vmem>>, %arg6: memref<1x1x128xf32, #tpu.memory_space<vmem>>) attributes {dimension_semantics = [#tpu.dimension_semantics<parallel>, #tpu.dimension_semantics<arbitrary>], iteration_bounds = array<i64: 2, 1>, scalar_prefetch = 0 : i64, scratch_operands = 0 : i64, tpu.core_type = #tpu.core_type<tc>, window_params = [{transform_indices = @transform_0, window_bounds = array<i64: 4, 6, 6, 128>}, {pipeline_mode = #tpu.pipeline_mode<synchronous>, transform_indices = @transform_1, window_bounds = array<i64: 5, 5, 128, 128>}, {transform_indices = @transform_2, window_bounds = array<i64: 1, 4, 4, 128>}, {transform_indices = @transform_3, window_bounds = array<i64: 1, 1, 128>}, {transform_indices = @transform_4, window_bounds = array<i64: 1, 1, 128>}]} {
    %c4_i32 = arith.constant 4 : i32
    %0 = arith.muli %arg1, %c4_i32 : i32
    %cst = arith.constant 0.000000e+00 : f32
    %1 = vector.broadcast %cst : f32 to vector<16x128xf32>
    %c0_i32 = arith.constant 0 : i32
    %2 = arith.addi %0, %c0_i32 : i32
    %c0 = arith.constant 0 : index
    %3 = arith.index_cast %2 : i32 to index
    %c0_0 = arith.constant 0 : index
    %c0_1 = arith.constant 0 : index
    %4 = vector.load %arg2[%c0, %3, %c0_0, %c0_1] : memref<4x6x6x128xbf16, #tpu.memory_space<vmem>>, vector<1x4x4x128xbf16>
    %5 = vector.shape_cast %4 : vector<1x4x4x128xbf16> to vector<4x4x128xbf16>
    %6 = vector.shape_cast %5 : vector<4x4x128xbf16> to vector<16x128xbf16>
    %c0_2 = arith.constant 0 : index
    %c0_3 = arith.constant 0 : index
    %c0_4 = arith.constant 0 : index
    %c0_5 = arith.constant 0 : index
    %7 = vector.load %arg3[%c0_2, %c0_3, %c0_4, %c0_5] : memref<5x5x128x128xbf16, #tpu.memory_space<vmem>>, vector<1x1x128x128xbf16>
    %8 = vector.shape_cast %7 : vector<1x1x128x128xbf16> to vector<128x128xbf16>
    %cst_6 = arith.constant dense<0.000000e+00> : vector<16x128xf32>
    %9 = tpu.matmul %6, %8, %cst_6 {dimension_numbers = #tpu.dot_dimension_numbers<[1], [0], [0], [1], [0, 0, 1, 1], [], []>} : vector<16x128xbf16>, vector<128x128xbf16>, vector<16x128xf32> -> vector<16x128xf32>
    %10 = arith.addf %1, %9 : vector<16x128xf32>
    %c0_i32_7 = arith.constant 0 : i32
    %11 = arith.addi %0, %c0_i32_7 : i32
    %c1 = arith.constant 1 : index
    %12 = arith.index_cast %11 : i32 to index
    %c0_8 = arith.constant 0 : index
    %c0_9 = arith.constant 0 : index
    %13 = vector.load %arg2[%c1, %12, %c0_8, %c0_9] : memref<4x6x6x128xbf16, #tpu.memory_space<vmem>>, vector<1x4x4x128xbf16>
    %14 = vector.shape_cast %13 : vector<1x4x4x128xbf16> to vector<4x4x128xbf16>
    %15 = vector.shape_cast %14 : vector<4x4x128xbf16> to vector<16x128xbf16>
    %c0_10 = arith.constant 0 : index
    %c1_11 = arith.constant 1 : index
    %c0_12 = arith.constant 0 : index
    %c0_13 = arith.constant 0 : index
    %16 = vector.load %arg3[%c0_10, %c1_11, %c0_12, %c0_13] : memref<5x5x128x128xbf16, #tpu.memory_space<vmem>>, vector<1x1x128x128xbf16>
    %17 = vector.shape_cast %16 : vector<1x1x128x128xbf16> to vector<128x128xbf16>
    %cst_14 = arith.constant dense<0.000000e+00> : vector<16x128xf32>
    %18 = tpu.matmul %15, %17, %cst_14 {dimension_numbers = #tpu.dot_dimension_numbers<[1], [0], [0], [1], [0, 0, 1, 1], [], []>} : vector<16x128xbf16>, vector<128x128xbf16>, vector<16x128xf32> -> vector<16x128xf32>
    %19 = arith.addf %10, %18 : vector<16x128xf32>
    %c0_i32_15 = arith.constant 0 : i32
    %20 = arith.addi %0, %c0_i32_15 : i32
    %c0_16 = arith.constant 0 : index
    %21 = arith.index_cast %20 : i32 to index
    %c1_17 = arith.constant 1 : index
    %c0_18 = arith.constant 0 : index
    %22 = vector.load %arg2[%c0_16, %21, %c1_17, %c0_18] : memref<4x6x6x128xbf16, #tpu.memory_space<vmem>>, vector<1x4x4x128xbf16>
    %23 = vector.shape_cast %22 : vector<1x4x4x128xbf16> to vector<4x4x128xbf16>
    %24 = vector.shape_cast %23 : vector<4x4x128xbf16> to vector<16x128xbf16>
    %c0_19 = arith.constant 0 : index
    %c2 = arith.constant 2 : index
    %c0_20 = arith.constant 0 : index
    %c0_21 = arith.constant 0 : index
    %25 = vector.load %arg3[%c0_19, %c2, %c0_20, %c0_21] : memref<5x5x128x128xbf16, #tpu.memory_space<vmem>>, vector<1x1x128x128xbf16>
    %26 = vector.shape_cast %25 : vector<1x1x128x128xbf16> to vector<128x128xbf16>
    %cst_22 = arith.constant dense<0.000000e+00> : vector<16x128xf32>
    %27 = tpu.matmul %24, %26, %cst_22 {dimension_numbers = #tpu.dot_dimension_numbers<[1], [0], [0], [1], [0, 0, 1, 1], [], []>} : vector<16x128xbf16>, vector<128x128xbf16>, vector<16x128xf32> -> vector<16x128xf32>
    %28 = arith.addf %19, %27 : vector<16x128xf32>
    %c0_i32_23 = arith.constant 0 : i32
    %29 = arith.addi %0, %c0_i32_23 : i32
    %c1_24 = arith.constant 1 : index
    %30 = arith.index_cast %29 : i32 to index
    %c1_25 = arith.constant 1 : index
    %c0_26 = arith.constant 0 : index
    %31 = vector.load %arg2[%c1_24, %30, %c1_25, %c0_26] : memref<4x6x6x128xbf16, #tpu.memory_space<vmem>>, vector<1x4x4x128xbf16>
    %32 = vector.shape_cast %31 : vector<1x4x4x128xbf16> to vector<4x4x128xbf16>
    %33 = vector.shape_cast %32 : vector<4x4x128xbf16> to vector<16x128xbf16>
    %c0_27 = arith.constant 0 : index
    %c3 = arith.constant 3 : index
    %c0_28 = arith.constant 0 : index
    %c0_29 = arith.constant 0 : index
    %34 = vector.load %arg3[%c0_27, %c3, %c0_28, %c0_29] : memref<5x5x128x128xbf16, #tpu.memory_space<vmem>>, vector<1x1x128x128xbf16>
    %35 = vector.shape_cast %34 : vector<1x1x128x128xbf16> to vector<128x128xbf16>
    %cst_30 = arith.constant dense<0.000000e+00> : vector<16x128xf32>
    %36 = tpu.matmul %33, %35, %cst_30 {dimension_numbers = #tpu.dot_dimension_numbers<[1], [0], [0], [1], [0, 0, 1, 1], [], []>} : vector<16x128xbf16>, vector<128x128xbf16>, vector<16x128xf32> -> vector<16x128xf32>
    %37 = arith.addf %28, %36 : vector<16x128xf32>
    %c0_i32_31 = arith.constant 0 : i32
    %38 = arith.addi %0, %c0_i32_31 : i32
    %c0_32 = arith.constant 0 : index
    %39 = arith.index_cast %38 : i32 to index
    %c2_33 = arith.constant 2 : index
    %c0_34 = arith.constant 0 : index
    %40 = vector.load %arg2[%c0_32, %39, %c2_33, %c0_34] : memref<4x6x6x128xbf16, #tpu.memory_space<vmem>>, vector<1x4x4x128xbf16>
    %41 = vector.shape_cast %40 : vector<1x4x4x128xbf16> to vector<4x4x128xbf16>
    %42 = vector.shape_cast %41 : vector<4x4x128xbf16> to vector<16x128xbf16>
    %c0_35 = arith.constant 0 : index
    %c4 = arith.constant 4 : index
    %c0_36 = arith.constant 0 : index
    %c0_37 = arith.constant 0 : index
    %43 = vector.load %arg3[%c0_35, %c4, %c0_36, %c0_37] : memref<5x5x128x128xbf16, #tpu.memory_space<vmem>>, vector<1x1x128x128xbf16>
    %44 = vector.shape_cast %43 : vector<1x1x128x128xbf16> to vector<128x128xbf16>
    %cst_38 = arith.constant dense<0.000000e+00> : vector<16x128xf32>
    %45 = tpu.matmul %42, %44, %cst_38 {dimension_numbers = #tpu.dot_dimension_numbers<[1], [0], [0], [1], [0, 0, 1, 1], [], []>} : vector<16x128xbf16>, vector<128x128xbf16>, vector<16x128xf32> -> vector<16x128xf32>
    %46 = arith.addf %37, %45 : vector<16x128xf32>
    %c0_i32_39 = arith.constant 0 : i32
    %47 = arith.addi %0, %c0_i32_39 : i32
    %c2_40 = arith.constant 2 : index
    %48 = arith.index_cast %47 : i32 to index
    %c0_41 = arith.constant 0 : index
    %c0_42 = arith.constant 0 : index
    %49 = vector.load %arg2[%c2_40, %48, %c0_41, %c0_42] : memref<4x6x6x128xbf16, #tpu.memory_space<vmem>>, vector<1x4x4x128xbf16>
    %50 = vector.shape_cast %49 : vector<1x4x4x128xbf16> to vector<4x4x128xbf16>
    %51 = vector.shape_cast %50 : vector<4x4x128xbf16> to vector<16x128xbf16>
    %c1_43 = arith.constant 1 : index
    %c0_44 = arith.constant 0 : index
    %c0_45 = arith.constant 0 : index
    %c0_46 = arith.constant 0 : index
    %52 = vector.load %arg3[%c1_43, %c0_44, %c0_45, %c0_46] : memref<5x5x128x128xbf16, #tpu.memory_space<vmem>>, vector<1x1x128x128xbf16>
    %53 = vector.shape_cast %52 : vector<1x1x128x128xbf16> to vector<128x128xbf16>
    %cst_47 = arith.constant dense<0.000000e+00> : vector<16x128xf32>
    %54 = tpu.matmul %51, %53, %cst_47 {dimension_numbers = #tpu.dot_dimension_numbers<[1], [0], [0], [1], [0, 0, 1, 1], [], []>} : vector<16x128xbf16>, vector<128x128xbf16>, vector<16x128xf32> -> vector<16x128xf32>
    %55 = arith.addf %46, %54 : vector<16x128xf32>
    %c0_i32_48 = arith.constant 0 : i32
    %56 = arith.addi %0, %c0_i32_48 : i32
    %c3_49 = arith.constant 3 : index
    %57 = arith.index_cast %56 : i32 to index
    %c0_50 = arith.constant 0 : index
    %c0_51 = arith.constant 0 : index
    %58 = vector.load %arg2[%c3_49, %57, %c0_50, %c0_51] : memref<4x6x6x128xbf16, #tpu.memory_space<vmem>>, vector<1x4x4x128xbf16>
    %59 = vector.shape_cast %58 : vector<1x4x4x128xbf16> to vector<4x4x128xbf16>
    %60 = vector.shape_cast %59 : vector<4x4x128xbf16> to vector<16x128xbf16>
    %c1_52 = arith.constant 1 : index
    %c1_53 = arith.constant 1 : index
    %c0_54 = arith.constant 0 : index
    %c0_55 = arith.constant 0 : index
    %61 = vector.load %arg3[%c1_52, %c1_53, %c0_54, %c0_55] : memref<5x5x128x128xbf16, #tpu.memory_space<vmem>>, vector<1x1x128x128xbf16>
    %62 = vector.shape_cast %61 : vector<1x1x128x128xbf16> to vector<128x128xbf16>
    %cst_56 = arith.constant dense<0.000000e+00> : vector<16x128xf32>
    %63 = tpu.matmul %60, %62, %cst_56 {dimension_numbers = #tpu.dot_dimension_numbers<[1], [0], [0], [1], [0, 0, 1, 1], [], []>} : vector<16x128xbf16>, vector<128x128xbf16>, vector<16x128xf32> -> vector<16x128xf32>
    %64 = arith.addf %55, %63 : vector<16x128xf32>
    %c0_i32_57 = arith.constant 0 : i32
    %65 = arith.addi %0, %c0_i32_57 : i32
    %c2_58 = arith.constant 2 : index
    %66 = arith.index_cast %65 : i32 to index
    %c1_59 = arith.constant 1 : index
    %c0_60 = arith.constant 0 : index
    %67 = vector.load %arg2[%c2_58, %66, %c1_59, %c0_60] : memref<4x6x6x128xbf16, #tpu.memory_space<vmem>>, vector<1x4x4x128xbf16>
    %68 = vector.shape_cast %67 : vector<1x4x4x128xbf16> to vector<4x4x128xbf16>
    %69 = vector.shape_cast %68 : vector<4x4x128xbf16> to vector<16x128xbf16>
    %c1_61 = arith.constant 1 : index
    %c2_62 = arith.constant 2 : index
    %c0_63 = arith.constant 0 : index
    %c0_64 = arith.constant 0 : index
    %70 = vector.load %arg3[%c1_61, %c2_62, %c0_63, %c0_64] : memref<5x5x128x128xbf16, #tpu.memory_space<vmem>>, vector<1x1x128x128xbf16>
    %71 = vector.shape_cast %70 : vector<1x1x128x128xbf16> to vector<128x128xbf16>
    %cst_65 = arith.constant dense<0.000000e+00> : vector<16x128xf32>
    %72 = tpu.matmul %69, %71, %cst_65 {dimension_numbers = #tpu.dot_dimension_numbers<[1], [0], [0], [1], [0, 0, 1, 1], [], []>} : vector<16x128xbf16>, vector<128x128xbf16>, vector<16x128xf32> -> vector<16x128xf32>
    %73 = arith.addf %64, %72 : vector<16x128xf32>
    %c0_i32_66 = arith.constant 0 : i32
    %74 = arith.addi %0, %c0_i32_66 : i32
    %c3_67 = arith.constant 3 : index
    %75 = arith.index_cast %74 : i32 to index
    %c1_68 = arith.constant 1 : index
    %c0_69 = arith.constant 0 : index
    %76 = vector.load %arg2[%c3_67, %75, %c1_68, %c0_69] : memref<4x6x6x128xbf16, #tpu.memory_space<vmem>>, vector<1x4x4x128xbf16>
    %77 = vector.shape_cast %76 : vector<1x4x4x128xbf16> to vector<4x4x128xbf16>
    %78 = vector.shape_cast %77 : vector<4x4x128xbf16> to vector<16x128xbf16>
    %c1_70 = arith.constant 1 : index
    %c3_71 = arith.constant 3 : index
    %c0_72 = arith.constant 0 : index
    %c0_73 = arith.constant 0 : index
    %79 = vector.load %arg3[%c1_70, %c3_71, %c0_72, %c0_73] : memref<5x5x128x128xbf16, #tpu.memory_space<vmem>>, vector<1x1x128x128xbf16>
    %80 = vector.shape_cast %79 : vector<1x1x128x128xbf16> to vector<128x128xbf16>
    %cst_74 = arith.constant dense<0.000000e+00> : vector<16x128xf32>
    %81 = tpu.matmul %78, %80, %cst_74 {dimension_numbers = #tpu.dot_dimension_numbers<[1], [0], [0], [1], [0, 0, 1, 1], [], []>} : vector<16x128xbf16>, vector<128x128xbf16>, vector<16x128xf32> -> vector<16x128xf32>
    %82 = arith.addf %73, %81 : vector<16x128xf32>
    %c0_i32_75 = arith.constant 0 : i32
    %83 = arith.addi %0, %c0_i32_75 : i32
    %c2_76 = arith.constant 2 : index
    %84 = arith.index_cast %83 : i32 to index
    %c2_77 = arith.constant 2 : index
    %c0_78 = arith.constant 0 : index
    %85 = vector.load %arg2[%c2_76, %84, %c2_77, %c0_78] : memref<4x6x6x128xbf16, #tpu.memory_space<vmem>>, vector<1x4x4x128xbf16>
    %86 = vector.shape_cast %85 : vector<1x4x4x128xbf16> to vector<4x4x128xbf16>
    %87 = vector.shape_cast %86 : vector<4x4x128xbf16> to vector<16x128xbf16>
    %c1_79 = arith.constant 1 : index
    %c4_80 = arith.constant 4 : index
    %c0_81 = arith.constant 0 : index
    %c0_82 = arith.constant 0 : index
    %88 = vector.load %arg3[%c1_79, %c4_80, %c0_81, %c0_82] : memref<5x5x128x128xbf16, #tpu.memory_space<vmem>>, vector<1x1x128x128xbf16>
    %89 = vector.shape_cast %88 : vector<1x1x128x128xbf16> to vector<128x128xbf16>
    %cst_83 = arith.constant dense<0.000000e+00> : vector<16x128xf32>
    %90 = tpu.matmul %87, %89, %cst_83 {dimension_numbers = #tpu.dot_dimension_numbers<[1], [0], [0], [1], [0, 0, 1, 1], [], []>} : vector<16x128xbf16>, vector<128x128xbf16>, vector<16x128xf32> -> vector<16x128xf32>
    %91 = arith.addf %82, %90 : vector<16x128xf32>
    %c1_i32 = arith.constant 1 : i32
    %92 = arith.addi %0, %c1_i32 : i32
    %c0_84 = arith.constant 0 : index
    %93 = arith.index_cast %92 : i32 to index
    %c0_85 = arith.constant 0 : index
    %c0_86 = arith.constant 0 : index
    %94 = vector.load %arg2[%c0_84, %93, %c0_85, %c0_86] : memref<4x6x6x128xbf16, #tpu.memory_space<vmem>>, vector<1x4x4x128xbf16>
    %95 = vector.shape_cast %94 : vector<1x4x4x128xbf16> to vector<4x4x128xbf16>
    %96 = vector.shape_cast %95 : vector<4x4x128xbf16> to vector<16x128xbf16>
    %c2_87 = arith.constant 2 : index
    %c0_88 = arith.constant 0 : index
    %c0_89 = arith.constant 0 : index
    %c0_90 = arith.constant 0 : index
    %97 = vector.load %arg3[%c2_87, %c0_88, %c0_89, %c0_90] : memref<5x5x128x128xbf16, #tpu.memory_space<vmem>>, vector<1x1x128x128xbf16>
    %98 = vector.shape_cast %97 : vector<1x1x128x128xbf16> to vector<128x128xbf16>
    %cst_91 = arith.constant dense<0.000000e+00> : vector<16x128xf32>
    %99 = tpu.matmul %96, %98, %cst_91 {dimension_numbers = #tpu.dot_dimension_numbers<[1], [0], [0], [1], [0, 0, 1, 1], [], []>} : vector<16x128xbf16>, vector<128x128xbf16>, vector<16x128xf32> -> vector<16x128xf32>
    %100 = arith.addf %91, %99 : vector<16x128xf32>
    %c1_i32_92 = arith.constant 1 : i32
    %101 = arith.addi %0, %c1_i32_92 : i32
    %c1_93 = arith.constant 1 : index
    %102 = arith.index_cast %101 : i32 to index
    %c0_94 = arith.constant 0 : index
    %c0_95 = arith.constant 0 : index
    %103 = vector.load %arg2[%c1_93, %102, %c0_94, %c0_95] : memref<4x6x6x128xbf16, #tpu.memory_space<vmem>>, vector<1x4x4x128xbf16>
    %104 = vector.shape_cast %103 : vector<1x4x4x128xbf16> to vector<4x4x128xbf16>
    %105 = vector.shape_cast %104 : vector<4x4x128xbf16> to vector<16x128xbf16>
    %c2_96 = arith.constant 2 : index
    %c1_97 = arith.constant 1 : index
    %c0_98 = arith.constant 0 : index
    %c0_99 = arith.constant 0 : index
    %106 = vector.load %arg3[%c2_96, %c1_97, %c0_98, %c0_99] : memref<5x5x128x128xbf16, #tpu.memory_space<vmem>>, vector<1x1x128x128xbf16>
    %107 = vector.shape_cast %106 : vector<1x1x128x128xbf16> to vector<128x128xbf16>
    %cst_100 = arith.constant dense<0.000000e+00> : vector<16x128xf32>
    %108 = tpu.matmul %105, %107, %cst_100 {dimension_numbers = #tpu.dot_dimension_numbers<[1], [0], [0], [1], [0, 0, 1, 1], [], []>} : vector<16x128xbf16>, vector<128x128xbf16>, vector<16x128xf32> -> vector<16x128xf32>
    %109 = arith.addf %100, %108 : vector<16x128xf32>
    %c1_i32_101 = arith.constant 1 : i32
    %110 = arith.addi %0, %c1_i32_101 : i32
    %c0_102 = arith.constant 0 : index
    %111 = arith.index_cast %110 : i32 to index
    %c1_103 = arith.constant 1 : index
    %c0_104 = arith.constant 0 : index
    %112 = vector.load %arg2[%c0_102, %111, %c1_103, %c0_104] : memref<4x6x6x128xbf16, #tpu.memory_space<vmem>>, vector<1x4x4x128xbf16>
    %113 = vector.shape_cast %112 : vector<1x4x4x128xbf16> to vector<4x4x128xbf16>
    %114 = vector.shape_cast %113 : vector<4x4x128xbf16> to vector<16x128xbf16>
    %c2_105 = arith.constant 2 : index
    %c2_106 = arith.constant 2 : index
    %c0_107 = arith.constant 0 : index
    %c0_108 = arith.constant 0 : index
    %115 = vector.load %arg3[%c2_105, %c2_106, %c0_107, %c0_108] : memref<5x5x128x128xbf16, #tpu.memory_space<vmem>>, vector<1x1x128x128xbf16>
    %116 = vector.shape_cast %115 : vector<1x1x128x128xbf16> to vector<128x128xbf16>
    %cst_109 = arith.constant dense<0.000000e+00> : vector<16x128xf32>
    %117 = tpu.matmul %114, %116, %cst_109 {dimension_numbers = #tpu.dot_dimension_numbers<[1], [0], [0], [1], [0, 0, 1, 1], [], []>} : vector<16x128xbf16>, vector<128x128xbf16>, vector<16x128xf32> -> vector<16x128xf32>
    %118 = arith.addf %109, %117 : vector<16x128xf32>
    %c1_i32_110 = arith.constant 1 : i32
    %119 = arith.addi %0, %c1_i32_110 : i32
    %c1_111 = arith.constant 1 : index
    %120 = arith.index_cast %119 : i32 to index
    %c1_112 = arith.constant 1 : index
    %c0_113 = arith.constant 0 : index
    %121 = vector.load %arg2[%c1_111, %120, %c1_112, %c0_113] : memref<4x6x6x128xbf16, #tpu.memory_space<vmem>>, vector<1x4x4x128xbf16>
    %122 = vector.shape_cast %121 : vector<1x4x4x128xbf16> to vector<4x4x128xbf16>
    %123 = vector.shape_cast %122 : vector<4x4x128xbf16> to vector<16x128xbf16>
    %c2_114 = arith.constant 2 : index
    %c3_115 = arith.constant 3 : index
    %c0_116 = arith.constant 0 : index
    %c0_117 = arith.constant 0 : index
    %124 = vector.load %arg3[%c2_114, %c3_115, %c0_116, %c0_117] : memref<5x5x128x128xbf16, #tpu.memory_space<vmem>>, vector<1x1x128x128xbf16>
    %125 = vector.shape_cast %124 : vector<1x1x128x128xbf16> to vector<128x128xbf16>
    %cst_118 = arith.constant dense<0.000000e+00> : vector<16x128xf32>
    %126 = tpu.matmul %123, %125, %cst_118 {dimension_numbers = #tpu.dot_dimension_numbers<[1], [0], [0], [1], [0, 0, 1, 1], [], []>} : vector<16x128xbf16>, vector<128x128xbf16>, vector<16x128xf32> -> vector<16x128xf32>
    %127 = arith.addf %118, %126 : vector<16x128xf32>
    %c1_i32_119 = arith.constant 1 : i32
    %128 = arith.addi %0, %c1_i32_119 : i32
    %c0_120 = arith.constant 0 : index
    %129 = arith.index_cast %128 : i32 to index
    %c2_121 = arith.constant 2 : index
    %c0_122 = arith.constant 0 : index
    %130 = vector.load %arg2[%c0_120, %129, %c2_121, %c0_122] : memref<4x6x6x128xbf16, #tpu.memory_space<vmem>>, vector<1x4x4x128xbf16>
    %131 = vector.shape_cast %130 : vector<1x4x4x128xbf16> to vector<4x4x128xbf16>
    %132 = vector.shape_cast %131 : vector<4x4x128xbf16> to vector<16x128xbf16>
    %c2_123 = arith.constant 2 : index
    %c4_124 = arith.constant 4 : index
    %c0_125 = arith.constant 0 : index
    %c0_126 = arith.constant 0 : index
    %133 = vector.load %arg3[%c2_123, %c4_124, %c0_125, %c0_126] : memref<5x5x128x128xbf16, #tpu.memory_space<vmem>>, vector<1x1x128x128xbf16>
    %134 = vector.shape_cast %133 : vector<1x1x128x128xbf16> to vector<128x128xbf16>
    %cst_127 = arith.constant dense<0.000000e+00> : vector<16x128xf32>
    %135 = tpu.matmul %132, %134, %cst_127 {dimension_numbers = #tpu.dot_dimension_numbers<[1], [0], [0], [1], [0, 0, 1, 1], [], []>} : vector<16x128xbf16>, vector<128x128xbf16>, vector<16x128xf32> -> vector<16x128xf32>
    %136 = arith.addf %127, %135 : vector<16x128xf32>
    %c1_i32_128 = arith.constant 1 : i32
    %137 = arith.addi %0, %c1_i32_128 : i32
    %c2_129 = arith.constant 2 : index
    %138 = arith.index_cast %137 : i32 to index
    %c0_130 = arith.constant 0 : index
    %c0_131 = arith.constant 0 : index
    %139 = vector.load %arg2[%c2_129, %138, %c0_130, %c0_131] : memref<4x6x6x128xbf16, #tpu.memory_space<vmem>>, vector<1x4x4x128xbf16>
    %140 = vector.shape_cast %139 : vector<1x4x4x128xbf16> to vector<4x4x128xbf16>
    %141 = vector.shape_cast %140 : vector<4x4x128xbf16> to vector<16x128xbf16>
    %c3_132 = arith.constant 3 : index
    %c0_133 = arith.constant 0 : index
    %c0_134 = arith.constant 0 : index
    %c0_135 = arith.constant 0 : index
    %142 = vector.load %arg3[%c3_132, %c0_133, %c0_134, %c0_135] : memref<5x5x128x128xbf16, #tpu.memory_space<vmem>>, vector<1x1x128x128xbf16>
    %143 = vector.shape_cast %142 : vector<1x1x128x128xbf16> to vector<128x128xbf16>
    %cst_136 = arith.constant dense<0.000000e+00> : vector<16x128xf32>
    %144 = tpu.matmul %141, %143, %cst_136 {dimension_numbers = #tpu.dot_dimension_numbers<[1], [0], [0], [1], [0, 0, 1, 1], [], []>} : vector<16x128xbf16>, vector<128x128xbf16>, vector<16x128xf32> -> vector<16x128xf32>
    %145 = arith.addf %136, %144 : vector<16x128xf32>
    %c1_i32_137 = arith.constant 1 : i32
    %146 = arith.addi %0, %c1_i32_137 : i32
    %c3_138 = arith.constant 3 : index
    %147 = arith.index_cast %146 : i32 to index
    %c0_139 = arith.constant 0 : index
    %c0_140 = arith.constant 0 : index
    %148 = vector.load %arg2[%c3_138, %147, %c0_139, %c0_140] : memref<4x6x6x128xbf16, #tpu.memory_space<vmem>>, vector<1x4x4x128xbf16>
    %149 = vector.shape_cast %148 : vector<1x4x4x128xbf16> to vector<4x4x128xbf16>
    %150 = vector.shape_cast %149 : vector<4x4x128xbf16> to vector<16x128xbf16>
    %c3_141 = arith.constant 3 : index
    %c1_142 = arith.constant 1 : index
    %c0_143 = arith.constant 0 : index
    %c0_144 = arith.constant 0 : index
    %151 = vector.load %arg3[%c3_141, %c1_142, %c0_143, %c0_144] : memref<5x5x128x128xbf16, #tpu.memory_space<vmem>>, vector<1x1x128x128xbf16>
    %152 = vector.shape_cast %151 : vector<1x1x128x128xbf16> to vector<128x128xbf16>
    %cst_145 = arith.constant dense<0.000000e+00> : vector<16x128xf32>
    %153 = tpu.matmul %150, %152, %cst_145 {dimension_numbers = #tpu.dot_dimension_numbers<[1], [0], [0], [1], [0, 0, 1, 1], [], []>} : vector<16x128xbf16>, vector<128x128xbf16>, vector<16x128xf32> -> vector<16x128xf32>
    %154 = arith.addf %145, %153 : vector<16x128xf32>
    %c1_i32_146 = arith.constant 1 : i32
    %155 = arith.addi %0, %c1_i32_146 : i32
    %c2_147 = arith.constant 2 : index
    %156 = arith.index_cast %155 : i32 to index
    %c1_148 = arith.constant 1 : index
    %c0_149 = arith.constant 0 : index
    %157 = vector.load %arg2[%c2_147, %156, %c1_148, %c0_149] : memref<4x6x6x128xbf16, #tpu.memory_space<vmem>>, vector<1x4x4x128xbf16>
    %158 = vector.shape_cast %157 : vector<1x4x4x128xbf16> to vector<4x4x128xbf16>
    %159 = vector.shape_cast %158 : vector<4x4x128xbf16> to vector<16x128xbf16>
    %c3_150 = arith.constant 3 : index
    %c2_151 = arith.constant 2 : index
    %c0_152 = arith.constant 0 : index
    %c0_153 = arith.constant 0 : index
    %160 = vector.load %arg3[%c3_150, %c2_151, %c0_152, %c0_153] : memref<5x5x128x128xbf16, #tpu.memory_space<vmem>>, vector<1x1x128x128xbf16>
    %161 = vector.shape_cast %160 : vector<1x1x128x128xbf16> to vector<128x128xbf16>
    %cst_154 = arith.constant dense<0.000000e+00> : vector<16x128xf32>
    %162 = tpu.matmul %159, %161, %cst_154 {dimension_numbers = #tpu.dot_dimension_numbers<[1], [0], [0], [1], [0, 0, 1, 1], [], []>} : vector<16x128xbf16>, vector<128x128xbf16>, vector<16x128xf32> -> vector<16x128xf32>
    %163 = arith.addf %154, %162 : vector<16x128xf32>
    %c1_i32_155 = arith.constant 1 : i32
    %164 = arith.addi %0, %c1_i32_155 : i32
    %c3_156 = arith.constant 3 : index
    %165 = arith.index_cast %164 : i32 to index
    %c1_157 = arith.constant 1 : index
    %c0_158 = arith.constant 0 : index
    %166 = vector.load %arg2[%c3_156, %165, %c1_157, %c0_158] : memref<4x6x6x128xbf16, #tpu.memory_space<vmem>>, vector<1x4x4x128xbf16>
    %167 = vector.shape_cast %166 : vector<1x4x4x128xbf16> to vector<4x4x128xbf16>
    %168 = vector.shape_cast %167 : vector<4x4x128xbf16> to vector<16x128xbf16>
    %c3_159 = arith.constant 3 : index
    %c3_160 = arith.constant 3 : index
    %c0_161 = arith.constant 0 : index
    %c0_162 = arith.constant 0 : index
    %169 = vector.load %arg3[%c3_159, %c3_160, %c0_161, %c0_162] : memref<5x5x128x128xbf16, #tpu.memory_space<vmem>>, vector<1x1x128x128xbf16>
    %170 = vector.shape_cast %169 : vector<1x1x128x128xbf16> to vector<128x128xbf16>
    %cst_163 = arith.constant dense<0.000000e+00> : vector<16x128xf32>
    %171 = tpu.matmul %168, %170, %cst_163 {dimension_numbers = #tpu.dot_dimension_numbers<[1], [0], [0], [1], [0, 0, 1, 1], [], []>} : vector<16x128xbf16>, vector<128x128xbf16>, vector<16x128xf32> -> vector<16x128xf32>
    %172 = arith.addf %163, %171 : vector<16x128xf32>
    %c1_i32_164 = arith.constant 1 : i32
    %173 = arith.addi %0, %c1_i32_164 : i32
    %c2_165 = arith.constant 2 : index
    %174 = arith.index_cast %173 : i32 to index
    %c2_166 = arith.constant 2 : index
    %c0_167 = arith.constant 0 : index
    %175 = vector.load %arg2[%c2_165, %174, %c2_166, %c0_167] : memref<4x6x6x128xbf16, #tpu.memory_space<vmem>>, vector<1x4x4x128xbf16>
    %176 = vector.shape_cast %175 : vector<1x4x4x128xbf16> to vector<4x4x128xbf16>
    %177 = vector.shape_cast %176 : vector<4x4x128xbf16> to vector<16x128xbf16>
    %c3_168 = arith.constant 3 : index
    %c4_169 = arith.constant 4 : index
    %c0_170 = arith.constant 0 : index
    %c0_171 = arith.constant 0 : index
    %178 = vector.load %arg3[%c3_168, %c4_169, %c0_170, %c0_171] : memref<5x5x128x128xbf16, #tpu.memory_space<vmem>>, vector<1x1x128x128xbf16>
    %179 = vector.shape_cast %178 : vector<1x1x128x128xbf16> to vector<128x128xbf16>
    %cst_172 = arith.constant dense<0.000000e+00> : vector<16x128xf32>
    %180 = tpu.matmul %177, %179, %cst_172 {dimension_numbers = #tpu.dot_dimension_numbers<[1], [0], [0], [1], [0, 0, 1, 1], [], []>} : vector<16x128xbf16>, vector<128x128xbf16>, vector<16x128xf32> -> vector<16x128xf32>
    %181 = arith.addf %172, %180 : vector<16x128xf32>
    %c2_i32 = arith.constant 2 : i32
    %182 = arith.addi %0, %c2_i32 : i32
    %c0_173 = arith.constant 0 : index
    %183 = arith.index_cast %182 : i32 to index
    %c0_174 = arith.constant 0 : index
    %c0_175 = arith.constant 0 : index
    %184 = vector.load %arg2[%c0_173, %183, %c0_174, %c0_175] : memref<4x6x6x128xbf16, #tpu.memory_space<vmem>>, vector<1x4x4x128xbf16>
    %185 = vector.shape_cast %184 : vector<1x4x4x128xbf16> to vector<4x4x128xbf16>
    %186 = vector.shape_cast %185 : vector<4x4x128xbf16> to vector<16x128xbf16>
    %c4_176 = arith.constant 4 : index
    %c0_177 = arith.constant 0 : index
    %c0_178 = arith.constant 0 : index
    %c0_179 = arith.constant 0 : index
    %187 = vector.load %arg3[%c4_176, %c0_177, %c0_178, %c0_179] : memref<5x5x128x128xbf16, #tpu.memory_space<vmem>>, vector<1x1x128x128xbf16>
    %188 = vector.shape_cast %187 : vector<1x1x128x128xbf16> to vector<128x128xbf16>
    %cst_180 = arith.constant dense<0.000000e+00> : vector<16x128xf32>
    %189 = tpu.matmul %186, %188, %cst_180 {dimension_numbers = #tpu.dot_dimension_numbers<[1], [0], [0], [1], [0, 0, 1, 1], [], []>} : vector<16x128xbf16>, vector<128x128xbf16>, vector<16x128xf32> -> vector<16x128xf32>
    %190 = arith.addf %181, %189 : vector<16x128xf32>
    %c2_i32_181 = arith.constant 2 : i32
    %191 = arith.addi %0, %c2_i32_181 : i32
    %c1_182 = arith.constant 1 : index
    %192 = arith.index_cast %191 : i32 to index
    %c0_183 = arith.constant 0 : index
    %c0_184 = arith.constant 0 : index
    %193 = vector.load %arg2[%c1_182, %192, %c0_183, %c0_184] : memref<4x6x6x128xbf16, #tpu.memory_space<vmem>>, vector<1x4x4x128xbf16>
    %194 = vector.shape_cast %193 : vector<1x4x4x128xbf16> to vector<4x4x128xbf16>
    %195 = vector.shape_cast %194 : vector<4x4x128xbf16> to vector<16x128xbf16>
    %c4_185 = arith.constant 4 : index
    %c1_186 = arith.constant 1 : index
    %c0_187 = arith.constant 0 : index
    %c0_188 = arith.constant 0 : index
    %196 = vector.load %arg3[%c4_185, %c1_186, %c0_187, %c0_188] : memref<5x5x128x128xbf16, #tpu.memory_space<vmem>>, vector<1x1x128x128xbf16>
    %197 = vector.shape_cast %196 : vector<1x1x128x128xbf16> to vector<128x128xbf16>
    %cst_189 = arith.constant dense<0.000000e+00> : vector<16x128xf32>
    %198 = tpu.matmul %195, %197, %cst_189 {dimension_numbers = #tpu.dot_dimension_numbers<[1], [0], [0], [1], [0, 0, 1, 1], [], []>} : vector<16x128xbf16>, vector<128x128xbf16>, vector<16x128xf32> -> vector<16x128xf32>
    %199 = arith.addf %190, %198 : vector<16x128xf32>
    %c2_i32_190 = arith.constant 2 : i32
    %200 = arith.addi %0, %c2_i32_190 : i32
    %c0_191 = arith.constant 0 : index
    %201 = arith.index_cast %200 : i32 to index
    %c1_192 = arith.constant 1 : index
    %c0_193 = arith.constant 0 : index
    %202 = vector.load %arg2[%c0_191, %201, %c1_192, %c0_193] : memref<4x6x6x128xbf16, #tpu.memory_space<vmem>>, vector<1x4x4x128xbf16>
    %203 = vector.shape_cast %202 : vector<1x4x4x128xbf16> to vector<4x4x128xbf16>
    %204 = vector.shape_cast %203 : vector<4x4x128xbf16> to vector<16x128xbf16>
    %c4_194 = arith.constant 4 : index
    %c2_195 = arith.constant 2 : index
    %c0_196 = arith.constant 0 : index
    %c0_197 = arith.constant 0 : index
    %205 = vector.load %arg3[%c4_194, %c2_195, %c0_196, %c0_197] : memref<5x5x128x128xbf16, #tpu.memory_space<vmem>>, vector<1x1x128x128xbf16>
    %206 = vector.shape_cast %205 : vector<1x1x128x128xbf16> to vector<128x128xbf16>
    %cst_198 = arith.constant dense<0.000000e+00> : vector<16x128xf32>
    %207 = tpu.matmul %204, %206, %cst_198 {dimension_numbers = #tpu.dot_dimension_numbers<[1], [0], [0], [1], [0, 0, 1, 1], [], []>} : vector<16x128xbf16>, vector<128x128xbf16>, vector<16x128xf32> -> vector<16x128xf32>
    %208 = arith.addf %199, %207 : vector<16x128xf32>
    %c2_i32_199 = arith.constant 2 : i32
    %209 = arith.addi %0, %c2_i32_199 : i32
    %c1_200 = arith.constant 1 : index
    %210 = arith.index_cast %209 : i32 to index
    %c1_201 = arith.constant 1 : index
    %c0_202 = arith.constant 0 : index
    %211 = vector.load %arg2[%c1_200, %210, %c1_201, %c0_202] : memref<4x6x6x128xbf16, #tpu.memory_space<vmem>>, vector<1x4x4x128xbf16>
    %212 = vector.shape_cast %211 : vector<1x4x4x128xbf16> to vector<4x4x128xbf16>
    %213 = vector.shape_cast %212 : vector<4x4x128xbf16> to vector<16x128xbf16>
    %c4_203 = arith.constant 4 : index
    %c3_204 = arith.constant 3 : index
    %c0_205 = arith.constant 0 : index
    %c0_206 = arith.constant 0 : index
    %214 = vector.load %arg3[%c4_203, %c3_204, %c0_205, %c0_206] : memref<5x5x128x128xbf16, #tpu.memory_space<vmem>>, vector<1x1x128x128xbf16>
    %215 = vector.shape_cast %214 : vector<1x1x128x128xbf16> to vector<128x128xbf16>
    %cst_207 = arith.constant dense<0.000000e+00> : vector<16x128xf32>
    %216 = tpu.matmul %213, %215, %cst_207 {dimension_numbers = #tpu.dot_dimension_numbers<[1], [0], [0], [1], [0, 0, 1, 1], [], []>} : vector<16x128xbf16>, vector<128x128xbf16>, vector<16x128xf32> -> vector<16x128xf32>
    %217 = arith.addf %208, %216 : vector<16x128xf32>
    %c2_i32_208 = arith.constant 2 : i32
    %218 = arith.addi %0, %c2_i32_208 : i32
    %c0_209 = arith.constant 0 : index
    %219 = arith.index_cast %218 : i32 to index
    %c2_210 = arith.constant 2 : index
    %c0_211 = arith.constant 0 : index
    %220 = vector.load %arg2[%c0_209, %219, %c2_210, %c0_211] : memref<4x6x6x128xbf16, #tpu.memory_space<vmem>>, vector<1x4x4x128xbf16>
    %221 = vector.shape_cast %220 : vector<1x4x4x128xbf16> to vector<4x4x128xbf16>
    %222 = vector.shape_cast %221 : vector<4x4x128xbf16> to vector<16x128xbf16>
    %c4_212 = arith.constant 4 : index
    %c4_213 = arith.constant 4 : index
    %c0_214 = arith.constant 0 : index
    %c0_215 = arith.constant 0 : index
    %223 = vector.load %arg3[%c4_212, %c4_213, %c0_214, %c0_215] : memref<5x5x128x128xbf16, #tpu.memory_space<vmem>>, vector<1x1x128x128xbf16>
    %224 = vector.shape_cast %223 : vector<1x1x128x128xbf16> to vector<128x128xbf16>
    %cst_216 = arith.constant dense<0.000000e+00> : vector<16x128xf32>
    %225 = tpu.matmul %222, %224, %cst_216 {dimension_numbers = #tpu.dot_dimension_numbers<[1], [0], [0], [1], [0, 0, 1, 1], [], []>} : vector<16x128xbf16>, vector<128x128xbf16>, vector<16x128xf32> -> vector<16x128xf32>
    %226 = arith.addf %217, %225 : vector<16x128xf32>
    %227 = vector.shape_cast %226 : vector<16x128xf32> to vector<4x4x128xf32>
    %228 = arith.truncf %227 : vector<4x4x128xf32> to vector<4x4x128xbf16>
    %c0_217 = arith.constant 0 : index
    %c0_218 = arith.constant 0 : index
    %c0_219 = arith.constant 0 : index
    %c0_220 = arith.constant 0 : index
    %229 = vector.load %arg4[%c0_217, %c0_218, %c0_219, %c0_220] : memref<1x4x4x128xbf16, #tpu.memory_space<vmem>>, vector<1x4x4x128xbf16>
    %230 = vector.shape_cast %229 : vector<1x4x4x128xbf16> to vector<4x4x128xbf16>
    %231 = vector.shape_cast %228 : vector<4x4x128xbf16> to vector<1x4x4x128xbf16>
    tpu.vector_store %arg4[%c0_217, %c0_218, %c0_219, %c0_220], %231 {strides = array<i32>} : memref<1x4x4x128xbf16, #tpu.memory_space<vmem>>, vector<1x4x4x128xbf16>,
    %c0_i32_221 = arith.constant 0 : i32
    %232 = arith.cmpi eq, %arg1, %c0_i32_221 : i32
    %233 = arith.extui %232 : i1 to i32
    %c0_i32_222 = arith.constant 0 : i32
    %234 = arith.cmpi ne, %233, %c0_i32_222 : i32
    scf.if %234 {
      %cst_237 = arith.constant 0.000000e+00 : f32
      %246 = vector.broadcast %cst_237 : f32 to vector<1x1x128xf32>
      %c0_238 = arith.constant 0 : index
      %c0_239 = arith.constant 0 : index
      %c0_240 = arith.constant 0 : index
      %247 = vector.load %arg5[%c0_238, %c0_239, %c0_240] : memref<1x1x128xf32, #tpu.memory_space<vmem>>, vector<1x1x128xf32>
      tpu.vector_store %arg5[%c0_238, %c0_239, %c0_240], %246 {strides = array<i32>} : memref<1x1x128xf32, #tpu.memory_space<vmem>>, vector<1x1x128xf32>,
      %cst_241 = arith.constant 0.000000e+00 : f32
      %248 = vector.broadcast %cst_241 : f32 to vector<1x1x128xf32>
      %c0_242 = arith.constant 0 : index
      %c0_243 = arith.constant 0 : index
      %c0_244 = arith.constant 0 : index
      %249 = vector.load %arg6[%c0_242, %c0_243, %c0_244] : memref<1x1x128xf32, #tpu.memory_space<vmem>>, vector<1x1x128xf32>
      tpu.vector_store %arg6[%c0_242, %c0_243, %c0_244], %248 {strides = array<i32>} : memref<1x1x128xf32, #tpu.memory_space<vmem>>, vector<1x1x128xf32>,
    } else {
    }
    %c0_223 = arith.constant 0 : index
    %c0_224 = arith.constant 0 : index
    %c0_225 = arith.constant 0 : index
    %235 = vector.load %arg5[%c0_223, %c0_224, %c0_225] : memref<1x1x128xf32, #tpu.memory_space<vmem>>, vector<1x1x128xf32>
    %cst_226 = arith.constant dense<0.000000e+00> : vector<128xf32>
    %236 = vector.multi_reduction <add>, %226, %cst_226 [0] : vector<16x128xf32> to vector<128xf32>
    %237 = vector.shape_cast %236 : vector<128xf32> to vector<1x1x128xf32>
    %238 = arith.addf %235, %237 : vector<1x1x128xf32>
    %c0_227 = arith.constant 0 : index
    %c0_228 = arith.constant 0 : index
    %c0_229 = arith.constant 0 : index
    %239 = vector.load %arg5[%c0_227, %c0_228, %c0_229] : memref<1x1x128xf32, #tpu.memory_space<vmem>>, vector<1x1x128xf32>
    tpu.vector_store %arg5[%c0_227, %c0_228, %c0_229], %238 {strides = array<i32>} : memref<1x1x128xf32, #tpu.memory_space<vmem>>, vector<1x1x128xf32>,
    %c0_230 = arith.constant 0 : index
    %c0_231 = arith.constant 0 : index
    %c0_232 = arith.constant 0 : index
    %240 = vector.load %arg6[%c0_230, %c0_231, %c0_232] : memref<1x1x128xf32, #tpu.memory_space<vmem>>, vector<1x1x128xf32>
    %241 = arith.mulf %226, %226 : vector<16x128xf32>
    %cst_233 = arith.constant dense<0.000000e+00> : vector<128xf32>
    %242 = vector.multi_reduction <add>, %241, %cst_233 [0] : vector<16x128xf32> to vector<128xf32>
    %243 = vector.shape_cast %242 : vector<128xf32> to vector<1x1x128xf32>
    %244 = arith.addf %240, %243 : vector<1x1x128xf32>
    %c0_234 = arith.constant 0 : index
    %c0_235 = arith.constant 0 : index
    %c0_236 = arith.constant 0 : index
    %245 = vector.load %arg6[%c0_234, %c0_235, %c0_236] : memref<1x1x128xf32, #tpu.memory_space<vmem>>, vector<1x1x128xf32>
    tpu.vector_store %arg6[%c0_234, %c0_235, %c0_236], %244 {strides = array<i32>} : memref<1x1x128xf32, #tpu.memory_space<vmem>>, vector<1x1x128xf32>,
    return
  }
  func.func @transform_0(%arg0: i32, %arg1: i32) -> (i32, i32, i32, i32) {
    %c0_i32 = arith.constant 0 : i32
    %c0_i32_0 = arith.constant 0 : i32
    %c0_i32_1 = arith.constant 0 : i32
    %c0_i32_2 = arith.constant 0 : i32
    return %arg0, %c0_i32, %c0_i32_0, %c0_i32_1 : i32, i32, i32, i32
  }
  func.func @transform_1(%arg0: i32, %arg1: i32) -> (i32, i32, i32, i32) {
    %c0_i32 = arith.constant 0 : i32
    %c0_i32_0 = arith.constant 0 : i32
    %c0_i32_1 = arith.constant 0 : i32
    %c0_i32_2 = arith.constant 0 : i32
    %c0_i32_3 = arith.constant 0 : i32
    return %c0_i32, %c0_i32_0, %c0_i32_1, %c0_i32_2 : i32, i32, i32, i32
  }
  func.func @transform_2(%arg0: i32, %arg1: i32) -> (i32, i32, i32, i32) {
    %c0_i32 = arith.constant 0 : i32
    %c0_i32_0 = arith.constant 0 : i32
    %c0_i32_1 = arith.constant 0 : i32
    return %arg0, %arg1, %c0_i32, %c0_i32_0 : i32, i32, i32, i32
  }
  func.func @transform_3(%arg0: i32, %arg1: i32) -> (i32, i32, i32) {
    %c0_i32 = arith.constant 0 : i32
    %c0_i32_0 = arith.constant 0 : i32
    %c0_i32_1 = arith.constant 0 : i32
    return %arg0, %c0_i32, %c0_i32_0 : i32, i32, i32
  }
  func.func @transform_4(%arg0: i32, %arg1: i32) -> (i32, i32, i32) {
    %c0_i32 = arith.constant 0 : i32
    %c0_i32_0 = arith.constant 0 : i32
    %c0_i32_1 = arith.constant 0 : i32
    return %arg0, %c0_i32, %c0_i32_0 : i32, i32, i32
  }
}

module attributes {stable_mosaic.version = 11 : i64} {
  func.func @_bn_relu_kernel(%arg0: i32, %arg1: memref<1x4x4x128xbf16, #tpu.memory_space<vmem>>, %arg2: memref<1x1x1x128xf32, #tpu.memory_space<vmem>>, %arg3: memref<1x1x1x128xf32, #tpu.memory_space<vmem>>, %arg4: memref<1x4x4x128xbf16, #tpu.memory_space<vmem>>) attributes {dimension_semantics = [#tpu.dimension_semantics<parallel>], iteration_bounds = array<i64: 2>, scalar_prefetch = 0 : i64, scratch_operands = 0 : i64, tpu.core_type = #tpu.core_type<tc>, window_params = [{transform_indices = @transform_0, window_bounds = array<i64: 1, 4, 4, 128>}, {pipeline_mode = #tpu.pipeline_mode<synchronous>, transform_indices = @transform_1, window_bounds = array<i64: 1, 1, 1, 128>}, {pipeline_mode = #tpu.pipeline_mode<synchronous>, transform_indices = @transform_2, window_bounds = array<i64: 1, 1, 1, 128>}, {transform_indices = @transform_3, window_bounds = array<i64: 1, 4, 4, 128>}]} {
    %c0 = arith.constant 0 : index
    %c0_0 = arith.constant 0 : index
    %c0_1 = arith.constant 0 : index
    %c0_2 = arith.constant 0 : index
    %0 = vector.load %arg1[%c0, %c0_0, %c0_1, %c0_2] : memref<1x4x4x128xbf16, #tpu.memory_space<vmem>>, vector<1x4x4x128xbf16>
    %1 = arith.extf %0 : vector<1x4x4x128xbf16> to vector<1x4x4x128xf32>
    %c0_3 = arith.constant 0 : index
    %c0_4 = arith.constant 0 : index
    %c0_5 = arith.constant 0 : index
    %c0_6 = arith.constant 0 : index
    %2 = vector.load %arg2[%c0_3, %c0_4, %c0_5, %c0_6] : memref<1x1x1x128xf32, #tpu.memory_space<vmem>>, vector<1x1x1x128xf32>
    %3 = vector.broadcast %2 : vector<1x1x1x128xf32> to vector<1x4x4x128xf32>
    %4 = arith.mulf %1, %3 : vector<1x4x4x128xf32>
    %c0_7 = arith.constant 0 : index
    %c0_8 = arith.constant 0 : index
    %c0_9 = arith.constant 0 : index
    %c0_10 = arith.constant 0 : index
    %5 = vector.load %arg3[%c0_7, %c0_8, %c0_9, %c0_10] : memref<1x1x1x128xf32, #tpu.memory_space<vmem>>, vector<1x1x1x128xf32>
    %6 = vector.broadcast %5 : vector<1x1x1x128xf32> to vector<1x4x4x128xf32>
    %7 = arith.addf %4, %6 : vector<1x4x4x128xf32>
    %cst = arith.constant 0.000000e+00 : f32
    %8 = vector.broadcast %cst : f32 to vector<1x4x4x128xf32>
    %9 = arith.maximumf %7, %8 : vector<1x4x4x128xf32>
    %10 = arith.truncf %9 : vector<1x4x4x128xf32> to vector<1x4x4x128xbf16>
    %c0_11 = arith.constant 0 : index
    %c0_12 = arith.constant 0 : index
    %c0_13 = arith.constant 0 : index
    %c0_14 = arith.constant 0 : index
    %11 = vector.load %arg4[%c0_11, %c0_12, %c0_13, %c0_14] : memref<1x4x4x128xbf16, #tpu.memory_space<vmem>>, vector<1x4x4x128xbf16>
    tpu.vector_store %arg4[%c0_11, %c0_12, %c0_13, %c0_14], %10 {strides = array<i32>} : memref<1x4x4x128xbf16, #tpu.memory_space<vmem>>, vector<1x4x4x128xbf16>,
    return
  }
  func.func @transform_0(%arg0: i32) -> (i32, i32, i32, i32) {
    %c0_i32 = arith.constant 0 : i32
    %c0_i32_0 = arith.constant 0 : i32
    %c0_i32_1 = arith.constant 0 : i32
    %c0_i32_2 = arith.constant 0 : i32
    return %arg0, %c0_i32, %c0_i32_0, %c0_i32_1 : i32, i32, i32, i32
  }
  func.func @transform_1(%arg0: i32) -> (i32, i32, i32, i32) {
    %c0_i32 = arith.constant 0 : i32
    %c0_i32_0 = arith.constant 0 : i32
    %c0_i32_1 = arith.constant 0 : i32
    %c0_i32_2 = arith.constant 0 : i32
    %c0_i32_3 = arith.constant 0 : i32
    return %c0_i32, %c0_i32_0, %c0_i32_1, %c0_i32_2 : i32, i32, i32, i32
  }
  func.func @transform_2(%arg0: i32) -> (i32, i32, i32, i32) {
    %c0_i32 = arith.constant 0 : i32
    %c0_i32_0 = arith.constant 0 : i32
    %c0_i32_1 = arith.constant 0 : i32
    %c0_i32_2 = arith.constant 0 : i32
    %c0_i32_3 = arith.constant 0 : i32
    return %c0_i32, %c0_i32_0, %c0_i32_1, %c0_i32_2 : i32, i32, i32, i32
  }
  func.func @transform_3(%arg0: i32) -> (i32, i32, i32, i32) {
    %c0_i32 = arith.constant 0 : i32
    %c0_i32_0 = arith.constant 0 : i32
    %c0_i32_1 = arith.constant 0 : i32
    %c0_i32_2 = arith.constant 0 : i32
    return %arg0, %c0_i32, %c0_i32_0, %c0_i32_1 : i32, i32, i32, i32
  }
}

</mosaic_0001>

<bundles_post_ra>
// kernel: forward.5
= control target key start
LH: loop header
LB: loop body
LE: loop exit
PB: predicated region body
PF: predicated region fallthrough
CT: control target
= control target key end

     0   :  { %s389_s12 = smov 0   ;;  %s419_s0 = inlined_call_operand.vmem [shape: bf16[2,8,8,128], index: 0, kind: input, shape index: {}, may-alias: {0,3}]   ;;  %s420_s1 = inlined_call_operand.vmem [shape: f32[1,1,1,128], index: 1, kind: input, shape index: {}]   ;;  %s421_s2 = inlined_call_operand.vmem [shape: f32[1,1,1,128], index: 2, kind: input, shape index: {}]   ;;  %s422_s3 = inlined_call_operand.vmem [shape: bf16[2,8,8,128], index: 3, kind: output, shape index: {}, may-alias: {0,3}]  }
   0x1 LB: > { %s296_s13 = sadd.s32 4294967295, %s367_s12   ;;  %p300_p0 = scmp.ge.s32.totalorder %s367_s12, 1  ;;  %s367_s12 = sphi %s389_s12, %s13_s12  }
   0x2   : > { %p137_p1 = scmp.lt.s32.totalorder %s367_s12, 3 }
   0x4   : > { %p138_p2 = pnand %p300_p0, %p137_p1 }
   0x5   : > { %p161_p3 = scmp.lt.s32.totalorder (!%p138_p2), %s296_s13, 1  ;;  %v305_v0 = vld [vmem:[%s420_s1] ss:$0 sm:$0xff] (!%p138_p2) }
   0x6   : > { %141 = sbr.rel (%p138_p2) target bundleno = 29 (0x1d), region = 32  ;;  %v306_v13 = vld [vmem:[%s421_s2] ss:$0 sm:$0xff] (!%p138_p2) }
   0xd   : > { %s424_s13 = smov (!%p161_p3, %s296_s13), 1 }
   0xe   : > { %s309_s14 = sshll.u32 %s424_s13, 5 }
   0xf   : > { %s165_s17 = scalar_lea.vmem %s419_s0, %s309_s14  ;;  %s170_s24 = scalar_lea.vmem %s422_s3, %s309_s14 }
  0x10   : > { %v312_v1 = vld [vmem:[%s165_s17] sm:$0xff]   ;;  %v347_v2 = vld [vmem:[%s165_s17 + $0x8] sm:$0xff]   ;;  %v348_v3 = vld [vmem:[%s165_s17 + $0x10] sm:$0xff]  }
  0x11   : > { %v313_v4 = vunpack.c.l.bf16 %v312_v1  ;;  %v314_v5 = vunpack.c.h.bf16 %v312_v1  ;;  %v317_v6 = vunpack.c.l.bf16 %v347_v2  ;;  %v318_v7 = vunpack.c.h.bf16 %v347_v2  ;;  %v349_v8 = vld [vmem:[%s165_s17 + $0x18] sm:$0xff]  }
  0x12   : > { %v321_v9 = vunpack.c.l.bf16 %v348_v3  ;;  %v322_v10 = vunpack.c.h.bf16 %v348_v3  ;;  %v325_v11 = vunpack.c.l.bf16 %v349_v8  ;;  %v326_v12 = vunpack.c.h.bf16 %v349_v8 }
  0x13   : > { %v194_v14 = vmul.f32 %v313_v4, %v305_v0  ;;  %v195_v15 = vmul.f32 %v314_v5, %v305_v0  ;;  %v196_v16 = vmul.f32 %v317_v6, %v305_v0  ;;  %v197_v17 = vmul.f32 %v318_v7, %v305_v0 }
  0x14   : > { %v198_v18 = vmul.f32 %v321_v9, %v305_v0  ;;  %v199_v19 = vmul.f32 %v322_v10, %v305_v0  ;;  %v200_v20 = vmul.f32 %v325_v11, %v305_v0  ;;  %v201_v21 = vmul.f32 %v326_v12, %v305_v0 }
  0x15   : > { %v209_v22 = vadd.f32 %v306_v13, %v194_v14  ;;  %v210_v23 = vadd.f32 %v306_v13, %v195_v15  ;;  %v211_v24 = vadd.f32 %v306_v13, %v196_v16  ;;  %v212_v25 = vadd.f32 %v306_v13, %v197_v17 }
  0x16   : > { %v213_v26 = vadd.f32 %v306_v13, %v198_v18  ;;  %v214_v27 = vadd.f32 %v306_v13, %v199_v19  ;;  %v215_v28 = vadd.f32 %v306_v13, %v200_v20  ;;  %v216_v29 = vadd.f32 %v306_v13, %v201_v21 }
  0x17   : > { %v217_v30 = vmax.f32 %v209_v22, 0.0  ;;  %v218_v31 = vmax.f32 %v210_v23, 0.0  ;;  %v219_v32 = vmax.f32 %v211_v24, 0.0  ;;  %v220_v33 = vmax.f32 %v212_v25, 0.0 }
  0x18   : > { %v221_v34 = vmax.f32 %v213_v26, 0.0  ;;  %v222_v35 = vmax.f32 %v214_v27, 0.0  ;;  %v223_v36 = vmax.f32 %v215_v28, 0.0  ;;  %v224_v37 = vmax.f32 %v216_v29, 0.0 }
  0x19   : > { %v330_v38 = vpack.c.bf16 %v218_v31, %v217_v30  ;;  %v335_v39 = vpack.c.bf16 %v220_v33, %v219_v32 }
  0x1a   : > { %v340_v40 = vpack.c.bf16 %v222_v35, %v221_v34  ;;  %v345_v41 = vpack.c.bf16 %v224_v37, %v223_v36 }
  0x1b   : > { %331 = vst [vmem:[%s170_s24] sm:$0xff] %v330_v38   ;;  %350 = vst [vmem:[%s170_s24 + $0x8] sm:$0xff] %v335_v39  }
  0x1c   : > { %351 = vst [vmem:[%s170_s24 + $0x10] sm:$0xff] %v340_v40   ;;  %352 = vst [vmem:[%s170_s24 + $0x18] sm:$0xff] %v345_v41  }
  0x1d PF: > { %s13_s12 = sadd.s32 1, %s367_s12  }
  0x1e   : > { %p10_p4 = scmp.ge.s32.totalorder %s13_s12, 4  }
  0x20   :  { %12 = sbr.rel (!%p10_p4) target bundleno = 1 (0x1), region = 62 }

// kernel: forward.7
= control target key start
LH: loop header
LB: loop body
LE: loop exit
PB: predicated region body
PF: predicated region fallthrough
CT: control target
= control target key end

     0   :  { %s319_s12 = smov 0   ;;  %s342_s0 = inlined_call_operand.vmem [shape: bf16[2,4,4,128], index: 0, kind: input, shape index: {}, may-alias: {0,3}]   ;;  %s343_s1 = inlined_call_operand.vmem [shape: f32[1,1,1,128], index: 1, kind: input, shape index: {}]   ;;  %s344_s2 = inlined_call_operand.vmem [shape: f32[1,1,1,128], index: 2, kind: input, shape index: {}]   ;;  %s345_s3 = inlined_call_operand.vmem [shape: bf16[2,4,4,128], index: 3, kind: output, shape index: {}, may-alias: {0,3}]  }
   0x1 LB: > { %s268_s13 = sadd.s32 4294967295, %s297_s12   ;;  %p272_p0 = scmp.ge.s32.totalorder %s297_s12, 1  ;;  %s297_s12 = sphi %s319_s12, %s13_s12  }
   0x2   : > { %p137_p1 = scmp.lt.s32.totalorder %s297_s12, 3 }
   0x4   : > { %p138_p2 = pnand %p272_p0, %p137_p1 }
   0x5   : > { %p161_p3 = scmp.lt.s32.totalorder (!%p138_p2), %s268_s13, 1  ;;  %v277_v0 = vld [vmem:[%s343_s1] ss:$0 sm:$0xff] (!%p138_p2) }
   0x6   : > { %141 = sbr.rel (%p138_p2) target bundleno = 29 (0x1d), region = 32  ;;  %v278_v9 = vld [vmem:[%s344_s2] ss:$0 sm:$0xff] (!%p138_p2) }
   0xd   : > { %s347_s13 = smov (!%p161_p3, %s268_s13), 1 }
   0xe   : > { %s281_s14 = sshll.u32 %s347_s13, 3 }
   0xf   : > { %s165_s17 = scalar_lea.vmem %s342_s0, %s281_s14  ;;  %s170_s24 = scalar_lea.vmem %s345_s3, %s281_s14 }
  0x10   : > { %v171_v1 = vld [vmem:[%s165_s17] sm:$0x3]  ;;  %v172_v2 = vld [vmem:[%s165_s17 + $0x2] sm:$0x3]  ;;  %v173_v3 = vld [vmem:[%s165_s17 + $0x4] sm:$0x3] }
  0x11   : > { %v174_v4 = vld [vmem:[%s165_s17 + $0x6] sm:$0x3]  ;;  %v175_v5 = vunpack.c.l.bf16 %v171_v1  ;;  %v176_v6 = vunpack.c.l.bf16 %v172_v2  ;;  %v177_v7 = vunpack.c.l.bf16 %v173_v3 }
  0x12   : > { %v178_v8 = vunpack.c.l.bf16 %v174_v4 }
  0x13   : > { %v186_v10 = vmul.f32 %v277_v0, %v175_v5  ;;  %v187_v11 = vmul.f32 %v277_v0, %v176_v6  ;;  %v188_v12 = vmul.f32 %v277_v0, %v177_v7 }
  0x14   : > { %v189_v13 = vmul.f32 %v277_v0, %v178_v8 }
  0x15   : > { %v197_v14 = vadd.f32 %v278_v9, %v186_v10  ;;  %v198_v15 = vadd.f32 %v278_v9, %v187_v11  ;;  %v199_v16 = vadd.f32 %v278_v9, %v188_v12 }
  0x16   : > { %v200_v17 = vadd.f32 %v278_v9, %v189_v13 }
  0x17   : > { %v201_v18 = vmax.f32 %v197_v14, 0.0  ;;  %v202_v19 = vmax.f32 %v198_v15, 0.0  ;;  %v203_v20 = vmax.f32 %v199_v16, 0.0 }
  0x18   : > { %v204_v21 = vmax.f32 %v200_v17, 0.0 }
  0x19   : > { %v205_v22 = vpack.c.bf16 %v201_v18, %v201_v18  ;;  %v206_v23 = vpack.c.bf16 %v202_v19, %v202_v19  ;;  %v207_v24 = vpack.c.bf16 %v203_v20, %v203_v20 }
  0x1a   : > { %v208_v25 = vpack.c.bf16 %v204_v21, %v204_v21 }
  0x1b   : > { %209 = vst [vmem:[%s170_s24] sm:$0x3] %v205_v22  ;;  %210 = vst [vmem:[%s170_s24 + $0x2] sm:$0x3] %v206_v23 }
  0x1c   : > { %211 = vst [vmem:[%s170_s24 + $0x4] sm:$0x3] %v207_v24  ;;  %212 = vst [vmem:[%s170_s24 + $0x6] sm:$0x3] %v208_v25 }
  0x1d PF: > { %s13_s12 = sadd.s32 1, %s297_s12  }
  0x1e   : > { %p10_p4 = scmp.ge.s32.totalorder %s13_s12, 4  }
  0x20   :  { %12 = sbr.rel (!%p10_p4) target bundleno = 1 (0x1), region = 62 }

// kernel: forward.4
= control target key start
LH: loop header
LB: loop body
LE: loop exit
PB: predicated region body
PF: predicated region fallthrough
CT: control target
= control target key end

     0   :  { %s6036_s15 = smov 0   ;;  %s6038_s16 = smov 0   ;;  %s7060_s0 = inlined_call_operand.vmem [shape: bf16[8,10,10,4], index: 0, kind: input, shape index: {}]   ;;  %s7061_s1 = inlined_call_operand.vmem [shape: bf16[5,5,4,128], index: 1, kind: input, shape index: {}]   ;;  %s7062_s2 = inlined_call_operand.vmem [shape: bf16[2,8,8,128], index: 2, kind: output, shape index: {0}]   ;;  %s7063_s3 = inlined_call_operand.vmem [shape: f32[2,1,128], index: 3, kind: output, shape index: {1}]   ;;  %s7064_s4 = inlined_call_operand.vmem [shape: f32[2,1,128], index: 4, kind: output, shape index: {2}]  }
   0x1   :  { %s6040_s17 = smov 0  }
   0x2 LB: > { %s27_s18 = sadd.s32 1, %s6004_s16  ;;  %p4777_p0 = scmp.ge.s32.totalorder %s6008_s17, 1  ;;  %s6008_s17 = sphi %s6040_s17, %s15_s17   ;;  %s6004_s16 = sphi %s6038_s16, %s7070_s16   ;;  %s6000_s15 = sphi %s6036_s15, %s7069_s15  }
   0x3   : > { %p29_p1 = scmp.ge.s32.totalorder %s27_s18, 2  ;;  %p183_p2 = scmp.lt.s32.totalorder %s6008_s17, 3 }
   0x5   : > { %s7072_s18 = smov (%p29_p1, %s27_s18), 0  ;;  %p184_p3 = pnand %p4777_p0, %p183_p2 }
   0x6   : > { %v4790_v0 = vld [vmem:[%s7061_s1 + $0x2] sm:$0x3] (!%p184_p3)  ;;  %vm303_vm0 = vcmask (!%p184_p3), 1041408   ;;  %s4778_s21 = sshll.u32 (!%p184_p3), %s6000_s15, 2  ;;  %v5017_v2 = vld [vmem:[%s7061_s1 + $0x18] sm:$0x3] (!%p184_p3) }
   0x7   : > { %187 = sbr.rel (%p184_p3) target bundleno = 497 (0x1f1), region = 28  ;;  %5889 = vmatprep.subr.msk.bf16.mxu1 (!%p184_p3), %vm303_vm0, %v4790_v0  ;;  %v305_v1 = vsel (!%p184_p3), %vm303_vm0, %v4790_v0, 0  ;;  %p221_p4 = scmp.lt.s32.totalorder (!%p184_p3), %s4778_s21, 7  ;;  %v256_v3 = vld [vmem:[%s7061_s1] sm:$0x3] (!%p184_p3)  ;;  %5901 = vmatprep.subr.msk.bf16.mxu0 (!%p184_p3), %vm303_vm0, %v5017_v2  ;;  %v6070_v4 = vsel (!%p184_p3), %vm303_vm0, %v5017_v2, 0 }
   0x8   : > { %5446 = vmatpush3.bf16.msra.mxu1 (!%p184_p3), %v305_v1  ;;  %5566 = vmatpush3.bf16.msra.mxu0 (!%p184_p3), %v6070_v4  ;;  %v5042_v5 = vld [vmem:[%s7061_s1 + $0x1a] sm:$0x3] (!%p184_p3)  ;;  %v6081_v6 = vld [vmem:[%s7061_s1 + $0x1c] sm:$0x3] (!%p184_p3)  ;;  %v4807_v7 = vld [vmem:[%s7061_s1 + $0x4] sm:$0x3] (!%p184_p3) }
   0x9   : > { %5890 = vmatprep.subr.msk.bf16.mxu1 (!%p184_p3), %vm303_vm0, %v256_v3  ;;  %5903 = vmatprep.subr.msk.bf16.mxu0 (!%p184_p3), %vm303_vm0, %v5042_v5  ;;  %vm290_vm1 = vcmask (!%p184_p3), 31744   ;;  %v405_v8 = vsel (!%p184_p3), %vm303_vm0, %v256_v3, 0  ;;  %v6088_v9 = vsel (!%p184_p3), %vm303_vm0, %v5042_v5, 0  ;;  %vm488_vm2 = vsmask.f32 (!%p184_p3), 3328  ;;  %p228_p5 = scmp.lt.s32.totalorder (!%p184_p3), %s6000_s15, 1 }
   0xa   : > { %vm489_vm3 = vsmask.f32 (!%p184_p3), 7440  ;;  %v6097_v10 = vsel (!%p184_p3), %vm303_vm0, %v6081_v6, 0  ;;  %v6100_v11 = vsel (!%p184_p3), %vm303_vm0, %v4807_v7, 0  ;;  %v6105_v12 = vld [vmem:[%s7061_s1 + $0x1e] sm:$0x3] (!%p184_p3) }
   0xb   : > { %v6110_v13 = vld [vmem:[%s7061_s1 + $0x6] sm:$0x3] (!%p184_p3)  ;;  %v6119_v17 = vsel (!%p184_p3), %vm303_vm0, %v6105_v12, 0  ;;  %vm6151_vm4 = vmor (!%p184_p3), %vm488_vm2, %vm489_vm3  ;;  %vm959_vm5 = vcmask (!%p184_p3), 1042432   ;;  %vm960_vm6 = vcmask (!%p184_p3), 1046532  }
   0xc   : > { %v6123_v18 = vsel (!%p184_p3), %vm303_vm0, %v6110_v13, 0  ;;  %vm6245_vm7 = vmor (!%p184_p3), %vm959_vm5, %vm960_vm6 }
   0xe   : > { %s7074_s21 = smov (!%p221_p4, %s4778_s21), 7  ;;  %s7076_s15 = smov (!%p228_p5, %s6000_s15), 1 }
   0xf   : > { %s5915_s6 = smul.u32 80, %s7074_s21  ;;  %s7029_s8 = scalar_lea.vmem %s7064_s4, %s7076_s15 }
  0x10   : > { %s7035_s12 = scalar_lea.vmem %s7063_s3, %s7076_s15  ;;  %s5296_s13 = sshll.u32 %s7076_s15, 5 }
  0x11   : > { %s6093_s9 = scalar_lea.vmem %s7060_s0, %s5915_s6  ;;  %s7041_s20 = scalar_lea.vmem %s7062_s2, %s5296_s13 }
  0x12   : > { %v5941_v14 = vld [vmem:[%s6093_s9 + $0x50] ss:$8 sps:$4 sm:$0xff]   ;;  %v5942_v15 = vld [vmem:[%s6093_s9 + $0x60] ss:$8 sps:$4 sm:$0xff]   ;;  %v6128_v20 = vld [vmem:[%s6093_s9 + $0xc] sm:$0x1] }
  0x13   : > { %5447 = vmatprep.mubr.msk.bf16.mxu1 %vm290_vm1, %v5941_v14  ;;  %v5943_v16 = vld [vmem:[%s6093_s9 + $0x70] ss:$8 sps:$4 sm:$0xff]   ;;  %v5001_v19 = vld [vmem:[%s6093_s9 + $0x8] sm:$0xf]  ;;  %v6133_v23 = vld [vmem:[%s6093_s9 + $0x14] sm:$0x1] }
  0x14   : > { %5448 = vmatmul.mubr.msk.bf16.vlgmr.msra.gmra.mrb[0].mxu1 %vm290_vm1, %v5942_v15  ;;  %v5003_v21 = vld [vmem:[%s6093_s9 + $0x10] sm:$0xf]  ;;  %v5944_v22 = vld [vmem:[%s6093_s9 + $0x80] ss:$8 sps:$4 sm:$0xff]   ;;  %v2216_v24 = vshrl.u32 %v5001_v19, 16  ;;  %v2219_v25 = vshll.u32 %v5001_v19, 16 }
  0x15   : > { %5451 = vmatprep.mubr.msk.bf16.mxu1 %vm290_vm1, %v5943_v16  ;;  %5456 = vmatpush3.bf16.msra.mxu1 %v405_v8  ;;  %v2225_v26 = vshll.u32 %v6128_v20, 16  ;;  %v2230_v27 = vshrl.u32 %v5003_v21, 16  ;;  %v2233_v28 = vshll.u32 %v5003_v21, 16  ;;  %v2239_v29 = vshll.u32 %v6133_v23, 16  ;;  %v5005_v32 = vld [vmem:[%s6093_s9 + $0x18] sm:$0xf] }
  0x16   : > { %5891 = vmatprep.subr.msk.bf16.mxu1 %vm303_vm0, %v4807_v7  ;;  %v2685_v30 = vrot.slane %v6128_v20, 5  ;;  %v2689_v31 = vrot.slane %v6133_v23, 5  ;;  %v2218_v33 = vrot.slane %v2216_v24, 4  ;;  %v2221_v34 = vrot.slane %v2219_v25, 5  ;;  %v6142_v37 = vld [vmem:[%s6093_s9 + $0x1c] sm:$0x1] }
  0x17   : > { %v2227_v35 = vrot.slane %v2225_v26, 5  ;;  %v2232_v36 = vrot.slane %v2230_v27, 4  ;;  %v2235_v38 = vrot.slane %v2233_v28, 5  ;;  %v2241_v39 = vrot.slane %v2239_v29, 5  ;;  %v5007_v40 = vld [vmem:[%s6093_s9 + $0x20] sm:$0xf] }
  0x18   : > { %v6146_v41 = vld [vmem:[%s6093_s9 + $0x24] sm:$0x1]  ;;  %v2222_v42 = vor.u32 %v2221_v34, %v2218_v33  ;;  %v2244_v43 = vshrl.u32 %v5005_v32, 16  ;;  %v2247_v44 = vshll.u32 %v5005_v32, 16  ;;  %v2253_v45 = vshll.u32 %v6142_v37, 16 }
  0x19   : > { %v2236_v47 = vor.u32 %v2235_v38, %v2232_v36  ;;  %v2258_v48 = vshrl.u32 %v5007_v40, 16  ;;  %v2261_v49 = vshll.u32 %v5007_v40, 16  ;;  %v2267_v50 = vshll.u32 %v6146_v41, 16  ;;  %v5945_v55 = vld [vmem:[%s6093_s9] ss:$8 sps:$4 sm:$0xff]  }
  0x1a   : > { %v2223_v51 = vrot.slane %v2222_v42, 4  ;;  %v2246_v52 = vrot.slane %v2244_v43, 4  ;;  %v2249_v53 = vrot.slane %v2247_v44, 5  ;;  %v2255_v54 = vrot.slane %v2253_v45, 5  ;;  %v5946_v0 = vld [vmem:[%s6093_s9 + $0x10] ss:$8 sps:$4 sm:$0xff]  }
  0x1b   : > { %v2237_v56 = vrot.slane %v2236_v47, 4  ;;  %v2260_v57 = vrot.slane %v2258_v48, 4  ;;  %v2263_v58 = vrot.slane %v2261_v49, 5  ;;  %v2269_v59 = vrot.slane %v2267_v50, 5  ;;  %v5026_v3 = vld [vmem:[%s6093_s9 + $0x58] sm:$0xf] }
  0x1c   : > { %5452 = vmatmul.mubr.msk.bf16.gmra.mrb[4].mxu1 %vm290_vm1, %v5944_v22  ;;  %v2228_v60 = vsel %vm6151_vm4, %v2223_v51, %v2227_v35  ;;  %v2250_v61 = vor.u32 %v2249_v53, %v2246_v52  ;;  %v2693_v62 = vrot.slane %v6142_v37, 5  ;;  %v2697_v63 = vrot.slane %v6146_v41, 5  ;;  %v5027_v5 = vld [vmem:[%s6093_s9 + $0x5c] sm:$0x1]  ;;  %v5028_v7 = vld [vmem:[%s6093_s9 + $0x60] sm:$0xf] }
  0x1d   : > { %5457 = vmatprep.mubr.msk.bf16.mxu1 %vm290_vm1, %v5945_v55  ;;  %v2242_v1 = vsel %vm6151_vm4, %v2237_v56, %v2241_v39  ;;  %v2264_v2 = vor.u32 %v2263_v58, %v2260_v57  ;;  %v5029_v15 = vld [vmem:[%s6093_s9 + $0x64] sm:$0x1]  ;;  %v2446_v16 = vshrl.u32 %v5026_v3, 16  ;;  %v2449_v19 = vshll.u32 %v5026_v3, 16  ;;  %v5030_v26 = vld [vmem:[%s6093_s9 + $0x68] sm:$0xf] }
  0x1e   : > { %v5018_v8 = vcombine.low %v2228_v60, %v2242_v1  ;;  %v2251_v14 = vrot.slane %v2250_v61, 4  ;;  %v2455_v22 = vshll.u32 %v5027_v5, 16  ;;  %v2460_v24 = vshrl.u32 %v5028_v7, 16  ;;  %v5031_v33 = vld [vmem:[%s6093_s9 + $0x6c] sm:$0x1] }
  0x1f   : > { %v2265_v21 = vrot.slane %v2264_v2, 4  ;;  %v2463_v25 = vshll.u32 %v5028_v7, 16  ;;  %v2448_v28 = vrot.slane %v2446_v16, 4  ;;  %v2451_v29 = vrot.slane %v2449_v19, 5  ;;  %v5032_v39 = vld [vmem:[%s6093_s9 + $0x70] sm:$0xf] }
  0x20   : > { %5567 = vmatprep.mubr.msk.bf16.mxu0 %vm290_vm1, %v5018_v8  ;;  %v2256_v27 = vsel %vm6151_vm4, %v2251_v14, %v2255_v54  ;;  %v2469_v32 = vshll.u32 %v5029_v15, 16  ;;  %v2457_v35 = vrot.slane %v2455_v22, 5  ;;  %v2462_v36 = vrot.slane %v2460_v24, 4  ;;  %v5033_v44 = vld [vmem:[%s6093_s9 + $0x74] sm:$0x1] }
  0x21   : > { %v2270_v34 = vsel %vm6151_vm4, %v2265_v21, %v2269_v59  ;;  %v2465_v38 = vrot.slane %v2463_v25, 5  ;;  %v2452_v42 = vor.u32 %v2451_v29, %v2448_v28  ;;  %v2474_v45 = vshrl.u32 %v5030_v26, 16  ;;  %v5947_v55 = vld [vmem:[%s6093_s9 + $0x20] ss:$8 sps:$4 sm:$0xff]   ;;  %v5034_v1 = vld [vmem:[%s6093_s9 + $0x78] sm:$0xf] }
  0x22   : > { %v5019_v40 = vcombine.low %v2256_v27, %v2270_v34  ;;  %v2471_v43 = vrot.slane %v2469_v32, 5  ;;  %v2477_v48 = vshll.u32 %v5030_v26, 16  ;;  %v2483_v49 = vshll.u32 %v5031_v33, 16  ;;  %v5035_v2 = vld [vmem:[%s6093_s9 + $0x7c] sm:$0x1] }
  0x23   : > { %v2466_v47 = vor.u32 %v2465_v38, %v2462_v36  ;;  %v2488_v50 = vshrl.u32 %v5032_v39, 16  ;;  %v2453_v51 = vrot.slane %v2452_v42, 4  ;;  %v2476_v52 = vrot.slane %v2474_v45, 4  ;;  %v5036_v3 = vld [vmem:[%s6093_s9 + $0x80] sm:$0xf] }
  0x24   : > { %5458 = vmatmul.mubr.msk.bf16.vlgmr.msra.gmra.mrb[0].mxu1 %vm290_vm1, %v5946_v0  ;;  %5568 = vmatmul.mubr.msk.bf16.vlgmr.msra.gmra.mrb[0].mxu0 %vm290_vm1, %v5019_v40  ;;  %v2491_v53 = vshll.u32 %v5032_v39, 16  ;;  %v2497_v54 = vshll.u32 %v5033_v44, 16  ;;  %v2479_v57 = vrot.slane %v2477_v48, 5  ;;  %v5037_v8 = vld [vmem:[%s6093_s9 + $0x84] sm:$0x1]  ;;  %v2502_v14 = vshrl.u32 %v5034_v1, 16 }
  0x25   : > { %5466 = vmatpush3.bf16.msra.mxu1 %v6100_v11  ;;  %5576 = vmatpush3.bf16.msra.mxu0 %v6088_v9  ;;  %v2467_v56 = vrot.slane %v2466_v47, 4  ;;  %v2485_v11 = vrot.slane %v2483_v49, 5  ;;  %v2490_v58 = vrot.slane %v2488_v50, 4  ;;  %v2458_v59 = vsel %vm6151_vm4, %v2453_v51, %v2457_v35  ;;  %v5038_v22 = vld [vmem:[%s6093_s9 + $0x88] sm:$0xf] }
  0x26   : > { %5892 = vmatprep.subr.msk.bf16.mxu1 %vm303_vm0, %v6110_v13  ;;  %5904 = vmatprep.subr.msk.bf16.mxu0 %vm303_vm0, %v6081_v6  ;;  %v2493_v60 = vrot.slane %v2491_v53, 5  ;;  %v2499_v61 = vrot.slane %v2497_v54, 5  ;;  %v5948_v13 = vld [vmem:[%s6093_s9 + $0x30] ss:$8 sps:$4 sm:$0xff]   ;;  %v2480_v0 = vor.u32 %v2479_v57, %v2476_v52  ;;  %v2505_v15 = vshll.u32 %v5034_v1, 16 }
  0x27   : > { %5461 = vmatprep.mubr.msk.bf16.mxu1 %vm290_vm1, %v5947_v55  ;;  %v2472_v9 = vsel %vm6151_vm4, %v2467_v56, %v2471_v43  ;;  %v2511_v16 = vshll.u32 %v5035_v2, 16  ;;  %v2516_v19 = vshrl.u32 %v5036_v3, 16  ;;  %v2519_v21 = vshll.u32 %v5036_v3, 16  ;;  %v5039_v28 = vld [vmem:[%s6093_s9 + $0x8c] sm:$0x1] }
  0x28   : > { %v5043_v5 = vcombine.low %v2458_v59, %v2472_v9  ;;  %v2494_v7 = vor.u32 %v2493_v60, %v2490_v58  ;;  %v2481_v6 = vrot.slane %v2480_v0, 4  ;;  %v2504_v25 = vrot.slane %v2502_v14, 4  ;;  %v5040_v35 = vld [vmem:[%s6093_s9 + $0x90] sm:$0xf]  ;;  %v5041_v40 = vld [vmem:[%s6093_s9 + $0x94] sm:$0x1] }
  0x29   : > { %v2507_v26 = vrot.slane %v2505_v15, 5  ;;  %v2525_v27 = vshll.u32 %v5037_v8, 16  ;;  %v2513_v32 = vrot.slane %v2511_v16, 5  ;;  %v2518_v33 = vrot.slane %v2516_v19, 4  ;;  %v472_v48 = vld [vmem:[%s6093_s9] sm:$0xf] }
  0x2a   : > { %5577 = vmatprep.mubr.msk.bf16.mxu0 %vm290_vm1, %v5043_v5  ;;  %v2495_v24 = vrot.slane %v2494_v7, 4  ;;  %v2486_v29 = vsel %vm6151_vm4, %v2481_v6, %v2485_v11  ;;  %v2521_v34 = vrot.slane %v2519_v21, 5  ;;  %v2530_v42 = vshrl.u32 %v5038_v22, 16  ;;  %v6210_v57 = vld [vmem:[%s6093_s9 + $0x4] sm:$0x1] }
  0x2b   : > { %v2508_v38 = vor.u32 %v2507_v26, %v2504_v25  ;;  %v2527_v39 = vrot.slane %v2525_v27, 5  ;;  %v2533_v45 = vshll.u32 %v5038_v22, 16  ;;  %v2539_v47 = vshll.u32 %v5039_v28, 16  ;;  %v474_v60 = vld [vmem:[%s6093_s9 + $0x8] sm:$0xf] }
  0x2c   : > { %5462 = vmatmul.mubr.msk.bf16.gmra.mrb[4].mxu1 %vm290_vm1, %v5948_v13  ;;  %v2500_v36 = vsel %vm6151_vm4, %v2495_v24, %v2499_v61  ;;  %v2522_v44 = vor.u32 %v2521_v34, %v2518_v33  ;;  %v2532_v50 = vrot.slane %v2530_v42, 4  ;;  %v2544_v51 = vshrl.u32 %v5040_v35, 16  ;;  %v6220_v1 = vld [vmem:[%s6093_s9 + $0xc] sm:$0x1]  ;;  %v476_v3 = vld [vmem:[%s6093_s9 + $0x10] sm:$0xf] }
  0x2d   : > { %v5044_v43 = vcombine.low %v2486_v29, %v2500_v36  ;;  %v2509_v49 = vrot.slane %v2508_v38, 4  ;;  %v2547_v52 = vshll.u32 %v5040_v35, 16  ;;  %v2535_v54 = vrot.slane %v2533_v45, 5  ;;  %v6229_v24 = vld [vmem:[%s6093_s9 + $0x14] sm:$0x1] }
  0x2e   : > { %v2523_v53 = vrot.slane %v2522_v44, 4  ;;  %v2541_v55 = vrot.slane %v2539_v47, 5  ;;  %v2553_v56 = vshll.u32 %v5041_v40, 16  ;;  %v2546_v58 = vrot.slane %v2544_v51, 4  ;;  %v478_v29 = vld [vmem:[%s6093_s9 + $0x18] sm:$0xf] }
  0x2f   : > { %v2514_v11 = vsel %vm6151_vm4, %v2509_v49, %v2513_v32  ;;  %v2549_v59 = vrot.slane %v2547_v52, 5  ;;  %v492_v61 = vshrl.u32 %v472_v48, 16  ;;  %v2536_v9 = vor.u32 %v2535_v54, %v2532_v50  ;;  %v6235_v32 = vld [vmem:[%s6093_s9 + $0x1c] sm:$0x1]  ;;  %v5051_v38 = vld [vmem:[%s6093_s9 + $0x8] sm:$0xe] }
  0x30   : > { %5578 = vmatmul.mubr.msk.bf16.vlgmr.msra.gmra.mrb[0].mxu0 %vm290_vm1, %v5044_v43  ;;  %v2528_v13 = vsel %vm6151_vm4, %v2523_v53, %v2527_v39  ;;  %v2555_v0 = vrot.slane %v2553_v56, 5  ;;  %v495_v2 = vshll.u32 %v472_v48, 16  ;;  %v501_v14 = vshll.u32 %v6210_v57, 16  ;;  %v5052_v44 = vld [vmem:[%s6093_s9 + $0x10] sm:$0xe] }
  0x31   : > { %5586 = vmatpush3.bf16.msra.mxu0 %v6097_v10  ;;  %v5045_v5 = vcombine.low %v2514_v11, %v2528_v13  ;;  %v2550_v7 = vor.u32 %v2549_v59, %v2546_v58  ;;  %v494_v8 = vrot.slane %v492_v61, 4  ;;  %v2537_v10 = vrot.slane %v2536_v9, 4  ;;  %v5053_v51 = vld [vmem:[%s6093_s9 + $0x18] sm:$0xe]  ;;  %v5054_v56 = vld [vmem:[%s6093_s9 + $0x20] sm:$0xe] }
  0x32   : > { %5905 = vmatprep.subr.msk.bf16.mxu0 %vm303_vm0, %v6105_v12  ;;  %v497_v15 = vrot.slane %v495_v2, 5  ;;  %v506_v6 = vshrl.u32 %v474_v60, 16  ;;  %v509_v16 = vshll.u32 %v474_v60, 16  ;;  %v503_v21 = vrot.slane %v501_v14, 5  ;;  %v480_v61 = vld [vmem:[%s6093_s9 + $0x20] sm:$0xf] }
  0x33   : > { %5581 = vmatprep.mubr.msk.bf16.mxu0 %vm290_vm1, %v5045_v5  ;;  %v2551_v19 = vrot.slane %v2550_v7, 4  ;;  %v515_v22 = vshll.u32 %v6220_v1, 16  ;;  %v520_v25 = vshrl.u32 %v476_v3, 16  ;;  %v2542_v26 = vsel %vm6151_vm4, %v2537_v10, %v2541_v55  ;;  %v6262_v14 = vld [vmem:[%s6093_s9 + $0x24] sm:$0x1] }
  0x34   : > { %v498_v12 = vor.u32 %v497_v15, %v494_v8  ;;  %v508_v27 = vrot.slane %v506_v6, 4  ;;  %v511_v28 = vrot.slane %v509_v16, 5  ;;  %v523_v36 = vshll.u32 %v476_v3, 16  ;;  %v6274_v15 = vld [vmem:[%s6093_s9 + $0x2c] sm:$0x1] }
  0x35   : > { %v2556_v33 = vsel %vm6151_vm4, %v2551_v19, %v2555_v0  ;;  %v517_v34 = vrot.slane %v515_v22, 5  ;;  %v522_v35 = vrot.slane %v520_v25, 4  ;;  %v529_v43 = vshll.u32 %v6229_v24, 16  ;;  %v484_v37 = vld [vmem:[%s6093_s9 + $0x30] sm:$0xf] }
  0x36   : > { %v5046_v39 = vcombine.low %v2542_v26, %v2556_v33  ;;  %v499_v40 = vrot.slane %v498_v12, 4  ;;  %v512_v42 = vor.u32 %v511_v28, %v508_v27  ;;  %v525_v45 = vrot.slane %v523_v36, 5  ;;  %v6291_v27 = vld [vmem:[%s6093_s9 + $0x34] sm:$0x1]  ;;  %v486_v33 = vld [vmem:[%s6093_s9 + $0x38] sm:$0xf] }
  0x37   : > { %v534_v47 = vshrl.u32 %v478_v29, 16  ;;  %v537_v48 = vshll.u32 %v478_v29, 16  ;;  %v543_v49 = vshll.u32 %v6235_v32, 16  ;;  %v531_v54 = vrot.slane %v529_v43, 5 }
  0x38   : > { %5582 = vmatmul.mubr.msk.bf16.gmra.mrb[4].mxu0 %vm290_vm1, %v5046_v39  ;;  %v504_v52 = vsel %vm6151_vm4, %v499_v40, %v503_v21  ;;  %v513_v53 = vrot.slane %v512_v42, 4  ;;  %v5059_v55 = vrot.slane %v5051_v38, 9  ;;  %v526_v11 = vor.u32 %v525_v45, %v522_v35  ;;  %v6300_v38 = vld [vmem:[%s6093_s9 + $0x3c] sm:$0x1]  ;;  %v4849_v40 = vld [vmem:[%s7061_s1 + $0x8] sm:$0x3] }
  0x39   : > { %v536_v58 = vrot.slane %v534_v47, 4  ;;  %v539_v59 = vrot.slane %v537_v48, 5  ;;  %v545_v60 = vrot.slane %v543_v49, 5  ;;  %v5060_v0 = vrot.slane %v5052_v44, 9  ;;  %v5010_v47 = vld [vmem:[%s6093_s9 + $0x2c] sm:$0x1] }
  0x3a   : > { %v518_v13 = vsel %vm6151_vm4, %v513_v53, %v517_v34  ;;  %v2686_v9 = vsel %vm6245_vm7, %v5059_v55, %v2685_v30  ;;  %v5061_v2 = vrot.slane %v5053_v51, 9  ;;  %v527_v5 = vrot.slane %v526_v11, 4  ;;  %v482_v30 = vld [vmem:[%s6093_s9 + $0x28] sm:$0xf] }
  0x3b   : > { %v4808_v3 = vcombine.low %v504_v52, %v518_v13  ;;  %v540_v7 = vor.u32 %v539_v59, %v536_v58  ;;  %v5062_v8 = vrot.slane %v5054_v56, 9  ;;  %v2690_v10 = vsel %vm6245_vm7, %v5060_v0, %v2689_v31  ;;  %v5055_v48 = vld [vmem:[%s6093_s9 + $0x28] sm:$0xe]  ;;  %v5056_v58 = vld [vmem:[%s6093_s9 + $0x30] sm:$0xe] }
  0x3c   : > { %v2694_v20 = vsel %vm6245_vm7, %v5061_v2, %v2693_v62  ;;  %v548_v6 = vshrl.u32 %v480_v61, 16  ;;  %v551_v16 = vshll.u32 %v480_v61, 16  ;;  %v532_v19 = vsel %vm6151_vm4, %v527_v5, %v531_v54  ;;  %v6287_v62 = vld [vmem:[%s7061_s1 + $0x20] sm:$0x3]  ;;  %v5012_v54 = vld [vmem:[%s6093_s9 + $0x34] sm:$0x1] }
  0x3d   : > { %5467 = vmatprep.mubr.msk.bf16.mxu1 %vm290_vm1, %v4808_v3  ;;  %v541_v23 = vrot.slane %v540_v7, 4  ;;  %v5068_v21 = vcombine.low %v2686_v9, %v2690_v10  ;;  %v2698_v31 = vsel %vm6245_vm7, %v5062_v8, %v2697_v63  ;;  %v557_v12 = vshll.u32 %v6262_v14, 16  ;;  %v5014_v3 = vld [vmem:[%s6093_s9 + $0x3c] sm:$0x1]  ;;  %v5016_v5 = vld [vmem:[%s6093_s9 + $0x44] sm:$0x1] }
  0x3e   : > { %v5069_v22 = vcombine.low %v2694_v20, %v2698_v31  ;;  %v550_v25 = vrot.slane %v548_v6, 4  ;;  %v553_v26 = vrot.slane %v551_v16, 5  ;;  %v562_v63 = vshrl.u32 %v482_v30, 16  ;;  %v5057_v7 = vld [vmem:[%s6093_s9 + $0x38] sm:$0xe] }
  0x3f   : > { %v546_v41 = vsel %vm6151_vm4, %v541_v23, %v545_v60  ;;  %5587 = vmatprep.mubr.msk.bf16.mxu0 %vm290_vm1, %v5068_v21  ;;  %v565_v28 = vshll.u32 %v482_v30, 16  ;;  %v571_v29 = vshll.u32 %v6274_v15, 16  ;;  %v559_v36 = vrot.slane %v557_v12, 5  ;;  %v5058_v20 = vld [vmem:[%s6093_s9 + $0x40] sm:$0xe] }
  0x40   : > { %v4809_v34 = vcombine.low %v532_v19, %v546_v41  ;;  %5588 = vmatmul.mubr.msk.bf16.vlgmr.msra.gmra.mrb[0].mxu0 %vm290_vm1, %v5069_v22  ;;  %v554_v35 = vor.u32 %v553_v26, %v550_v25  ;;  %v576_v39 = vshrl.u32 %v484_v37, 16  ;;  %v564_v42 = vrot.slane %v562_v63, 4  ;;  %v4817_v22 = vld [vmem:[%s6093_s9 + $0x54] sm:$0x1]  ;;  %v4818_v63 = vld [vmem:[%s6093_s9 + $0x58] sm:$0xf] }
  0x41   : > { %5596 = vmatpush3.bf16.msra.mxu0 %v6119_v17  ;;  %v567_v43 = vrot.slane %v565_v28, 5  ;;  %v573_v44 = vrot.slane %v571_v29, 5  ;;  %v579_v45 = vshll.u32 %v484_v37, 16  ;;  %v585_v52 = vshll.u32 %v6291_v27, 16  ;;  %v4816_v37 = vld [vmem:[%s6093_s9 + $0x50] sm:$0xf] }
  0x42   : > { %5468 = vmatmul.mubr.msk.bf16.vlgmr.msra.gmra.mrb[0].mxu1 %vm290_vm1, %v4809_v34  ;;  %v555_v49 = vrot.slane %v554_v35, 4  ;;  %v578_v51 = vrot.slane %v576_v39, 4  ;;  %v590_v53 = vshrl.u32 %v486_v33, 16  ;;  %5906 = vmatprep.subr.msk.bf16.mxu0 %vm303_vm0, %v6287_v62  ;;  %v593_v56 = vshll.u32 %v486_v33, 16  ;;  %v4819_v28 = vld [vmem:[%s6093_s9 + $0x5c] sm:$0x1] }
  0x43   : > { %v568_v17 = vor.u32 %v567_v43, %v564_v42  ;;  %v581_v55 = vrot.slane %v579_v45, 5  ;;  %v599_v11 = vshll.u32 %v6300_v38, 16  ;;  %5476 = vmatpush3.bf16.msra.mxu1 %v6123_v18  ;;  %v5063_v61 = vrot.slane %v5055_v48, 9 }
  0x44   : > { %v560_v59 = vsel %vm6151_vm4, %v555_v49, %v559_v36  ;;  %v592_v60 = vrot.slane %v590_v53, 4  ;;  %5893 = vmatprep.subr.msk.bf16.mxu1 %vm303_vm0, %v4849_v40  ;;  %v587_v0 = vrot.slane %v585_v52, 5  ;;  %v595_v2 = vrot.slane %v593_v56, 5  ;;  %v4820_v36 = vld [vmem:[%s6093_s9 + $0x60] sm:$0xf] }
  0x45   : > { %v569_v13 = vrot.slane %v568_v17, 4  ;;  %v582_v9 = vor.u32 %v581_v55, %v578_v51  ;;  %v2701_v8 = vrot.slane %v5010_v47, 5  ;;  %v5064_v18 = vrot.slane %v5056_v58, 9  ;;  %v4822_v51 = vld [vmem:[%s6093_s9 + $0x68] sm:$0xf] }
  0x46   : > { %v2705_v10 = vrot.slane %v5012_v54, 5  ;;  %v596_v16 = vor.u32 %v595_v2, %v592_v60  ;;  %v601_v19 = vrot.slane %v599_v11, 5  ;;  %v6333_v25 = vsel %vm303_vm0, %v6287_v62, 0  ;;  %v5949_v52 = vld [vmem:[%s6093_s9 + $0xa8] ss:$8 sps:$4 sm:$0xff]  }
  0x47   : > { %v574_v30 = vsel %vm6151_vm4, %v569_v13, %v573_v44  ;;  %v583_v6 = vrot.slane %v582_v9, 4  ;;  %v2702_v21 = vsel %vm6245_vm7, %v5063_v61, %v2701_v8  ;;  %v6340_v29 = vsel %vm303_vm0, %v4849_v40, 0  ;;  %v4821_v44 = vld [vmem:[%s6093_s9 + $0x64] sm:$0x1]  ;;  %v4823_v56 = vld [vmem:[%s6093_s9 + $0x6c] sm:$0x1] }
  0x48   : > { %v4810_v23 = vcombine.low %v560_v59, %v574_v30  ;;  %v2706_v31 = vsel %vm6245_vm7, %v5064_v18, %v2705_v10  ;;  %v597_v12 = vrot.slane %v596_v16, 4  ;;  %v5065_v33 = vrot.slane %v5057_v7, 9  ;;  %v4824_v11 = vld [vmem:[%s6093_s9 + $0x70] sm:$0xf]  ;;  %v4825_v13 = vld [vmem:[%s6093_s9 + $0x74] sm:$0x1] }
  0x49   : > { %v588_v26 = vsel %vm6151_vm4, %v583_v6, %v587_v0  ;;  %v5070_v41 = vcombine.low %v2702_v21, %v2706_v31  ;;  %v2709_v34 = vrot.slane %v5014_v3, 5  ;;  %v5066_v35 = vrot.slane %v5058_v20, 9  ;;  %v4826_v10 = vld [vmem:[%s6093_s9 + $0x78] sm:$0xf] }
  0x4a   : > { %5471 = vmatprep.mubr.msk.bf16.mxu1 %vm290_vm1, %v4810_v23  ;;  %v2713_v62 = vrot.slane %v5016_v5, 5  ;;  %v602_v39 = vsel %vm6151_vm4, %v597_v12, %v601_v19  ;;  %v722_v42 = vshrl.u32 %v4816_v37, 16  ;;  %v725_v43 = vshll.u32 %v4816_v37, 16  ;;  %v5950_v19 = vld [vmem:[%s6093_s9 + $0xb8] ss:$8 sps:$4 sm:$0xff]  }
  0x4b   : > { %5591 = vmatprep.mubr.msk.bf16.mxu0 %vm290_vm1, %v5070_v41  ;;  %v731_v40 = vshll.u32 %v4817_v22, 16  ;;  %v4811_v45 = vcombine.low %v588_v26, %v602_v39  ;;  %v2710_v47 = vsel %vm6245_vm7, %v5065_v33, %v2709_v34  ;;  %v736_v49 = vshrl.u32 %v4818_v63, 16  ;;  %v4827_v12 = vld [vmem:[%s6093_s9 + $0x7c] sm:$0x1]  ;;  %v5951_v39 = vld [vmem:[%s6093_s9 + $0xc8] ss:$8 sps:$4 sm:$0xff]  }
  0x4c   : > { %v2714_v48 = vsel %vm6245_vm7, %v5066_v35, %v2713_v62  ;;  %v724_v54 = vrot.slane %v722_v42, 4  ;;  %v727_v17 = vrot.slane %v725_v43, 5  ;;  %v739_v59 = vshll.u32 %v4818_v63, 16  ;;  %v6371_v42 = vld [vmem:[%s7061_s1 + $0x22] sm:$0x3] }
  0x4d   : > { %v5071_v53 = vcombine.low %v2710_v47, %v2714_v48  ;;  %v733_v55 = vrot.slane %v731_v40, 5  ;;  %5472 = vmatmul.mubr.msk.bf16.gmra.mrb[4].mxu1 %vm290_vm1, %v4811_v45  ;;  %v738_v58 = vrot.slane %v736_v49, 4  ;;  %v745_v60 = vshll.u32 %v4819_v28, 16  ;;  %v4828_v28 = vld [vmem:[%s6093_s9 + $0x80] sm:$0xf] }
  0x4e   : > { %v750_v61 = vshrl.u32 %v4820_v36, 16  ;;  %v728_v9 = vor.u32 %v727_v17, %v724_v54  ;;  %v753_v0 = vshll.u32 %v4820_v36, 16  ;;  %v759_v2 = vshll.u32 %v4821_v44, 16  ;;  %v4829_v36 = vld [vmem:[%s6093_s9 + $0x84] sm:$0x1] }
  0x4f   : > { %5592 = vmatmul.mubr.msk.bf16.gmra.mrb[4].mxu0 %vm290_vm1, %v5071_v53  ;;  %v764_v3 = vshrl.u32 %v4822_v51, 16  ;;  %v741_v5 = vrot.slane %v739_v59, 5  ;;  %v747_v7 = vrot.slane %v745_v60, 5  ;;  %v767_v18 = vshll.u32 %v4822_v51, 16  ;;  %v4830_v47 = vld [vmem:[%s6093_s9 + $0x88] sm:$0xf] }
  0x50   : > { %v752_v8 = vrot.slane %v750_v61, 4  ;;  %5597 = vmatprep.mubr.msk.bf16.mxu0 %vm290_vm1, %v5949_v52  ;;  %v729_v20 = vrot.slane %v728_v9, 4  ;;  %v755_v30 = vrot.slane %v753_v0, 5  ;;  %v761_v6 = vrot.slane %v759_v2, 5  ;;  %v4831_v53 = vld [vmem:[%s6093_s9 + $0x8c] sm:$0x1] }
  0x51   : > { %v766_v16 = vrot.slane %v764_v3, 4  ;;  %v742_v23 = vor.u32 %v741_v5, %v738_v58  ;;  %v769_v21 = vrot.slane %v767_v18, 5  ;;  %v773_v31 = vshll.u32 %v4823_v56, 16  ;;  %v6389_v9 = vld [vmem:[%s7061_s1 + $0xa] sm:$0x3] }
  0x52   : > { %v778_v37 = vshrl.u32 %v4824_v11, 16  ;;  %v734_v22 = vsel %vm6151_vm4, %v729_v20, %v733_v55  ;;  %v756_v26 = vor.u32 %v755_v30, %v752_v8  ;;  %v781_v41 = vshll.u32 %v4824_v11, 16  ;;  %v935_v11 = vld [vmem:[%s6093_s9] sm:$0xe] }
  0x53   : > { %v787_v63 = vshll.u32 %v4825_v13, 16  ;;  %v743_v33 = vrot.slane %v742_v23, 4  ;;  %v770_v34 = vor.u32 %v769_v21, %v766_v16  ;;  %v775_v35 = vrot.slane %v773_v31, 5  ;;  %v936_v13 = vld [vmem:[%s6093_s9 + $0x8] sm:$0xe] }
  0x54   : > { %v780_v62 = vrot.slane %v778_v37, 4  ;;  %v757_v43 = vrot.slane %v756_v26, 4  ;;  %v783_v40 = vrot.slane %v781_v41, 5  ;;  %v792_v45 = vshrl.u32 %v4826_v10, 16 }
  0x55   : > { %v789_v44 = vrot.slane %v787_v63, 5  ;;  %v748_v48 = vsel %vm6151_vm4, %v743_v33, %v747_v7  ;;  %v771_v49 = vrot.slane %v770_v34, 4  ;;  %v795_v51 = vshll.u32 %v4826_v10, 16  ;;  %v5952_v7 = vld [vmem:[%s6093_s9 + $0xd8] ss:$8 sps:$4 sm:$0xff]  }
  0x56   : > { %v801_v52 = vshll.u32 %v4827_v12, 16  ;;  %v4833_v54 = vcombine.low %v734_v22, %v748_v48  ;;  %v762_v17 = vsel %vm6151_vm4, %v757_v43, %v761_v6  ;;  %v784_v55 = vor.u32 %v783_v40, %v780_v62  ;;  %v5953_v22 = vld [vmem:[%s6093_s9 + $0xf8] ss:$8 sps:$4 sm:$0xff]  }
  0x57   : > { %5598 = vmatmul.mubr.msk.bf16.vlgmr.msra.gmra.mrb[0].mxu0 %vm290_vm1, %v5950_v19  ;;  %v794_v56 = vrot.slane %v792_v45, 4  ;;  %v776_v58 = vsel %vm6151_vm4, %v771_v49, %v775_v35  ;;  %v797_v59 = vrot.slane %v795_v51, 5  ;;  %v806_v61 = vshrl.u32 %v4828_v28, 16  ;;  %v937_v19 = vld [vmem:[%s6093_s9 + $0x10] sm:$0xe] }
  0x58   : > { %5606 = vmatpush3.bf16.msra.mxu0 %v6333_v25  ;;  %v803_v60 = vrot.slane %v801_v52, 5  ;;  %5601 = vmatprep.mubr.msk.bf16.mxu0 %vm290_vm1, %v5951_v39  ;;  %v4834_v0 = vcombine.low %v762_v17, %v776_v58  ;;  %v785_v2 = vrot.slane %v784_v55, 4  ;;  %v809_v3 = vshll.u32 %v4828_v28, 16  ;;  %v938_v28 = vld [vmem:[%s6093_s9 + $0x18] sm:$0xe] }
  0x59   : > { %5477 = vmatprep.mubr.msk.bf16.mxu1 %vm290_vm1, %v4833_v54  ;;  %v815_v5 = vshll.u32 %v4829_v36, 16  ;;  %5907 = vmatprep.subr.msk.bf16.mxu0 %vm303_vm0, %v6371_v42  ;;  %v798_v25 = vor.u32 %v797_v59, %v794_v56  ;;  %v808_v8 = vrot.slane %v806_v61, 4  ;;  %v820_v18 = vshrl.u32 %v4830_v47, 16  ;;  %v941_v51 = vld [vmem:[%s6093_s9 + $0x30] sm:$0xe] }
  0x5a   : > { %v823_v10 = vshll.u32 %v4830_v47, 16  ;;  %5478 = vmatmul.mubr.msk.bf16.vlgmr.msra.gmra.mrb[0].mxu1 %vm290_vm1, %v4834_v0  ;;  %v790_v20 = vsel %vm6151_vm4, %v785_v2, %v789_v44  ;;  %v811_v30 = vrot.slane %v809_v3, 5  ;;  %v829_v16 = vshll.u32 %v4831_v53, 16  ;;  %v940_v47 = vld [vmem:[%s6093_s9 + $0x28] sm:$0xe] }
  0x5b   : > { %v817_v6 = vrot.slane %v815_v5, 5  ;;  %v799_v23 = vrot.slane %v798_v25, 4  ;;  %v822_v21 = vrot.slane %v820_v18, 4  ;;  %5486 = vmatpush3.bf16.msra.mxu1 %v6340_v29  ;;  %v4841_v37 = vrot.slane %v935_v11, 9  ;;  %v939_v29 = vld [vmem:[%s6093_s9 + $0x20] sm:$0xe] }
  0x5c   : > { %v825_v31 = vrot.slane %v823_v10, 5  ;;  %v812_v26 = vor.u32 %v811_v30, %v808_v8  ;;  %v831_v12 = vrot.slane %v829_v16, 5  ;;  %v964_v41 = vrot.slane %v6210_v57, 5  ;;  %5894 = vmatprep.subr.msk.bf16.mxu1 %vm303_vm0, %v6389_v9  ;;  %v942_v54 = vld [vmem:[%s6093_s9 + $0x38] sm:$0xe] }
  0x5d   : > { %v4842_v63 = vrot.slane %v936_v13, 9  ;;  %v804_v33 = vsel %vm6151_vm4, %v799_v23, %v803_v60  ;;  %v968_v35 = vrot.slane %v6220_v1, 5  ;;  %v4843_v62 = vrot.slane %v937_v19, 9  ;;  %v5954_v56 = vld [vmem:[%s6093_s9 + $0x108] ss:$8 sps:$4 sm:$0xff]  }
  0x5e   : > { %v826_v34 = vor.u32 %v825_v31, %v822_v21  ;;  %v4835_v36 = vcombine.low %v790_v20, %v804_v33  ;;  %v813_v39 = vrot.slane %v812_v26, 4  ;;  %v965_v57 = vsel %vm6245_vm7, %v4841_v37, %v964_v41  ;;  %v5955_v59 = vld [vmem:[%s6093_s9 + $0x118] ss:$8 sps:$4 sm:$0xff]   ;;  %v5110_v3 = vld [vmem:[%s6093_s9 + $0xa8] sm:$0xf] }
  0x5f   : > { %5602 = vmatmul.mubr.msk.bf16.gmra.mrb[4].mxu0 %vm290_vm1, %v5952_v7  ;;  %v972_v43 = vrot.slane %v6229_v24, 5  ;;  %v969_v44 = vsel %vm6245_vm7, %v4842_v63, %v968_v35  ;;  %v4844_v45 = vrot.slane %v938_v28, 9  ;;  %v976_v1 = vrot.slane %v6235_v32, 5  ;;  %v6444_v5 = vld [vmem:[%s6093_s9 + $0xac] sm:$0x1] }
  0x60   : > { %v827_v40 = vrot.slane %v826_v34, 4  ;;  %5607 = vmatprep.mubr.msk.bf16.mxu0 %vm290_vm1, %v5953_v22  ;;  %5481 = vmatprep.mubr.msk.bf16.mxu1 %vm290_vm1, %v4835_v36  ;;  %v818_v48 = vsel %vm6151_vm4, %v813_v39, %v817_v6  ;;  %v4850_v49 = vcombine.low %v965_v57, %v969_v44  ;;  %v4845_v53 = vrot.slane %v939_v29, 9  ;;  %v5112_v7 = vld [vmem:[%s6093_s9 + $0xb0] sm:$0xf]  ;;  %v5116_v28 = vld [vmem:[%s6093_s9 + $0xc0] sm:$0xf] }
  0x61   : > { %v973_v52 = vsel %vm6245_vm7, %v4843_v62, %v972_v43  ;;  %v980_v32 = vrot.slane %v6262_v14, 5  ;;  %v977_v55 = vsel %vm6245_vm7, %v4844_v45, %v976_v1  ;;  %v4846_v11 = vrot.slane %v940_v47, 9  ;;  %v5956_v19 = vld [vmem:[%s6093_s9 + $0x128] ss:$8 sps:$4 sm:$0xff]   ;;  %v6468_v33 = vld [vmem:[%s6093_s9 + $0xc4] sm:$0x1] }
  0x62   : > { %v832_v24 = vsel %vm6151_vm4, %v827_v40, %v831_v12  ;;  %v984_v58 = vrot.slane %v6274_v15, 5  ;;  %v3214_v60 = vsel %vm303_vm0, %v6371_v42, 0  ;;  %v4847_v14 = vrot.slane %v941_v51, 9  ;;  %v6464_v12 = vld [vmem:[%s6093_s9 + $0xbc] sm:$0x1] }
  0x63   : > { %v4836_v17 = vcombine.low %v818_v48, %v832_v24  ;;  %v988_v61 = vrot.slane %v6291_v27, 5  ;;  %v4848_v13 = vrot.slane %v942_v54, 9  ;;  %v4851_v0 = vcombine.low %v973_v52, %v977_v55  ;;  %v6450_v27 = vld [vmem:[%s6093_s9 + $0xb4] sm:$0x1]  ;;  %v5957_v52 = vld [vmem:[%s6093_s9 + $0xa0] ss:$8 sps:$4 sm:$0xff]  }
  0x64   : > { %v981_v2 = vsel %vm6245_vm7, %v4845_v53, %v980_v32  ;;  %v985_v15 = vsel %vm6245_vm7, %v4846_v11, %v984_v58  ;;  %v992_v42 = vrot.slane %v6300_v38, 5  ;;  %v3076_v25 = vshrl.u32 %v5110_v3, 16  ;;  %v5151_v38 = vld [vmem:[%s7061_s1 + $0x24] sm:$0x3]  ;;  %v5118_v55 = vld [vmem:[%s6093_s9 + $0xc8] sm:$0xf] }
  0x65   : > { %5482 = vmatmul.mubr.msk.bf16.gmra.mrb[4].mxu1 %vm290_vm1, %v4836_v17  ;;  %v3079_v8 = vshll.u32 %v5110_v3, 16  ;;  %v3085_v18 = vshll.u32 %v6444_v5, 16  ;;  %v1142_v10 = vsel %vm303_vm0, %v6389_v9, 0  ;;  %v3090_v20 = vshrl.u32 %v5112_v7, 16  ;;  %v5114_v9 = vld [vmem:[%s6093_s9 + $0xb8] sm:$0xf] }
  0x66   : > { %5487 = vmatprep.mubr.msk.bf16.mxu1 %vm290_vm1, %v4850_v49  ;;  %v3093_v30 = vshll.u32 %v5112_v7, 16  ;;  %v3099_v6 = vshll.u32 %v6450_v27, 16  ;;  %v4852_v16 = vcombine.low %v981_v2, %v985_v15  ;;  %v3078_v23 = vrot.slane %v3076_v25, 4  ;;  %v4883_v17 = vld [vmem:[%s7061_s1 + $0xc] sm:$0x3] }
  0x67   : > { %5608 = vmatmul.mubr.msk.bf16.vlgmr.msra.gmra.mrb[0].mxu0 %vm290_vm1, %v5954_v56  ;;  %v3081_v21 = vrot.slane %v3079_v8, 5  ;;  %v3087_v31 = vrot.slane %v3085_v18, 5  ;;  %v3092_v37 = vrot.slane %v3090_v20, 4  ;;  %v3104_v41 = vshrl.u32 %v5114_v9, 16  ;;  %v5122_v8 = vld [vmem:[%s6093_s9 + $0xd8] sm:$0xf] }
  0x68   : > { %5616 = vmatpush3.bf16.msra.mxu0 %v3214_v60  ;;  %5611 = vmatprep.mubr.msk.bf16.mxu0 %vm290_vm1, %v5955_v59  ;;  %v3095_v22 = vrot.slane %v3093_v30, 5  ;;  %v3101_v26 = vrot.slane %v3099_v6, 5  ;;  %v3107_v34 = vshll.u32 %v5114_v9, 16  ;;  %v3113_v35 = vshll.u32 %v6464_v12, 16  ;;  %v6491_v60 = vld [vmem:[%s6093_s9 + $0xcc] sm:$0x1] }
  0x69   : > { %5908 = vmatprep.subr.msk.bf16.mxu0 %vm303_vm0, %v5151_v38  ;;  %v3082_v63 = vor.u32 %v3081_v21, %v3078_v23  ;;  %v3106_v29 = vrot.slane %v3104_v41, 4  ;;  %v3118_v36 = vshrl.u32 %v5116_v28, 16  ;;  %v3121_v39 = vshll.u32 %v5116_v28, 16  ;;  %v6506_v6 = vld [vmem:[%s6093_s9 + $0xdc] sm:$0x1] }
  0x6a   : > { %v3096_v62 = vor.u32 %v3095_v22, %v3092_v37  ;;  %v989_v57 = vsel %vm6245_vm7, %v4847_v14, %v988_v61  ;;  %v3109_v40 = vrot.slane %v3107_v34, 5  ;;  %v3127_v44 = vshll.u32 %v6468_v33, 16  ;;  %v5120_v14 = vld [vmem:[%s6093_s9 + $0xd0] sm:$0xf]  ;;  %v5124_v21 = vld [vmem:[%s6093_s9 + $0xe0] sm:$0xf] }
  0x6b   : > { %v3083_v43 = vrot.slane %v3082_v63, 4  ;;  %v993_v45 = vsel %vm6245_vm7, %v4848_v13, %v992_v42  ;;  %v3120_v47 = vrot.slane %v3118_v36, 4  ;;  %v3123_v48 = vrot.slane %v3121_v39, 5  ;;  %v6495_v13 = vld [vmem:[%s6093_s9 + $0xd4] sm:$0x1] }
  0x6c   : > { %v3097_v1 = vrot.slane %v3096_v62, 4  ;;  %v3110_v51 = vor.u32 %v3109_v40, %v3106_v29  ;;  %v3115_v24 = vrot.slane %v3113_v35, 5  ;;  %v3129_v54 = vrot.slane %v3127_v44, 5  ;;  %v6512_v9 = vld [vmem:[%s6093_s9 + $0xe4] sm:$0x1] }
  0x6d   : > { %5488 = vmatmul.mubr.msk.bf16.vlgmr.msra.gmra.mrb[0].mxu1 %vm290_vm1, %v4851_v0  ;;  %v3088_v49 = vsel %vm6151_vm4, %v3083_v43, %v3087_v31  ;;  %v3124_v32 = vor.u32 %v3123_v48, %v3120_v47  ;;  %v4853_v56 = vcombine.low %v989_v57, %v993_v45  ;;  %v3444_v59 = vsel %vm303_vm0, %v5151_v38, 0  ;;  %v5958_v41 = vld [vmem:[%s6093_s9 + $0xb0] ss:$8 sps:$4 sm:$0xff]   ;;  %v5959_v39 = vld [vmem:[%s6093_s9 + $0xc0] ss:$8 sps:$4 sm:$0xff]  }
  0x6e   : > { %5491 = vmatprep.mubr.msk.bf16.mxu1 %vm290_vm1, %v4852_v16  ;;  %5496 = vmatpush3.bf16.msra.mxu1 %v1142_v10  ;;  %v3102_v53 = vsel %vm6151_vm4, %v3097_v1, %v3101_v26  ;;  %v3111_v58 = vrot.slane %v3110_v51, 4  ;;  %v3132_v0 = vshrl.u32 %v5118_v55, 16  ;;  %v3135_v2 = vshll.u32 %v5118_v55, 16 }
  0x6f   : > { %5612 = vmatmul.mubr.msk.bf16.gmra.mrb[4].mxu0 %vm290_vm1, %v5956_v19  ;;  %v5127_v11 = vcombine.low %v3088_v49, %v3102_v53  ;;  %5895 = vmatprep.subr.msk.bf16.mxu1 %vm303_vm0, %v4883_v17  ;;  %v3125_v61 = vrot.slane %v3124_v32, 4  ;;  %v3141_v15 = vshll.u32 %v6491_v60, 16  ;;  %v3146_v7 = vshrl.u32 %v5120_v14, 16  ;;  %v5137_v53 = vld [vmem:[%s6093_s9 + $0x100] sm:$0xf] }
  0x70   : > { %v3116_v3 = vsel %vm6151_vm4, %v3111_v58, %v3115_v24  ;;  %v3149_v42 = vshll.u32 %v5120_v14, 16  ;;  %v3155_v25 = vshll.u32 %v6495_v13, 16  ;;  %v3134_v10 = vrot.slane %v3132_v0, 4  ;;  %v5135_v24 = vld [vmem:[%s6093_s9 + $0xf8] sm:$0xf] }
  0x71   : > { %5617 = vmatprep.mubr.msk.bf16.mxu0 %vm290_vm1, %v5127_v11  ;;  %v3130_v18 = vsel %vm6151_vm4, %v3125_v61, %v3129_v54  ;;  %v3137_v20 = vrot.slane %v3135_v2, 5  ;;  %v3143_v30 = vrot.slane %v3141_v15, 5  ;;  %v3148_v16 = vrot.slane %v3146_v7, 4  ;;  %v5176_v61 = vld [vmem:[%s7061_s1 + $0x26] sm:$0x3] }
  0x72   : > { %v5128_v38 = vcombine.low %v3116_v3, %v3130_v18  ;;  %v3151_v19 = vrot.slane %v3149_v42, 5  ;;  %v3157_v23 = vrot.slane %v3155_v25, 5  ;;  %v3160_v37 = vshrl.u32 %v5122_v8, 16  ;;  %v5139_v7 = vld [vmem:[%s6093_s9 + $0x108] sm:$0xf] }
  0x73   : > { %v3138_v31 = vor.u32 %v3137_v20, %v3134_v10  ;;  %v3163_v22 = vshll.u32 %v5122_v8, 16  ;;  %v3169_v26 = vshll.u32 %v6506_v6, 16  ;;  %v3174_v28 = vshrl.u32 %v5124_v21, 16  ;;  %v5960_v42 = vld [vmem:[%s6093_s9 + $0xd0] ss:$8 sps:$4 sm:$0xff]  }
  0x74   : > { %v3152_v63 = vor.u32 %v3151_v19, %v3148_v16  ;;  %v3177_v34 = vshll.u32 %v5124_v21, 16  ;;  %v3183_v35 = vshll.u32 %v6512_v9, 16  ;;  %v3162_v29 = vrot.slane %v3160_v37, 4  ;;  %v5140_v20 = vld [vmem:[%s6093_s9 + $0x10c] sm:$0x1] }
  0x75   : > { %5492 = vmatmul.mubr.msk.bf16.gmra.mrb[4].mxu1 %vm290_vm1, %v4853_v56  ;;  %v3139_v62 = vrot.slane %v3138_v31, 4  ;;  %v3165_v36 = vrot.slane %v3163_v22, 5  ;;  %v1263_v57 = vsel %vm303_vm0, %v4883_v17, 0  ;;  %v3176_v40 = vrot.slane %v3174_v28, 4  ;;  %v5138_v17 = vld [vmem:[%s6093_s9 + $0x104] sm:$0x1] }
  0x76   : > { %5497 = vmatprep.mubr.msk.bf16.mxu1 %vm290_vm1, %v5957_v52  ;;  %v3153_v43 = vrot.slane %v3152_v63, 4  ;;  %v3179_v44 = vrot.slane %v3177_v34, 5  ;;  %v3171_v47 = vrot.slane %v3169_v26, 5  ;;  %v3185_v48 = vrot.slane %v3183_v35, 5  ;;  %v5136_v52 = vld [vmem:[%s6093_s9 + $0xfc] sm:$0x1] }
  0x77   : > { %5618 = vmatmul.mubr.msk.bf16.vlgmr.msra.gmra.mrb[0].mxu0 %vm290_vm1, %v5128_v38  ;;  %v3144_v45 = vsel %vm6151_vm4, %v3139_v62, %v3143_v30  ;;  %v3166_v1 = vor.u32 %v3165_v36, %v3162_v29  ;;  %v3306_v55 = vshrl.u32 %v5135_v24, 16  ;;  %v3309_v56 = vshll.u32 %v5135_v24, 16  ;;  %v5961_v38 = vld [vmem:[%s6093_s9 + $0xf0] ss:$8 sps:$4 sm:$0xff]   ;;  %v5142_v21 = vld [vmem:[%s6093_s9 + $0x114] sm:$0x1] }
  0x78   : > { %5626 = vmatpush3.bf16.msra.mxu0 %v3444_v59  ;;  %v3158_v49 = vsel %vm6151_vm4, %v3153_v43, %v3157_v23  ;;  %v3180_v51 = vor.u32 %v3179_v44, %v3176_v40  ;;  %v3315_v58 = vshll.u32 %v5136_v52, 16  ;;  %v3320_v59 = vshrl.u32 %v5137_v53, 16  ;;  %v5141_v23 = vld [vmem:[%s6093_s9 + $0x110] sm:$0xf] }
  0x79   : > { %v5129_v32 = vcombine.low %v3144_v45, %v3158_v49  ;;  %v3167_v54 = vrot.slane %v3166_v1, 4  ;;  %v3323_v14 = vshll.u32 %v5137_v53, 16  ;;  %v3308_v2 = vrot.slane %v3306_v55, 4  ;;  %5909 = vmatprep.subr.msk.bf16.mxu0 %vm303_vm0, %v5176_v61  ;;  %v4908_v49 = vld [vmem:[%s7061_s1 + $0xe] sm:$0x3] }
  0x7a   : > { %v3181_v11 = vrot.slane %v3180_v51, 4  ;;  %v3311_v15 = vrot.slane %v3309_v56, 5  ;;  %v3329_v3 = vshll.u32 %v5138_v17, 16  ;;  %v3317_v8 = vrot.slane %v3315_v58, 5  ;;  %v5143_v53 = vld [vmem:[%s6093_s9 + $0x118] sm:$0xf] }
  0x7b   : > { %v3172_v0 = vsel %vm6151_vm4, %v3167_v54, %v3171_v47  ;;  %5621 = vmatprep.mubr.msk.bf16.mxu0 %vm290_vm1, %v5129_v32  ;;  %v3322_v18 = vrot.slane %v3320_v59, 4  ;;  %v3325_v10 = vrot.slane %v3323_v14, 5  ;;  %v3334_v31 = vshrl.u32 %v5139_v7, 16  ;;  %v5144_v32 = vld [vmem:[%s6093_s9 + $0x11c] sm:$0x1] }
  0x7c   : > { %v3186_v25 = vsel %vm6151_vm4, %v3181_v11, %v3185_v48  ;;  %v3312_v16 = vor.u32 %v3311_v15, %v3308_v2  ;;  %v3331_v19 = vrot.slane %v3329_v3, 5  ;;  %v3337_v22 = vshll.u32 %v5139_v7, 16  ;;  %v5962_v17 = vld [vmem:[%s6093_s9 + $0x100] ss:$8 sps:$4 sm:$0xff]   ;;  %v5146_v11 = vld [vmem:[%s6093_s9 + $0x124] sm:$0x1] }
  0x7d   : > { %5498 = vmatmul.mubr.msk.bf16.vlgmr.msra.gmra.mrb[0].mxu1 %vm290_vm1, %v5958_v41  ;;  %v5130_v30 = vcombine.low %v3172_v0, %v3186_v25  ;;  %v3326_v37 = vor.u32 %v3325_v10, %v3322_v18  ;;  %v3343_v26 = vshll.u32 %v5140_v20, 16  ;;  %v3348_v41 = vshrl.u32 %v5141_v23, 16  ;;  %v5145_v56 = vld [vmem:[%s6093_s9 + $0x120] sm:$0xf]  ;;  %v5963_v14 = vld [vmem:[%s6093_s9 + $0x110] ss:$8 sps:$4 sm:$0xff]  }
  0x7e   : > { %5501 = vmatprep.mubr.msk.bf16.mxu1 %vm290_vm1, %v5959_v39  ;;  %5506 = vmatpush3.bf16.msra.mxu1 %v1263_v57  ;;  %v3313_v63 = vrot.slane %v3312_v16, 4  ;;  %v3336_v28 = vrot.slane %v3334_v31, 4  ;;  %v3351_v34 = vshll.u32 %v5141_v23, 16  ;;  %v3357_v35 = vshll.u32 %v5142_v21, 16  ;;  %v5147_v15 = vld [vmem:[%s6093_s9 + $0x128] sm:$0xf] }
  0x7f   : > { %5622 = vmatmul.mubr.msk.bf16.gmra.mrb[4].mxu0 %vm290_vm1, %v5130_v30  ;;  %v3327_v62 = vrot.slane %v3326_v37, 4  ;;  %v3339_v29 = vrot.slane %v3337_v22, 5  ;;  %v3350_v36 = vrot.slane %v3348_v41, 4  ;;  %v3545_v39 = vrot.slane %v6444_v5, 5  ;;  %5896 = vmatprep.subr.msk.bf16.mxu1 %vm303_vm0, %v4908_v49  ;;  %v5150_v21 = vld [vmem:[%s6093_s9 + $0x134] sm:$0x1] }
  0x80   : > { %v3318_v57 = vsel %vm6151_vm4, %v3313_v63, %v3317_v8  ;;  %v3345_v43 = vrot.slane %v3343_v26, 5  ;;  %v3353_v40 = vrot.slane %v3351_v34, 5  ;;  %v3549_v44 = vrot.slane %v6450_v27, 5  ;;  %v5148_v8 = vld [vmem:[%s6093_s9 + $0x12c] sm:$0x1] }
  0x81   : > { %v3332_v45 = vsel %vm6151_vm4, %v3327_v62, %v3331_v19  ;;  %v3340_v1 = vor.u32 %v3339_v29, %v3336_v28  ;;  %v3359_v47 = vrot.slane %v3357_v35, 5  ;;  %v3602_v48 = vsel %vm303_vm0, %v5176_v61, 0  ;;  %v4892_v63 = vld [vmem:[%s6093_s9 + $0xa0] sm:$0xf]  ;;  %v6580_v29 = vld [vmem:[%s6093_s9 + $0xa4] sm:$0x1] }
  0x82   : > { %v5152_v51 = vcombine.low %v3318_v57, %v3332_v45  ;;  %v3354_v24 = vor.u32 %v3353_v40, %v3350_v36  ;;  %v1493_v52 = vsel %vm303_vm0, %v4908_v49, 0  ;;  %v3553_v54 = vrot.slane %v6464_v12, 5  ;;  %v4894_v45 = vld [vmem:[%s6093_s9 + $0xa8] sm:$0xf]  ;;  %v4933_v27 = vld [vmem:[%s7061_s1 + $0x10] sm:$0x3] }
  0x83   : > { %v3341_v55 = vrot.slane %v3340_v1, 4  ;;  %v3362_v58 = vshrl.u32 %v5143_v53, 16  ;;  %v3365_v61 = vshll.u32 %v5143_v53, 16  ;;  %v3371_v0 = vshll.u32 %v5144_v32, 16 }
  0x84   : > { %5627 = vmatprep.mubr.msk.bf16.mxu0 %vm290_vm1, %v5152_v51  ;;  %v3355_v59 = vrot.slane %v3354_v24, 4  ;;  %v3376_v2 = vshrl.u32 %v5145_v56, 16  ;;  %v3385_v25 = vshll.u32 %v5146_v11, 16  ;;  %v3390_v31 = vshrl.u32 %v5147_v15, 16 }
  0x85   : > { %5502 = vmatmul.mubr.msk.bf16.gmra.mrb[4].mxu1 %vm290_vm1, %v5960_v42  ;;  %v3346_v3 = vsel %vm6151_vm4, %v3341_v55, %v3345_v43  ;;  %v3364_v7 = vrot.slane %v3362_v58, 4  ;;  %v3379_v42 = vshll.u32 %v5145_v56, 16  ;;  %v3367_v10 = vrot.slane %v3365_v61, 5  ;;  %v5964_v55 = vld [vmem:[%s6093_s9 + $0x120] ss:$8 sps:$4 sm:$0xff]  }
  0x86   : > { %5507 = vmatprep.mubr.msk.bf16.mxu1 %vm290_vm1, %v5961_v38  ;;  %v3360_v18 = vsel %vm6151_vm4, %v3355_v59, %v3359_v47  ;;  %v3373_v20 = vrot.slane %v3371_v0, 5  ;;  %v3378_v30 = vrot.slane %v3376_v2, 4  ;;  %v5149_v38 = vld [vmem:[%s6093_s9 + $0x130] sm:$0xf]  ;;  %v3387_v23 = vrot.slane %v3385_v25, 5 }
  0x87   : > { %v5153_v16 = vcombine.low %v3346_v3, %v3360_v18  ;;  %v3381_v19 = vrot.slane %v3379_v42, 5  ;;  %v3368_v37 = vor.u32 %v3367_v10, %v3364_v7  ;;  %v3393_v22 = vshll.u32 %v5147_v15, 16  ;;  %v4896_v59 = vld [vmem:[%s6093_s9 + $0xb0] sm:$0xf]  ;;  %v6595_v15 = vld [vmem:[%s6093_s9 + $0xb4] sm:$0x1] }
  0x88   : > { %v3399_v26 = vshll.u32 %v5148_v8, 16  ;;  %v3404_v41 = vshrl.u32 %v5149_v38, 16  ;;  %v3392_v34 = vrot.slane %v3390_v31, 4  ;;  %v3407_v35 = vshll.u32 %v5149_v38, 16  ;;  %v4898_v8 = vld [vmem:[%s6093_s9 + $0xb8] sm:$0xf] }
  0x89   : > { %5628 = vmatmul.mubr.msk.bf16.vlgmr.msra.gmra.mrb[0].mxu0 %vm290_vm1, %v5153_v16  ;;  %v3382_v28 = vor.u32 %v3381_v19, %v3378_v30  ;;  %v3413_v62 = vshll.u32 %v5150_v21, 16  ;;  %v3369_v36 = vrot.slane %v3368_v37, 4  ;;  %v3395_v57 = vrot.slane %v3393_v22, 5  ;;  %v5193_v16 = vld [vmem:[%s7061_s1 + $0x28] sm:$0x3] }
  0x8a   : > { %5636 = vmatpush3.bf16.msra.mxu0 %v3602_v48  ;;  %v3401_v43 = vrot.slane %v3399_v26, 5  ;;  %v3406_v40 = vrot.slane %v3404_v41, 4  ;;  %v3409_v47 = vrot.slane %v3407_v35, 5  ;;  %v1355_v51 = vshrl.u32 %v4892_v63, 16  ;;  %v6587_v48 = vld [vmem:[%s6093_s9 + $0xac] sm:$0x1] }
  0x8b   : > { %v3383_v1 = vrot.slane %v3382_v28, 4  ;;  %v3415_v49 = vrot.slane %v3413_v62, 5  ;;  %v3374_v24 = vsel %vm6151_vm4, %v3369_v36, %v3373_v20  ;;  %v3396_v53 = vor.u32 %v3395_v57, %v3392_v34  ;;  %v6603_v20 = vld [vmem:[%s6093_s9 + $0xbc] sm:$0x1]  ;;  %v5160_v37 = vld [vmem:[%s6093_s9 + $0xa8] sm:$0xe]  ;;  %5910 = vmatprep.subr.msk.bf16.mxu0 %vm303_vm0, %v5193_v16 }
  0x8c   : > { %v1358_v32 = vshll.u32 %v4892_v63, 16  ;;  %v1357_v11 = vrot.slane %v1355_v51, 4  ;;  %v1369_v58 = vshrl.u32 %v4894_v45, 16  ;;  %v1372_v42 = vshll.u32 %v4894_v45, 16  ;;  %v5161_v28 = vld [vmem:[%s6093_s9 + $0xb0] sm:$0xe] }
  0x8d   : > { %5508 = vmatmul.mubr.msk.bf16.vlgmr.msra.gmra.mrb[0].mxu1 %vm290_vm1, %v5962_v17  ;;  %v1364_v17 = vshll.u32 %v6580_v29, 16  ;;  %v3388_v56 = vsel %vm6151_vm4, %v3383_v1, %v3387_v23  ;;  %v3397_v61 = vrot.slane %v3396_v53, 4  ;;  %v1378_v25 = vshll.u32 %v6587_v48, 16  ;;  %v5162_v57 = vld [vmem:[%s6093_s9 + $0xb8] sm:$0xe] }
  0x8e   : > { %5511 = vmatprep.mubr.msk.bf16.mxu1 %vm290_vm1, %v5963_v14  ;;  %5516 = vmatpush3.bf16.msra.mxu1 %v1493_v52  ;;  %v3410_v52 = vor.u32 %v3409_v47, %v3406_v40  ;;  %v5154_v14 = vcombine.low %v3374_v24, %v3388_v56  ;;  %v1360_v0 = vrot.slane %v1358_v32, 5  ;;  %v1371_v7 = vrot.slane %v1369_v58, 4  ;;  %v5163_v47 = vld [vmem:[%s6093_s9 + $0xc0] sm:$0xe] }
  0x8f   : > { %v1366_v2 = vrot.slane %v1364_v17, 5  ;;  %v3402_v18 = vsel %vm6151_vm4, %v3397_v61, %v3401_v43  ;;  %v1383_v30 = vshrl.u32 %v4896_v59, 16  ;;  %v1386_v38 = vshll.u32 %v4896_v59, 16  ;;  %v6633_v61 = vld [vmem:[%s6093_s9 + $0xc4] sm:$0x1]  ;;  %5897 = vmatprep.subr.msk.bf16.mxu1 %vm303_vm0, %v4933_v27 }
  0x90   : > { %v3411_v3 = vrot.slane %v3410_v52, 4  ;;  %5631 = vmatprep.mubr.msk.bf16.mxu0 %vm290_vm1, %v5154_v14  ;;  %v1361_v10 = vor.u32 %v1360_v0, %v1357_v11  ;;  %v1374_v23 = vrot.slane %v1372_v42, 5  ;;  %v1380_v21 = vrot.slane %v1378_v25, 5  ;;  %v4900_v52 = vld [vmem:[%s6093_s9 + $0xc0] sm:$0xf] }
  0x91   : > { %v1392_v31 = vshll.u32 %v6595_v15, 16  ;;  %v1385_v41 = vrot.slane %v1383_v30, 4  ;;  %v1388_v63 = vrot.slane %v1386_v38, 5  ;;  %v1397_v62 = vshrl.u32 %v4898_v8, 16  ;;  %v4902_v0 = vld [vmem:[%s6093_s9 + $0xc8] sm:$0xf] }
  0x92   : > { %v3416_v19 = vsel %vm6151_vm4, %v3411_v3, %v3415_v49  ;;  %v1362_v26 = vrot.slane %v1361_v10, 4  ;;  %v1375_v34 = vor.u32 %v1374_v23, %v1371_v7  ;;  %v1400_v36 = vshll.u32 %v4898_v8, 16  ;;  %v6643_v7 = vld [vmem:[%s6093_s9 + $0xcc] sm:$0x1]  ;;  %v4904_v30 = vld [vmem:[%s6093_s9 + $0xd0] sm:$0xf] }
  0x93   : > { %v5155_v22 = vcombine.low %v3402_v18, %v3416_v19  ;;  %v1394_v35 = vrot.slane %v1392_v31, 5  ;;  %v1389_v40 = vor.u32 %v1388_v63, %v1385_v41  ;;  %v1406_v45 = vshll.u32 %v6603_v20, 16  ;;  %v6661_v23 = vld [vmem:[%s6093_s9 + $0xd4] sm:$0x1]  ;;  %v6665_v41 = vld [vmem:[%s6093_s9 + $0xdc] sm:$0x1] }
  0x94   : > { %v1367_v43 = vsel %vm6151_vm4, %v1362_v26, %v1366_v2  ;;  %v5168_v1 = vrot.slane %v5160_v37, 9  ;;  %v1376_v49 = vrot.slane %v1375_v34, 4  ;;  %v1399_v51 = vrot.slane %v1397_v62, 4  ;;  %v5164_v62 = vld [vmem:[%s6093_s9 + $0xc8] sm:$0xe] }
  0x95   : > { %5512 = vmatmul.mubr.msk.bf16.gmra.mrb[4].mxu1 %vm290_vm1, %v5964_v55  ;;  %5632 = vmatmul.mubr.msk.bf16.gmra.mrb[4].mxu0 %vm290_vm1, %v5155_v22  ;;  %v1402_v24 = vrot.slane %v1400_v36, 5  ;;  %v5169_v53 = vrot.slane %v5161_v28, 9  ;;  %v1390_v32 = vrot.slane %v1389_v40, 4  ;;  %v1408_v17 = vrot.slane %v1406_v45, 5  ;;  %v5165_v45 = vld [vmem:[%s6093_s9 + $0xd0] sm:$0xe] }
  0x96   : > { %v3546_v55 = vsel %vm6245_vm7, %v5168_v1, %v3545_v39  ;;  %v5170_v56 = vrot.slane %v5162_v57, 9  ;;  %v1381_v11 = vsel %vm6151_vm4, %v1376_v49, %v1380_v21  ;;  %v5171_v14 = vrot.slane %v5163_v47, 9  ;;  %v4906_v21 = vld [vmem:[%s6093_s9 + $0xd8] sm:$0xf] }
  0x97   : > { %v1403_v58 = vor.u32 %v1402_v24, %v1399_v51  ;;  %v3550_v59 = vsel %vm6245_vm7, %v5169_v53, %v3549_v44  ;;  %v4909_v2 = vcombine.low %v1367_v43, %v1381_v11  ;;  %v1395_v5 = vsel %vm6151_vm4, %v1390_v32, %v1394_v35  ;;  %v5166_v24 = vld [vmem:[%s6093_s9 + $0xd8] sm:$0xe] }
  0x98   : > { %v5177_v39 = vcombine.low %v3546_v55, %v3550_v59  ;;  %v3554_v3 = vsel %vm6245_vm7, %v5170_v56, %v3553_v54  ;;  %v3557_v42 = vrot.slane %v6468_v33, 5  ;;  %v3724_v25 = vsel %vm303_vm0, %v5193_v16, 0  ;;  %v5167_v56 = vld [vmem:[%s6093_s9 + $0xe0] sm:$0xe] }
  0x99   : > { %v1404_v44 = vrot.slane %v1403_v58, 4  ;;  %v1411_v8 = vshrl.u32 %v4900_v52, 16  ;;  %5517 = vmatprep.mubr.msk.bf16.mxu1 %vm290_vm1, %v4909_v2  ;;  %v1414_v12 = vshll.u32 %v4900_v52, 16  ;;  %v1420_v54 = vshll.u32 %v6633_v61, 16 }
  0x9a   : > { %5637 = vmatprep.mubr.msk.bf16.mxu0 %vm290_vm1, %v5177_v39  ;;  %v1425_v18 = vshrl.u32 %v4902_v0, 16  ;;  %v1428_v10 = vshll.u32 %v4902_v0, 16  ;;  %v3558_v38 = vsel %vm6245_vm7, %v5171_v14, %v3557_v42  ;;  %v1434_v19 = vshll.u32 %v6643_v7, 16  ;;  %v4917_v39 = vld [vmem:[%s6093_s9 + $0xf0] sm:$0xf] }
  0x9b   : > { %v1409_v33 = vsel %vm6151_vm4, %v1404_v44, %v1408_v17  ;;  %v1413_v16 = vrot.slane %v1411_v8, 4  ;;  %v5178_v37 = vcombine.low %v3554_v3, %v3558_v38  ;;  %v1416_v22 = vrot.slane %v1414_v12, 5  ;;  %v4919_v38 = vld [vmem:[%s6093_s9 + $0xf8] sm:$0xf] }
  0x9c   : > { %v4910_v31 = vcombine.low %v1395_v5, %v1409_v33  ;;  %v1422_v26 = vrot.slane %v1420_v54, 5  ;;  %v1427_v63 = vrot.slane %v1425_v18, 4  ;;  %v1430_v28 = vrot.slane %v1428_v10, 5  ;;  %v4918_v18 = vld [vmem:[%s6093_s9 + $0xf4] sm:$0x1] }
  0x9d   : > { %v1436_v34 = vrot.slane %v1434_v19, 5  ;;  %v1439_v35 = vshrl.u32 %v4904_v30, 16  ;;  %5638 = vmatmul.mubr.msk.bf16.vlgmr.msra.gmra.mrb[0].mxu0 %vm290_vm1, %v5178_v37  ;;  %v1417_v36 = vor.u32 %v1416_v22, %v1413_v16  ;;  %v1442_v57 = vshll.u32 %v4904_v30, 16 }
  0x9e   : > { %5518 = vmatmul.mubr.msk.bf16.vlgmr.msra.gmra.mrb[0].mxu1 %vm290_vm1, %v4910_v31  ;;  %v1448_v43 = vshll.u32 %v6661_v23, 16  ;;  %v1453_v40 = vshrl.u32 %v4906_v21, 16  ;;  %5646 = vmatpush3.bf16.msra.mxu0 %v3724_v25  ;;  %v1431_v1 = vor.u32 %v1430_v28, %v1427_v63  ;;  %v1456_v49 = vshll.u32 %v4906_v21, 16  ;;  %v4920_v31 = vld [vmem:[%s6093_s9 + $0xfc] sm:$0x1] }
  0x9f   : > { %v1441_v47 = vrot.slane %v1439_v35, 4  ;;  %v1462_v51 = vshll.u32 %v6665_v41, 16  ;;  %v1418_v53 = vrot.slane %v1417_v36, 4  ;;  %v1444_v32 = vrot.slane %v1442_v57, 5  ;;  %v4921_v28 = vld [vmem:[%s6093_s9 + $0x100] sm:$0xf] }
  0xa0   : > { %v1450_v17 = vrot.slane %v1448_v43, 5  ;;  %v1455_v55 = vrot.slane %v1453_v40, 4  ;;  %v1432_v52 = vrot.slane %v1431_v1, 4  ;;  %v1458_v11 = vrot.slane %v1456_v49, 5  ;;  %v4923_v57 = vld [vmem:[%s6093_s9 + $0x108] sm:$0xf] }
  0xa1   : > { %v1464_v58 = vrot.slane %v1462_v51, 5  ;;  %v1723_v59 = vsel %vm303_vm0, %v4933_v27, 0  ;;  %v1423_v14 = vsel %vm6151_vm4, %v1418_v53, %v1422_v26  ;;  %v1445_v0 = vor.u32 %v1444_v32, %v1441_v47  ;;  %v6686_v27 = vld [vmem:[%s7061_s1 + $0x2a] sm:$0x3]  ;;  %v5965_v43 = vld [vmem:[%s6093_s9 + $0x10] ss:$8 sps:$4 sm:$0xff]  }
  0xa2   : > { %5526 = vmatpush3.bf16.msra.mxu1 %v1723_v59  ;;  %v5172_v2 = vrot.slane %v5164_v62, 9  ;;  %v3561_v5 = vrot.slane %v6491_v60, 5  ;;  %v1437_v3 = vsel %vm6151_vm4, %v1432_v52, %v1436_v34  ;;  %v1459_v44 = vor.u32 %v1458_v11, %v1455_v55  ;;  %5911 = vmatprep.subr.msk.bf16.mxu0 %vm303_vm0, %v6686_v27  ;;  %v4922_v34 = vld [vmem:[%s6093_s9 + $0x104] sm:$0x1]  ;;  %v4924_v49 = vld [vmem:[%s6093_s9 + $0x10c] sm:$0x1] }
  0xa3   : > { %v5173_v42 = vrot.slane %v5165_v45, 9  ;;  %v3565_v25 = vrot.slane %v6495_v13, 5  ;;  %v4911_v8 = vcombine.low %v1423_v14, %v1437_v3  ;;  %v1446_v12 = vrot.slane %v1445_v0, 4  ;;  %v6719_v55 = vld [vmem:[%s7061_s1 + $0x12] sm:$0x3] }
  0xa4   : > { %v3562_v60 = vsel %vm6245_vm7, %v5172_v2, %v3561_v5  ;;  %v5174_v54 = vrot.slane %v5166_v24, 9  ;;  %v1460_v10 = vrot.slane %v1459_v44, 4  ;;  %v3569_v30 = vrot.slane %v6506_v6, 5  ;;  %v4926_v59 = vld [vmem:[%s6093_s9 + $0x114] sm:$0x1]  ;;  %5898 = vmatprep.subr.msk.bf16.mxu1 %vm303_vm0, %v6719_v55 }
  0xa5   : > { %v3566_v13 = vsel %vm6245_vm7, %v5173_v42, %v3565_v25  ;;  %v5175_v33 = vrot.slane %v5167_v56, 9  ;;  %5521 = vmatprep.mubr.msk.bf16.mxu1 %vm290_vm1, %v4911_v8  ;;  %v1451_v16 = vsel %vm6151_vm4, %v1446_v12, %v1450_v17  ;;  %v3573_v21 = vrot.slane %v6512_v9, 5  ;;  %v4925_v17 = vld [vmem:[%s6093_s9 + $0x110] sm:$0xf]  ;;  %v5966_v25 = vld [vmem:[%s6093_s9 + $0x20] ss:$8 sps:$4 sm:$0xff]  }
  0xa6   : > { %v5179_v19 = vcombine.low %v3562_v60, %v3566_v13  ;;  %v1585_v37 = vshrl.u32 %v4917_v39, 16  ;;  %v1465_v22 = vsel %vm6151_vm4, %v1460_v10, %v1464_v58  ;;  %v3570_v6 = vsel %vm6245_vm7, %v5174_v54, %v3569_v30  ;;  %v4927_v8 = vld [vmem:[%s6093_s9 + $0x118] sm:$0xf]  ;;  %v4928_v10 = vld [vmem:[%s6093_s9 + $0x11c] sm:$0x1] }
  0xa7   : > { %v1588_v26 = vshll.u32 %v4917_v39, 16  ;;  %v1594_v63 = vshll.u32 %v4918_v18, 16  ;;  %v4912_v35 = vcombine.low %v1451_v16, %v1465_v22  ;;  %v3574_v9 = vsel %vm6245_vm7, %v5175_v33, %v3573_v21  ;;  %v4929_v16 = vld [vmem:[%s6093_s9 + $0x120] sm:$0xf]  ;;  %v4930_v22 = vld [vmem:[%s6093_s9 + $0x124] sm:$0x1] }
  0xa8   : > { %5641 = vmatprep.mubr.msk.bf16.mxu0 %vm290_vm1, %v5179_v19  ;;  %v1587_v62 = vrot.slane %v1585_v37, 4  ;;  %v1599_v36 = vshrl.u32 %v4919_v38, 16  ;;  %v5180_v40 = vcombine.low %v3570_v6, %v3574_v9  ;;  %v1602_v47 = vshll.u32 %v4919_v38, 16 }
  0xa9   : > { %v1590_v45 = vrot.slane %v1588_v26, 5  ;;  %v1596_v1 = vrot.slane %v1594_v63, 5  ;;  %5522 = vmatmul.mubr.msk.bf16.gmra.mrb[4].mxu1 %vm290_vm1, %v4912_v35  ;;  %v1608_v24 = vshll.u32 %v4920_v31, 16  ;;  %v1613_v53 = vshrl.u32 %v4921_v28, 16 }
  0xaa   : > { %v1601_v51 = vrot.slane %v1599_v36, 4  ;;  %v1616_v32 = vshll.u32 %v4921_v28, 16  ;;  %5642 = vmatmul.mubr.msk.bf16.gmra.mrb[4].mxu0 %vm290_vm1, %v5180_v40  ;;  %v1604_v52 = vrot.slane %v1602_v47, 5  ;;  %v1622_v11 = vshll.u32 %v4922_v34, 16  ;;  %v5967_v28 = vld [vmem:[%s6093_s9 + $0x30] ss:$8 sps:$4 sm:$0xff]  }
  0xab   : > { %v1591_v56 = vor.u32 %v1590_v45, %v1587_v62  ;;  %v1627_v58 = vshrl.u32 %v4923_v57, 16  ;;  %v1610_v14 = vrot.slane %v1608_v24, 5  ;;  %v1615_v0 = vrot.slane %v1613_v53, 4  ;;  %5647 = vmatprep.mubr.msk.bf16.mxu0 %vm290_vm1, %v5965_v43  ;;  %v4931_v36 = vld [vmem:[%s6093_s9 + $0x128] sm:$0xf] }
  0xac   : > { %v1618_v2 = vrot.slane %v1616_v32, 5  ;;  %v1630_v5 = vshll.u32 %v4923_v57, 16  ;;  %v1605_v3 = vor.u32 %v1604_v52, %v1601_v51  ;;  %v1624_v44 = vrot.slane %v1622_v11, 5  ;;  %v4932_v57 = vld [vmem:[%s6093_s9 + $0x12c] sm:$0x1] }
  0xad   : > { %v1592_v39 = vrot.slane %v1591_v56, 4  ;;  %v1629_v42 = vrot.slane %v1627_v58, 4  ;;  %v1636_v54 = vshll.u32 %v4924_v49, 16  ;;  %v3845_v18 = vsel %vm303_vm0, %v6686_v27, 0  ;;  %v4942_v47 = vld [vmem:[%s6093_s9 + $0xa0] sm:$0xe] }
  0xae   : > { %v1619_v12 = vor.u32 %v1618_v2, %v1615_v0  ;;  %v1632_v60 = vrot.slane %v1630_v5, 5  ;;  %v1606_v30 = vrot.slane %v1605_v3, 4  ;;  %v1641_v33 = vshrl.u32 %v4925_v17, 16  ;;  %v5968_v11 = vld [vmem:[%s6093_s9 + $0x40] ss:$8 sps:$4 sm:$0xff]  }
  0xaf   : > { %v1597_v13 = vsel %vm6151_vm4, %v1592_v39, %v1596_v1  ;;  %v1644_v38 = vshll.u32 %v4925_v17, 16  ;;  %v1638_v31 = vrot.slane %v1636_v54, 5  ;;  %v1650_v37 = vshll.u32 %v4926_v59, 16  ;;  %v4943_v58 = vld [vmem:[%s6093_s9 + $0xa8] sm:$0xe] }
  0xb0   : > { %v1620_v19 = vrot.slane %v1619_v12, 4  ;;  %v1633_v21 = vor.u32 %v1632_v60, %v1629_v42  ;;  %v1611_v6 = vsel %vm6151_vm4, %v1606_v30, %v1610_v14  ;;  %v1643_v27 = vrot.slane %v1641_v33, 4  ;;  %v4944_v5 = vld [vmem:[%s6093_s9 + $0xb0] sm:$0xe]  ;;  %v5969_v39 = vld [vmem:[%s6093_s9 + $0x60] ss:$8 sps:$4 sm:$0xff]  }
  0xb1   : > { %v1646_v26 = vrot.slane %v1644_v38, 5  ;;  %v1655_v63 = vshrl.u32 %v4927_v8, 16  ;;  %v4934_v34 = vcombine.low %v1597_v13, %v1611_v6  ;;  %v1652_v62 = vrot.slane %v1650_v37, 5 }
  0xb2   : > { %v1625_v35 = vsel %vm6151_vm4, %v1620_v19, %v1624_v44  ;;  %v1634_v9 = vrot.slane %v1633_v21, 4  ;;  %5648 = vmatmul.mubr.msk.bf16.vlgmr.msra.gmra.mrb[0].mxu0 %vm290_vm1, %v5966_v25  ;;  %v1658_v45 = vshll.u32 %v4927_v8, 16  ;;  %v1664_v1 = vshll.u32 %v4928_v10, 16  ;;  %v5235_v25 = vld [vmem:[%s7061_s1 + $0x2c] sm:$0x3] }
  0xb3   : > { %v1647_v43 = vor.u32 %v1646_v26, %v1643_v27  ;;  %v1657_v40 = vrot.slane %v1655_v63, 4  ;;  %5527 = vmatprep.mubr.msk.bf16.mxu1 %vm290_vm1, %v4934_v34  ;;  %5656 = vmatpush3.bf16.msra.mxu0 %v3845_v18  ;;  %v1669_v51 = vshrl.u32 %v4929_v16, 16  ;;  %v1672_v24 = vshll.u32 %v4929_v16, 16  ;;  %v6775_v26 = vld [vmem:[%s6093_s9 + $0xd0] sm:$0xe] }
  0xb4   : > { %v1639_v49 = vsel %vm6151_vm4, %v1634_v9, %v1638_v31  ;;  %v1678_v53 = vshll.u32 %v4930_v22, 16  ;;  %v1660_v56 = vrot.slane %v1658_v45, 5  ;;  %v1666_v52 = vrot.slane %v1664_v1, 5  ;;  %5651 = vmatprep.mubr.msk.bf16.mxu0 %vm290_vm1, %v5967_v28  ;;  %5912 = vmatprep.subr.msk.bf16.mxu0 %vm303_vm0, %v5235_v25  ;;  %v4945_v31 = vld [vmem:[%s6093_s9 + $0xb8] sm:$0xe] }
  0xb5   : > { %v4935_v32 = vcombine.low %v1625_v35, %v1639_v49  ;;  %v1648_v17 = vrot.slane %v1647_v43, 4  ;;  %v1671_v59 = vrot.slane %v1669_v51, 4  ;;  %v1674_v14 = vrot.slane %v1672_v24, 5  ;;  %v4946_v22 = vld [vmem:[%s6093_s9 + $0xc0] sm:$0xe] }
  0xb6   : > { %v1680_v0 = vrot.slane %v1678_v53, 5  ;;  %v1683_v2 = vshrl.u32 %v4931_v36, 16  ;;  %v1661_v3 = vor.u32 %v1660_v56, %v1657_v40  ;;  %v1686_v44 = vshll.u32 %v4931_v36, 16  ;;  %v4975_v63 = vld [vmem:[%s7061_s1 + $0x14] sm:$0x3] }
  0xb7   : > { %5528 = vmatmul.mubr.msk.bf16.vlgmr.msra.gmra.mrb[0].mxu1 %vm290_vm1, %v4935_v32  ;;  %v1692_v42 = vshll.u32 %v4932_v57, 16  ;;  %v1675_v8 = vor.u32 %v1674_v14, %v1671_v59  ;;  %v1881_v60 = vsel %vm303_vm0, %v6719_v55, 0  ;;  %v4950_v54 = vrot.slane %v4942_v47, 9  ;;  %v5970_v9 = vld [vmem:[%s6093_s9 + $0x70] ss:$8 sps:$4 sm:$0xff]  }
  0xb8   : > { %v1685_v12 = vrot.slane %v1683_v2, 4  ;;  %v1653_v18 = vsel %vm6151_vm4, %v1648_v17, %v1652_v62  ;;  %v1662_v10 = vrot.slane %v1661_v3, 4  ;;  %v1688_v13 = vrot.slane %v1686_v44, 5  ;;  %5536 = vmatpush3.bf16.msra.mxu1 %v1881_v60  ;;  %v6789_v40 = vld [vmem:[%s6093_s9 + $0xd8] sm:$0xe] }
  0xb9   : > { %v1824_v30 = vrot.slane %v6580_v29, 5  ;;  %v1676_v33 = vrot.slane %v1675_v8, 4  ;;  %v4951_v38 = vrot.slane %v4943_v58, 9  ;;  %v1828_v16 = vrot.slane %v6587_v48, 5  ;;  %v4947_v48 = vld [vmem:[%s6093_s9 + $0xc8] sm:$0xe]  ;;  %5899 = vmatprep.subr.msk.bf16.mxu1 %vm303_vm0, %v4975_v63 }
  0xba   : > { %v1667_v55 = vsel %vm6151_vm4, %v1662_v10, %v1666_v52  ;;  %v1689_v19 = vor.u32 %v1688_v13, %v1685_v12  ;;  %v1694_v21 = vrot.slane %v1692_v42, 5  ;;  %5652 = vmatmul.mubr.msk.bf16.gmra.mrb[4].mxu0 %vm290_vm1, %v5968_v11  ;;  %v4952_v37 = vrot.slane %v4944_v5, 9  ;;  %v5971_v51 = vld [vmem:[%s6093_s9 + $0x80] ss:$8 sps:$4 sm:$0xff]   ;;  %v5219_v58 = vld [vmem:[%s6093_s9 + $0x10] sm:$0xf] }
  0xbb   : > { %v4936_v6 = vcombine.low %v1653_v18, %v1667_v55  ;;  %v1825_v29 = vsel %vm6245_vm7, %v4950_v54, %v1824_v30  ;;  %v1829_v27 = vsel %vm6245_vm7, %v4951_v38, %v1828_v16  ;;  %5657 = vmatprep.mubr.msk.bf16.mxu0 %vm290_vm1, %v5969_v39  ;;  %v1681_v28 = vsel %vm6151_vm4, %v1676_v33, %v1680_v0  ;;  %v6814_v59 = vld [vmem:[%s6093_s9 + $0x14] sm:$0x1]  ;;  %v6819_v14 = vld [vmem:[%s6093_s9 + $0x1c] sm:$0x1]  ;;  %v5260_v44 = vld [vmem:[%s7061_s1 + $0x2e] sm:$0x3] }
  0xbc   : > { %v1690_v34 = vrot.slane %v1689_v19, 4  ;;  %v1832_v35 = vrot.slane %v6595_v15, 5  ;;  %v4953_v62 = vrot.slane %v4945_v31, 9  ;;  %v1836_v36 = vrot.slane %v6603_v20, 5  ;;  %v5972_v8 = vld [vmem:[%s6093_s9 + $0x90] ss:$8 sps:$4 sm:$0xff]  }
  0xbd   : > { %5531 = vmatprep.mubr.msk.bf16.mxu1 %vm290_vm1, %v4936_v6  ;;  %v4954_v57 = vrot.slane %v4946_v22, 9  ;;  %v1840_v43 = vrot.slane %v6633_v61, 5  ;;  %v4959_v1 = vcombine.low %v1825_v29, %v1829_v27  ;;  %v4955_v47 = vrot.slane %v4947_v48, 9  ;;  %v5223_v54 = vld [vmem:[%s6093_s9 + $0x20] sm:$0xf] }
  0xbe   : > { %v1695_v45 = vsel %vm6151_vm4, %v1690_v34, %v1694_v21  ;;  %v1844_v15 = vrot.slane %v6643_v7, 5  ;;  %v4075_v24 = vsel %vm303_vm0, %v5235_v25, 0  ;;  %v4956_v20 = vrot.slane %v6775_v26, 9  ;;  %v6830_v18 = vld [vmem:[%s6093_s9 + $0x24] sm:$0x1] }
  0xbf   : > { %v4937_v49 = vcombine.low %v1681_v28, %v1695_v45  ;;  %v1833_v61 = vsel %vm6245_vm7, %v4952_v37, %v1832_v35  ;;  %v1837_v53 = vsel %vm6245_vm7, %v4953_v62, %v1836_v36  ;;  %v1848_v7 = vrot.slane %v6661_v23, 5  ;;  %v5221_v23 = vld [vmem:[%s6093_s9 + $0x18] sm:$0xf]  ;;  %v5225_v38 = vld [vmem:[%s6093_s9 + $0x28] sm:$0xf] }
  0xc0   : > { %v4957_v32 = vrot.slane %v6789_v40, 9  ;;  %v1841_v17 = vsel %vm6245_vm7, %v4954_v57, %v1840_v43  ;;  %v1845_v56 = vsel %vm6245_vm7, %v4955_v47, %v1844_v15  ;;  %v1852_v52 = vrot.slane %v6665_v41, 5  ;;  %v6834_v55 = vld [vmem:[%s6093_s9 + $0x2c] sm:$0x1]  ;;  %v5981_v62 = vld [vmem:[%s6093_s9 + $0x3c] sm:$0x1] }
  0xc1   : > { %5532 = vmatmul.mubr.msk.bf16.gmra.mrb[4].mxu1 %vm290_vm1, %v4937_v49  ;;  %v2003_v11 = vsel %vm303_vm0, %v4975_v63, 0  ;;  %v3937_v0 = vshrl.u32 %v5219_v58, 16  ;;  %v3940_v2 = vshll.u32 %v5219_v58, 16  ;;  %v3946_v5 = vshll.u32 %v6814_v59, 16  ;;  %v6849_v45 = vld [vmem:[%s6093_s9 + $0x44] sm:$0x1] }
  0xc2   : > { %5537 = vmatprep.mubr.msk.bf16.mxu1 %vm290_vm1, %v4959_v1  ;;  %5658 = vmatmul.mubr.msk.bf16.vlgmr.msra.gmra.mrb[0].mxu0 %vm290_vm1, %v5970_v9  ;;  %v3951_v39 = vshrl.u32 %v5221_v23, 16  ;;  %v3954_v41 = vshll.u32 %v5221_v23, 16  ;;  %v3960_v3 = vshll.u32 %v6819_v14, 16  ;;  %v4960_v42 = vcombine.low %v1833_v61, %v1837_v53  ;;  %v5973_v47 = vld [vmem:[%s6093_s9 + $0x8] ss:$8 sps:$4 sm:$0xff]  }
  0xc3   : > { %5666 = vmatpush3.bf16.msra.mxu0 %v4075_v24  ;;  %5661 = vmatprep.mubr.msk.bf16.mxu0 %vm290_vm1, %v5971_v51  ;;  %v4961_v25 = vcombine.low %v1841_v17, %v1845_v56  ;;  %v3939_v12 = vrot.slane %v3937_v0, 4  ;;  %v3942_v60 = vrot.slane %v3940_v2, 5  ;;  %v3948_v10 = vrot.slane %v3946_v5, 5  ;;  %v4992_v24 = vld [vmem:[%s7061_s1 + $0x16] sm:$0x3] }
  0xc4   : > { %5913 = vmatprep.subr.msk.bf16.mxu0 %vm303_vm0, %v5260_v44  ;;  %v3953_v13 = vrot.slane %v3951_v39, 4  ;;  %v3956_v30 = vrot.slane %v3954_v41, 5  ;;  %v3962_v33 = vrot.slane %v3960_v3, 5  ;;  %v3965_v19 = vshrl.u32 %v5223_v54, 16  ;;  %v6862_v17 = vld [vmem:[%s6093_s9 + $0x34] sm:$0x1] }
  0xc5   : > { %v3943_v16 = vor.u32 %v3942_v60, %v3939_v12  ;;  %v3968_v21 = vshll.u32 %v5223_v54, 16  ;;  %v3974_v31 = vshll.u32 %v6830_v18, 16  ;;  %v3979_v22 = vshrl.u32 %v5225_v38, 16  ;;  %v5229_v56 = vld [vmem:[%s6093_s9 + $0x38] sm:$0xf] }
  0xc6   : > { %v3957_v37 = vor.u32 %v3956_v30, %v3953_v13  ;;  %v3982_v6 = vshll.u32 %v5225_v38, 16  ;;  %v3988_v29 = vshll.u32 %v6834_v55, 16  ;;  %v1849_v27 = vsel %vm6245_vm7, %v4956_v20, %v1848_v7  ;;  %v5227_v20 = vld [vmem:[%s6093_s9 + $0x30] sm:$0xf]  ;;  %v5231_v3 = vld [vmem:[%s6093_s9 + $0x40] sm:$0xf] }
  0xc7   : > { %v3944_v48 = vrot.slane %v3943_v16, 4  ;;  %v3967_v26 = vrot.slane %v3965_v19, 4  ;;  %v3970_v63 = vrot.slane %v3968_v21, 5  ;;  %v1853_v28 = vsel %vm6245_vm7, %v4957_v32, %v1852_v52  ;;  %v6877_v12 = vld [vmem:[%s6093_s9 + $0x44] sm:$0x1] }
  0xc8   : > { %v3958_v34 = vrot.slane %v3957_v37, 4  ;;  %v3981_v35 = vrot.slane %v3979_v22, 4  ;;  %v3984_v9 = vrot.slane %v3982_v6, 5  ;;  %v2309_v36 = vshll.u32 %v5981_v62, 16  ;;  %v5233_v30 = vld [vmem:[%s6093_s9 + $0x48] sm:$0xf] }
  0xc9   : > { %5538 = vmatmul.mubr.msk.bf16.vlgmr.msra.gmra.mrb[0].mxu1 %vm290_vm1, %v4960_v42  ;;  %v3949_v57 = vsel %vm6151_vm4, %v3944_v48, %v3948_v10  ;;  %v3971_v43 = vor.u32 %v3970_v63, %v3967_v26  ;;  %v3976_v40 = vrot.slane %v3974_v31, 5  ;;  %v2323_v1 = vshll.u32 %v6849_v45, 16  ;;  %v6883_v38 = vld [vmem:[%s6093_s9 + $0x4c] sm:$0x1]  ;;  %v5974_v31 = vld [vmem:[%s6093_s9 + $0x18] ss:$8 sps:$4 sm:$0xff]  }
  0xca   : > { %5541 = vmatprep.mubr.msk.bf16.mxu1 %vm290_vm1, %v4961_v25  ;;  %5546 = vmatpush3.bf16.msra.mxu1 %v2003_v11  ;;  %v3963_v15 = vsel %vm6151_vm4, %v3958_v34, %v3962_v33  ;;  %v3985_v49 = vor.u32 %v3984_v9, %v3981_v35  ;;  %v3990_v51 = vrot.slane %v3988_v29, 5  ;;  %v4962_v61 = vcombine.low %v1849_v27, %v1853_v28  ;;  %v6866_v11 = vld [vmem:[%s6093_s9 + $0x3c] sm:$0x1]  ;;  %v5975_v28 = vld [vmem:[%s6093_s9 + $0x28] ss:$8 sps:$4 sm:$0xff]  }
  0xcb   : > { %5662 = vmatmul.mubr.msk.bf16.gmra.mrb[4].mxu0 %vm290_vm1, %v5972_v8  ;;  %v5236_v53 = vcombine.low %v3949_v57, %v3963_v15  ;;  %v3972_v7 = vrot.slane %v3971_v43, 4  ;;  %v4305_v32 = vsel %vm303_vm0, %v5260_v44, 0  ;;  %5900 = vmatprep.subr.msk.bf16.mxu1 %vm303_vm0, %v4992_v24  ;;  %v3993_v58 = vshrl.u32 %v5227_v20, 16 }
  0xcc   : > { %v3986_v52 = vrot.slane %v3985_v49, 4  ;;  %v3996_v23 = vshll.u32 %v5227_v20, 16  ;;  %v4002_v0 = vshll.u32 %v6862_v17, 16  ;;  %v4007_v5 = vshrl.u32 %v5229_v56, 16  ;;  %v5244_v49 = vld [vmem:[%s6093_s9 + $0x60] sm:$0xf] }
  0xcd   : > { %5667 = vmatprep.mubr.msk.bf16.mxu0 %vm290_vm1, %v5236_v53  ;;  %v3977_v2 = vsel %vm6151_vm4, %v3972_v7, %v3976_v40  ;;  %v4010_v39 = vshll.u32 %v5229_v56, 16  ;;  %v4016_v41 = vshll.u32 %v6866_v11, 16  ;;  %v3995_v42 = vrot.slane %v3993_v58, 4  ;;  %v5246_v20 = vld [vmem:[%s6093_s9 + $0x68] sm:$0xf] }
  0xce   : > { %v3991_v44 = vsel %vm6151_vm4, %v3986_v52, %v3990_v51  ;;  %v3998_v25 = vrot.slane %v3996_v23, 5  ;;  %v4004_v8 = vrot.slane %v4002_v0, 5  ;;  %v4009_v54 = vrot.slane %v4007_v5, 4  ;;  %v5245_v51 = vld [vmem:[%s6093_s9 + $0x64] sm:$0x1] }
  0xcf   : > { %v5237_v60 = vcombine.low %v3977_v2, %v3991_v44  ;;  %v4012_v10 = vrot.slane %v4010_v39, 5  ;;  %v4018_v13 = vrot.slane %v4016_v41, 5  ;;  %v4021_v16 = vshrl.u32 %v5231_v3, 16  ;;  %v5285_v0 = vld [vmem:[%s7061_s1 + $0x30] sm:$0x3] }
  0xd0   : > { %v3999_v33 = vor.u32 %v3998_v25, %v3995_v42  ;;  %v4024_v19 = vshll.u32 %v5231_v3, 16  ;;  %v4030_v21 = vshll.u32 %v6877_v12, 16  ;;  %v4035_v22 = vshrl.u32 %v5233_v30, 16  ;;  %v5248_v3 = vld [vmem:[%s6093_s9 + $0x70] sm:$0xf] }
  0xd1   : > { %5542 = vmatmul.mubr.msk.bf16.gmra.mrb[4].mxu1 %vm290_vm1, %v4962_v61  ;;  %v4013_v37 = vor.u32 %v4012_v10, %v4009_v54  ;;  %v4038_v6 = vshll.u32 %v5233_v30, 16  ;;  %v4044_v29 = vshll.u32 %v6883_v38, 16  ;;  %v6889_v27 = vrot.slane %v2309_v36, 5  ;;  %v5976_v44 = vld [vmem:[%s6093_s9 + $0x38] ss:$8 sps:$4 sm:$0xff]  }
  0xd2   : > { %5547 = vmatprep.mubr.msk.bf16.mxu1 %vm290_vm1, %v5973_v47  ;;  %v4000_v48 = vrot.slane %v3999_v33, 4  ;;  %v4023_v26 = vrot.slane %v4021_v16, 4  ;;  %v4026_v63 = vrot.slane %v4024_v19, 5  ;;  %v2124_v34 = vsel %vm303_vm0, %v4992_v24, 0  ;;  %v5247_v24 = vld [vmem:[%s6093_s9 + $0x6c] sm:$0x1] }
  0xd3   : > { %5668 = vmatmul.mubr.msk.bf16.vlgmr.msra.gmra.mrb[0].mxu0 %vm290_vm1, %v5237_v60  ;;  %v4014_v35 = vrot.slane %v4013_v37, 4  ;;  %v4037_v9 = vrot.slane %v4035_v22, 4  ;;  %v4040_v62 = vrot.slane %v4038_v6, 5  ;;  %v4032_v36 = vrot.slane %v4030_v21, 5  ;;  %v5249_v54 = vld [vmem:[%s6093_s9 + $0x74] sm:$0x1] }
  0xd4   : > { %5676 = vmatpush3.bf16.msra.mxu0 %v4305_v32  ;;  %v4005_v57 = vsel %vm6151_vm4, %v4000_v48, %v4004_v8  ;;  %v4027_v43 = vor.u32 %v4026_v63, %v4023_v26  ;;  %v4046_v40 = vrot.slane %v4044_v29, 5  ;;  %v4167_v7 = vshrl.u32 %v5244_v49, 16  ;;  %v5250_v16 = vld [vmem:[%s6093_s9 + $0x78] sm:$0xf]  ;;  %v5251_v19 = vld [vmem:[%s6093_s9 + $0x7c] sm:$0x1] }
  0xd5   : > { %v4019_v47 = vsel %vm6151_vm4, %v4014_v35, %v4018_v13  ;;  %v4041_v15 = vor.u32 %v4040_v62, %v4037_v9  ;;  %v4170_v32 = vshll.u32 %v5244_v49, 16  ;;  %v4176_v52 = vshll.u32 %v5245_v51, 16  ;;  %5914 = vmatprep.subr.msk.bf16.mxu0 %vm303_vm0, %v5285_v0  ;;  %v5977_v13 = vld [vmem:[%s6093_s9 + $0x58] ss:$8 sps:$4 sm:$0xff]  }
  0xd6   : > { %v5238_v61 = vcombine.low %v4005_v57, %v4019_v47  ;;  %v4028_v53 = vrot.slane %v4027_v43, 4  ;;  %v4181_v58 = vshrl.u32 %v5246_v20, 16  ;;  %v4184_v23 = vshll.u32 %v5246_v20, 16  ;;  %v5252_v51 = vld [vmem:[%s6093_s9 + $0x80] sm:$0xf] }
  0xd7   : > { %v4042_v56 = vrot.slane %v4041_v15, 4  ;;  %v4169_v5 = vrot.slane %v4167_v7, 4  ;;  %v4172_v39 = vrot.slane %v4170_v32, 5  ;;  %v4190_v41 = vshll.u32 %v5247_v24, 16  ;;  %v5254_v24 = vld [vmem:[%s6093_s9 + $0x88] sm:$0xf] }
  0xd8   : > { %v4033_v2 = vsel %vm6151_vm4, %v4028_v53, %v4032_v36  ;;  %5671 = vmatprep.mubr.msk.bf16.mxu0 %vm290_vm1, %v5238_v61  ;;  %v4178_v25 = vrot.slane %v4176_v52, 5  ;;  %v4183_v8 = vrot.slane %v4181_v58, 4  ;;  %v4186_v60 = vrot.slane %v4184_v23, 5  ;;  %v5253_v53 = vld [vmem:[%s6093_s9 + $0x84] sm:$0x1] }
  0xd9   : > { %5548 = vmatmul.mubr.msk.bf16.vlgmr.msra.gmra.mrb[0].mxu1 %vm290_vm1, %v5974_v31  ;;  %v4047_v42 = vsel %vm6151_vm4, %v4042_v56, %v4046_v40  ;;  %v4173_v30 = vor.u32 %v4172_v39, %v4169_v5  ;;  %v4192_v33 = vrot.slane %v4190_v41, 5  ;;  %v4195_v21 = vshrl.u32 %v5248_v3, 16  ;;  %v5983_v31 = vld [vmem:[%s7061_s1 + $0x18] sm:$0x3]  ;;  %v6930_v40 = vld [vmem:[%s6093_s9 + $0x2c] sm:$0x1] }
  0xda   : > { %5551 = vmatprep.mubr.msk.bf16.mxu1 %vm290_vm1, %v5975_v28  ;;  %5556 = vmatpush3.bf16.msra.mxu1 %v2124_v34  ;;  %v5239_v10 = vcombine.low %v4033_v2, %v4047_v42  ;;  %v4187_v37 = vor.u32 %v4186_v60, %v4183_v8  ;;  %v4198_v22 = vshll.u32 %v5248_v3, 16  ;;  %v4204_v6 = vshll.u32 %v5249_v54, 16  ;;  %v5255_v7 = vld [vmem:[%s6093_s9 + $0x8c] sm:$0x1]  ;;  %v5978_v32 = vld [vmem:[%s6093_s9 + $0x68] ss:$8 sps:$4 sm:$0xff]  }
  0xdb   : > { %5902 = vmatprep.subr.msk.bf16.mxu1 %vm303_vm0, %v5983_v31  ;;  %v4209_v29 = vshrl.u32 %v5250_v16, 16  ;;  %v4174_v48 = vrot.slane %v4173_v30, 4  ;;  %v4197_v26 = vrot.slane %v4195_v21, 4  ;;  %v4212_v63 = vshll.u32 %v5250_v16, 16  ;;  %v5256_v2 = vld [vmem:[%s6093_s9 + $0x90] sm:$0xf] }
  0xdc   : > { %5672 = vmatmul.mubr.msk.bf16.gmra.mrb[4].mxu0 %vm290_vm1, %v5239_v10  ;;  %v4218_v28 = vshll.u32 %v5251_v19, 16  ;;  %v6925_v34 = vrot.slane %v2323_v1, 5  ;;  %v4188_v35 = vrot.slane %v4187_v37, 4  ;;  %v4200_v9 = vrot.slane %v4198_v22, 5  ;;  %v5979_v5 = vld [vmem:[%s6093_s9 + $0x78] ss:$8 sps:$4 sm:$0xff]  }
  0xdd   : > { %v4211_v62 = vrot.slane %v4209_v29, 4  ;;  %v4179_v57 = vsel %vm6151_vm4, %v4174_v48, %v4178_v25  ;;  %v4206_v43 = vrot.slane %v4204_v6, 5  ;;  %v4214_v36 = vrot.slane %v4212_v63, 5  ;;  %v5258_v54 = vld [vmem:[%s6093_s9 + $0x98] sm:$0xf] }
  0xde   : > { %v2281_v47 = vshll.u32 %v6930_v40, 16  ;;  %v4193_v45 = vsel %vm6151_vm4, %v4188_v35, %v4192_v33  ;;  %v4201_v1 = vor.u32 %v4200_v9, %v4197_v26  ;;  %v4220_v15 = vrot.slane %v4218_v28, 5  ;;  %v5259_v16 = vld [vmem:[%s6093_s9 + $0x9c] sm:$0x1]  ;;  %v5009_v26 = vld [vmem:[%s6093_s9 + $0x28] sm:$0xf] }
  0xdf   : > { %v4463_v49 = vsel %vm303_vm0, %v5285_v0, 0  ;;  %v5261_v20 = vcombine.low %v4179_v57, %v4193_v45  ;;  %v4215_v61 = vor.u32 %v4214_v36, %v4211_v62  ;;  %v4223_v52 = vshrl.u32 %v5252_v51, 16  ;;  %v5011_v45 = vld [vmem:[%s6093_s9 + $0x30] sm:$0xf] }
  0xe0   : > { %v4202_v56 = vrot.slane %v4201_v1, 4  ;;  %v4226_v58 = vshll.u32 %v5252_v51, 16  ;;  %v4232_v23 = vshll.u32 %v5253_v53, 16  ;;  %v4237_v39 = vshrl.u32 %v5254_v24, 16 }
  0xe1   : > { %5552 = vmatmul.mubr.msk.bf16.gmra.mrb[4].mxu1 %vm290_vm1, %v5976_v44  ;;  %5677 = vmatprep.mubr.msk.bf16.mxu0 %vm290_vm1, %v5261_v20  ;;  %v4216_v0 = vrot.slane %v4215_v61, 4  ;;  %v4240_v41 = vshll.u32 %v5254_v24, 16  ;;  %v4246_v3 = vshll.u32 %v5255_v7, 16  ;;  %v5257_v44 = vld [vmem:[%s6093_s9 + $0x94] sm:$0x1]  ;;  %v4225_v25 = vrot.slane %v4223_v52, 4 }
  0xe2   : > { %5557 = vmatprep.mubr.msk.bf16.mxu1 %vm290_vm1, %v5977_v13  ;;  %v4207_v42 = vsel %vm6151_vm4, %v4202_v56, %v4206_v43  ;;  %v4228_v8 = vrot.slane %v4226_v58, 5  ;;  %v4234_v60 = vrot.slane %v4232_v23, 5  ;;  %v4239_v13 = vrot.slane %v4237_v39, 4  ;;  %v5013_v7 = vld [vmem:[%s6093_s9 + $0x38] sm:$0xf] }
  0xe3   : > { %v4221_v10 = vsel %vm6151_vm4, %v4216_v0, %v4220_v15  ;;  %v4242_v30 = vrot.slane %v4240_v41, 5  ;;  %v4248_v33 = vrot.slane %v4246_v3, 5  ;;  %v4251_v31 = vshrl.u32 %v5256_v2, 16  ;;  %v5015_v41 = vld [vmem:[%s6093_s9 + $0x40] sm:$0xf] }
  0xe4   : > { %v5262_v19 = vcombine.low %v4207_v42, %v4221_v10  ;;  %v4229_v21 = vor.u32 %v4228_v8, %v4225_v25  ;;  %v4254_v37 = vshll.u32 %v5256_v2, 16  ;;  %v4260_v6 = vshll.u32 %v5257_v44, 16  ;;  %v5269_v42 = vld [vmem:[%s6093_s9 + $0x10] sm:$0xe]  ;;  %v5270_v10 = vld [vmem:[%s6093_s9 + $0x18] sm:$0xe] }
  0xe5   : > { %v4243_v22 = vor.u32 %v4242_v30, %v4239_v13  ;;  %v4265_v29 = vshrl.u32 %v5258_v54, 16  ;;  %v4268_v48 = vshll.u32 %v5258_v54, 16  ;;  %v4253_v28 = vrot.slane %v4251_v31, 4 }
  0xe6   : > { %5678 = vmatmul.mubr.msk.bf16.vlgmr.msra.gmra.mrb[0].mxu0 %vm290_vm1, %v5262_v19  ;;  %v4230_v63 = vrot.slane %v4229_v21, 4  ;;  %v4256_v35 = vrot.slane %v4254_v37, 5  ;;  %v4274_v9 = vshll.u32 %v5259_v16, 16  ;;  %v4262_v57 = vrot.slane %v4260_v6, 5 }
  0xe7   : > { %5686 = vmatpush3.bf16.msra.mxu0 %v4463_v49  ;;  %v4244_v62 = vrot.slane %v4243_v22, 4  ;;  %v4267_v43 = vrot.slane %v4265_v29, 4  ;;  %v4270_v36 = vrot.slane %v4268_v48, 5  ;;  %v2272_v20 = vshrl.u32 %v5009_v26, 16  ;;  %v5271_v22 = vld [vmem:[%s6093_s9 + $0x20] sm:$0xe] }
  0xe8   : > { %v4235_v1 = vsel %vm6151_vm4, %v4230_v63, %v4234_v60  ;;  %v4257_v15 = vor.u32 %v4256_v35, %v4253_v28  ;;  %v4276_v51 = vrot.slane %v4274_v9, 5  ;;  %v2275_v53 = vshll.u32 %v5009_v26, 16  ;;  %v5272_v63 = vld [vmem:[%s6093_s9 + $0x28] sm:$0xe] }
  0xe9   : > { %5558 = vmatmul.mubr.msk.bf16.vlgmr.msra.gmra.mrb[0].mxu1 %vm290_vm1, %v5978_v32  ;;  %v4249_v49 = vsel %vm6151_vm4, %v4244_v62, %v4248_v33  ;;  %v4271_v61 = vor.u32 %v4270_v36, %v4267_v43  ;;  %v2283_v24 = vrot.slane %v2281_v47, 5  ;;  %v5980_v32 = vld [vmem:[%s6093_s9 + $0x88] ss:$8 sps:$4 sm:$0xff]   ;;  %v2274_v52 = vrot.slane %v2272_v20, 4 }
  0xea   : > { %5561 = vmatprep.mubr.msk.bf16.mxu1 %vm290_vm1, %v5979_v5  ;;  %5696 = vmatpush3.bf16.msra.mxu1 %v6070_v4  ;;  %v5263_v4 = vcombine.low %v4235_v1, %v4249_v49  ;;  %v4258_v56 = vrot.slane %v4257_v15, 4  ;;  %v2286_v58 = vshrl.u32 %v5011_v45, 16  ;;  %v2277_v2 = vrot.slane %v2275_v53, 5  ;;  %v5985_v5 = vld [vmem:[%s6093_s9 + $0x34] sm:$0x1] }
  0xeb   : > { %v4272_v23 = vrot.slane %v4271_v61, 4  ;;  %v2289_v0 = vshll.u32 %v5011_v45, 16  ;;  %v2295_v39 = vshll.u32 %v5985_v5, 16  ;;  %v2300_v3 = vshrl.u32 %v5013_v7, 16  ;;  %v5274_v49 = vld [vmem:[%s6093_s9 + $0x38] sm:$0xe] }
  0xec   : > { %5681 = vmatprep.mubr.msk.bf16.mxu0 %vm290_vm1, %v5263_v4  ;;  %v4263_v40 = vsel %vm6151_vm4, %v4258_v56, %v4262_v57  ;;  %v2288_v47 = vrot.slane %v2286_v58, 4  ;;  %v2303_v44 = vshll.u32 %v5013_v7, 16  ;;  %v2278_v8 = vor.u32 %v2277_v2, %v2274_v52  ;;  %v5275_v61 = vld [vmem:[%s6093_s9 + $0x40] sm:$0xe]  ;;  %v5276_v7 = vld [vmem:[%s6093_s9 + $0x48] sm:$0xe] }
  0xed   : > { %v4277_v25 = vsel %vm6151_vm4, %v4272_v23, %v4276_v51  ;;  %v2291_v60 = vrot.slane %v2289_v0, 5  ;;  %v2297_v54 = vrot.slane %v2295_v39, 5  ;;  %v2302_v30 = vrot.slane %v2300_v3, 4 }
  0xee   : > { %v5264_v13 = vcombine.low %v4263_v40, %v4277_v25  ;;  %v2305_v33 = vrot.slane %v2303_v44, 5  ;;  %v2314_v16 = vshrl.u32 %v5015_v41, 16  ;;  %v2279_v19 = vrot.slane %v2278_v8, 4 }
  0xef   : > { %v2292_v21 = vor.u32 %v2291_v60, %v2288_v47  ;;  %v2317_v31 = vshll.u32 %v5015_v41, 16  ;;  %v5277_v37 = vrot.slane %v5269_v42, 9  ;;  %v4406_v48 = vrot.slane %v6814_v59, 5  ;;  %v5273_v59 = vld [vmem:[%s6093_s9 + $0x30] sm:$0xe] }
  0xf0   : > { %5682 = vmatmul.mubr.msk.bf16.gmra.mrb[4].mxu0 %vm290_vm1, %v5264_v13  ;;  %v2306_v6 = vor.u32 %v2305_v33, %v2302_v30  ;;  %v2316_v29 = vrot.slane %v2314_v16, 4  ;;  %v5278_v26 = vrot.slane %v5270_v10, 9  ;;  %v2284_v28 = vsel %vm6151_vm4, %v2279_v19, %v2283_v24 }
  0xf1   : > { %5562 = vmatmul.mubr.msk.bf16.gmra.mrb[4].mxu1 %vm290_vm1, %v5980_v32  ;;  %v2293_v35 = vrot.slane %v2292_v21, 4  ;;  %v2319_v9 = vrot.slane %v2317_v31, 5  ;;  %v4410_v62 = vrot.slane %v6819_v14, 5  ;;  %v4407_v43 = vsel %vm6245_vm7, %v5277_v37, %v4406_v48 }
  0xf2   : > { %v2307_v57 = vrot.slane %v2306_v6, 4  ;;  %v5279_v36 = vrot.slane %v5271_v22, 9  ;;  %v4414_v45 = vrot.slane %v6830_v18, 5  ;;  %v5280_v20 = vrot.slane %v5272_v63, 9 }
  0xf3   : > { %v2298_v1 = vsel %vm6151_vm4, %v2293_v35, %v2297_v54  ;;  %v2320_v15 = vor.u32 %v2319_v9, %v2316_v29  ;;  %v4411_v51 = vsel %vm6245_vm7, %v5278_v26, %v4410_v62  ;;  %v4418_v4 = vrot.slane %v6834_v55, 5 }
  0xf4   : > { %v5020_v14 = vcombine.low %v2284_v28, %v2298_v1  ;;  %v2312_v53 = vsel %vm6151_vm4, %v2307_v57, %v6889_v27  ;;  %v5286_v24 = vcombine.low %v4407_v43, %v4411_v51  ;;  %v4415_v18 = vsel %vm6245_vm7, %v5279_v36, %v4414_v45 }
  0xf5   : > { %v2321_v32 = vrot.slane %v2320_v15, 4  ;;  %v5281_v56 = vrot.slane %v5273_v59, 9  ;;  %v4422_v52 = vrot.slane %v6862_v17, 5  ;;  %v5282_v58 = vrot.slane %v5274_v49, 9 }
  0xf6   : > { %5571 = vmatprep.mubr.msk.bf16.mxu1 %vm290_vm1, %v5020_v14  ;;  %5687 = vmatprep.mubr.msk.bf16.mxu0 %vm290_vm1, %v5286_v24  ;;  %v4426_v23 = vrot.slane %v6866_v11, 5  ;;  %v5283_v2 = vrot.slane %v5275_v61, 9  ;;  %v4430_v27 = vrot.slane %v6877_v12, 5  ;;  %v4419_v55 = vsel %vm6245_vm7, %v5280_v20, %v4418_v4 }
  0xf7   : > { %v2326_v0 = vsel %vm6151_vm4, %v2321_v32, %v6925_v34  ;;  %v4423_v17 = vsel %vm6245_vm7, %v5281_v56, %v4422_v52  ;;  %v5284_v5 = vrot.slane %v5276_v7, 9  ;;  %v5287_v41 = vcombine.low %v4415_v18, %v4419_v55 }
  0xf8   : > { %v5021_v39 = vcombine.low %v2312_v53, %v2326_v0  ;;  %v4427_v11 = vsel %vm6245_vm7, %v5282_v58, %v4426_v23  ;;  %v4434_v12 = vrot.slane %v6883_v38, 5  ;;  %v4431_v46 = vsel %vm6245_vm7, %v5283_v2, %v4430_v27 }
  0xf9   : > { %v5288_v40 = vcombine.low %v4423_v17, %v4427_v11  ;;  %5688 = vmatmul.mubr.msk.bf16.vlgmr.msra.gmra.mrb[0].mxu0 %vm290_vm1, %v5287_v41  ;;  %v6010_v38 = vmov 0.0  }
  0xfa   : > { %v4435_v34 = vsel %vm6245_vm7, %v5284_v5, %v4434_v12  ;;  %4559 = vst [vmem:[%s7029_s8] sm:$0x1] %v6010_v38  ;;  %4558 = vst [vmem:[%s7035_s12] sm:$0x1] %v6010_v38 }
  0xfb   : > { %5691 = vmatprep.mubr.msk.bf16.mxu0 %vm290_vm1, %v5288_v40  ;;  %v5289_v47 = vcombine.low %v4431_v46, %v4435_v34 }
  0xfd   : > { %5572 = vmatmul.mubr.msk.bf16.vlgmr.msra.gmra.mrb[4].mxu1 %vm290_vm1, %v5021_v39 }
 0x101   : > { %5692 = vmatmul.mubr.msk.bf16.gmra.mrb[4].mxu0 %vm290_vm1, %v5289_v47  ;;  %v4560_v12 = vld [vmem:[%s7035_s12] sm:$0x1] }
 0x102   : > { %v4576_v47 = vld [vmem:[%s7029_s8] sm:$0x1] }
 0x1bc   : > { %v5559_v50 = vpop.f32.mrb[0].mxu1 }
 0x1bd   : > { %v2160_v3 = vpop.f32.mrb[1].mxu1 }
 0x1be   : > { %v5560_v44 = vpop.f32.mrb[2].mxu1 }
 0x1bf   : > { %v2163_v42 = vpop.f32.mrb[3].mxu1 }
 0x1cc   : > { %v5689_v8 = vpop.f32.mrb[0].mxu0 }
 0x1cd   : > { %v5697_v54 = vadd.f32 %v5689_v8, %v5559_v50  ;;  %v4499_v10 = vpop.f32.mrb[1].mxu0 }
 0x1ce   : > { %v5698_v30 = vadd.f32 %v4499_v10, %v2160_v3  ;;  %v5690_v33 = vpop.f32.mrb[2].mxu0 }
 0x1cf   : > { %v5699_v19 = vadd.f32 %v5690_v33, %v5560_v44  ;;  %v4502_v21 = vpop.f32.mrb[3].mxu0  ;;  %v4579_v26 = vmul.f32 %v5697_v54, %v5697_v54 }
 0x1d0   : > { %v5573_v25 = vpop.f32.mrb[4].mxu1  ;;  %v5700_v31 = vadd.f32 %v4502_v21, %v2163_v42  ;;  %v4577_v22 = vmul.f32 %v5698_v30, %v5698_v30 }
 0x1d1   : > { %v2406_v60 = vpop.f32.mrb[5].mxu1  ;;  %v5305_v37 = vpack.c.bf16 %v5699_v19, %v5697_v54  ;;  %v4580_v57 = vmul.f32 %v5699_v19, %v5699_v19 }
 0x1d2   : > { %v5574_v13 = vpop.f32.mrb[6].mxu1  ;;  %v5300_v6 = vpack.c.bf16 %v5700_v31, %v5698_v30  ;;  %v4561_v29 = vadd.f32 %v5700_v31, %v5698_v30  ;;  %v4578_v48 = vmul.f32 %v5700_v31, %v5700_v31 }
 0x1d3   : > { %v2409_v16 = vpop.f32.mrb[7].mxu1  ;;  %5317 = vst [vmem:[%s7041_s20 + $0x8] sm:$0xff] %v5305_v37  }
 0x1d4   : > { %5301 = vst [vmem:[%s7041_s20] sm:$0xff] %v5300_v6   ;;  %v4562_v63 = vadd.f32 %v5697_v54, %v4561_v29  ;;  %v4585_v28 = vadd.f32 %v4578_v48, %v4577_v22  ;;  %v5693_v35 = vpop.f32.mrb[4].mxu0 }
 0x1d5   : > { %v5701_v9 = vadd.f32 %v5693_v35, %v5573_v25  ;;  %v4515_v62 = vpop.f32.mrb[5].mxu0 }
 0x1d6   : > { %v4586_v43 = vadd.f32 %v4585_v28, %v4579_v26  ;;  %v5702_v36 = vadd.f32 %v4515_v62, %v2406_v60  ;;  %v4563_v45 = vadd.f32 %v5699_v19, %v4562_v63  ;;  %v5694_v59 = vpop.f32.mrb[6].mxu0 }
 0x1d7   : > { %v5703_v1 = vadd.f32 %v5694_v59, %v5574_v13  ;;  %v4518_v15 = vpop.f32.mrb[7].mxu0  ;;  %v4583_v32 = vmul.f32 %v5701_v9, %v5701_v9 }
 0x1d8   : > { %v4564_v51 = vadd.f32 %v5702_v36, %v4563_v45  ;;  %v4581_v20 = vmul.f32 %v5702_v36, %v5702_v36  ;;  %v4587_v49 = vadd.f32 %v4586_v43, %v4580_v57  ;;  %v5704_v61 = vadd.f32 %v4518_v15, %v2409_v16 }
 0x1d9   : > { %v5315_v14 = vpack.c.bf16 %v5703_v1, %v5701_v9  ;;  %v4584_v52 = vmul.f32 %v5703_v1, %v5703_v1 }
 0x1da   : > { %v4588_v53 = vadd.f32 %v4587_v49, %v4581_v20  ;;  %v5310_v24 = vpack.c.bf16 %v5704_v61, %v5702_v36  ;;  %v4565_v18 = vadd.f32 %v5704_v61, %v4564_v51  ;;  %v4582_v7 = vmul.f32 %v5704_v61, %v5704_v61 }
 0x1db   : > { %5319 = vst [vmem:[%s7041_s20 + $0x18] sm:$0xff] %v5315_v14  }
 0x1dc   : > { %5318 = vst [vmem:[%s7041_s20 + $0x10] sm:$0xff] %v5310_v24   ;;  %v4566_v4 = vadd.f32 %v5701_v9, %v4565_v18  ;;  %v4589_v56 = vadd.f32 %v4588_v53, %v4582_v7 }
 0x1de   : > { %v4567_v58 = vadd.f32 %v5703_v1, %v4566_v4  ;;  %v4590_v23 = vadd.f32 %v4589_v56, %v4583_v32 }
 0x1e0   : > { %v4568_v2 = vrot.slane %v4567_v58, 4  ;;  %v4591_v27 = vadd.f32 %v4590_v23, %v4584_v52 }
 0x1e2   : > { %v4569_v0 = vadd.f32 %v4568_v2, %v4567_v58  ;;  %v4592_v55 = vrot.slane %v4591_v27, 4 }
 0x1e4   : > { %v4570_v17 = vrot.slane %v4569_v0, 2  ;;  %v4593_v5 = vadd.f32 %v4592_v55, %v4591_v27 }
 0x1e6   : > { %v4571_v39 = vadd.f32 %v4570_v17, %v4569_v0  ;;  %v4594_v41 = vrot.slane %v4593_v5, 2 }
 0x1e8   : > { %v4572_v11 = vrot.slane %v4571_v39, 1  ;;  %v4595_v40 = vadd.f32 %v4594_v41, %v4593_v5 }
 0x1ea   : > { %v4573_v46 = vadd.f32 %v4572_v11, %v4571_v39  ;;  %v4596_v34 = vrot.slane %v4595_v40, 1 }
 0x1ec   : > { %v4574_v38 = vadd.f32 %v4573_v46, %v4560_v12  ;;  %v4597_v50 = vadd.f32 %v4596_v34, %v4595_v40 }
 0x1ee   : > { %4575 = vst [vmem:[%s7035_s12] sm:$0x1] %v4574_v38  ;;  %v4598_v3 = vadd.f32 %v4597_v50, %v4576_v47 }
 0x1f0   : > { %4599 = vst [vmem:[%s7029_s8] sm:$0x1] %v4598_v3 }
 0x1f1 PF: > { %s15_s17 = sadd.s32 1, %s6008_s17   ;;  %s7069_s15 = smov %s6004_s16 }
 0x1f2   : > { %p12_p6 = scmp.ge.s32.totalorder %s15_s17, 4   ;;  %s7070_s16 = smov %s7072_s18 }
 0x1f4   :  { %14 = sbr.rel (!%p12_p6) target bundleno = 2 (0x2), region = 120 }

// kernel: forward.6
= control target key start
LH: loop header
LB: loop body
LE: loop exit
PB: predicated region body
PF: predicated region fallthrough
CT: control target
= control target key end

     0   :  { %s6867_s15 = smov 0   ;;  %s6869_s16 = smov 0   ;;  %s8053_s0 = inlined_call_operand.vmem [shape: bf16[8,6,6,128], index: 0, kind: input, shape index: {}]   ;;  %s8054_s1 = inlined_call_operand.vmem [shape: bf16[5,5,128,128], index: 1, kind: input, shape index: {}]   ;;  %s8055_s2 = inlined_call_operand.vmem [shape: bf16[2,4,4,128], index: 2, kind: output, shape index: {0}]   ;;  %s8056_s3 = inlined_call_operand.vmem [shape: f32[2,1,128], index: 3, kind: output, shape index: {1}]   ;;  %s8057_s4 = inlined_call_operand.vmem [shape: f32[2,1,128], index: 4, kind: output, shape index: {2}]  }
   0x1   :  { %s6871_s17 = smov 0  }
   0x2 LB: > { %s27_s18 = sadd.s32 1, %s6833_s16  ;;  %p4968_p0 = scmp.ge.s32.totalorder %s6837_s17, 1  ;;  %s6837_s17 = sphi %s6871_s17, %s15_s17   ;;  %s6833_s16 = sphi %s6869_s16, %s8067_s16   ;;  %s6829_s15 = sphi %s6867_s15, %s8066_s15  }
   0x3   : > { %p29_p1 = scmp.ge.s32.totalorder %s27_s18, 2  ;;  %p183_p2 = scmp.lt.s32.totalorder %s6837_s17, 3 }
   0x5   : > { %s8069_s18 = smov (%p29_p1, %s27_s18), 0  ;;  %p184_p3 = pnand %p4968_p0, %p183_p2 }
   0x6   : > { %v6575_v0 = vld [vmem:[%s8054_s1 + $0x40] sm:$0xff] (!%p184_p3)   ;;  %v6839_v1 = vmov (!%p184_p3), 0.0   ;;  %v6577_v3 = vld [vmem:[%s8054_s1 + $0x48] sm:$0xff] (!%p184_p3)   ;;  %vm6840_vm0 = vmmov (!%p184_p3), 0   ;;  %s4969_s25 = sshll.u32 (!%p184_p3), %s6829_s15, 2  ;;  %v6579_v5 = vld [vmem:[%s8054_s1 + $0x50] sm:$0xff] (!%p184_p3)   ;;  %v300_v9 = vlaneseq (!%p184_p3) }
   0x7   : > { %187 = sbr.rel (%p184_p3) target bundleno = 664 (0x298), region = 28  ;;  %5953 = vmatprep.subr.bf16.mxu1 (!%p184_p3), %v6839_v1  ;;  %6193 = vmatprep.subr.bf16.mxu0 (!%p184_p3), %v6839_v1  ;;  %v6576_v2 = vld [vmem:[%s8054_s1 + $0x300] sm:$0xff] (!%p184_p3)   ;;  %v6578_v4 = vld [vmem:[%s8054_s1 + $0x308] sm:$0xff] (!%p184_p3)   ;;  %p221_p4 = scmp.lt.s32.totalorder (!%p184_p3), %s4969_s25, 7  ;;  %v6580_v6 = vld [vmem:[%s8054_s1 + $0x310] sm:$0xff] (!%p184_p3)   ;;  %vm1004_vm8 = vcmask (!%p184_p3), 1040384  }
   0x8   : > { %5954 = vmatpush3.bf16.msra.mxu1 (!%p184_p3), %v6575_v0  ;;  %5969 = vmatprep.mubr.msk.bf16.mxu1 (!%p184_p3), %vm6840_vm0, %v6839_v1  ;;  %v6581_v7 = vld [vmem:[%s8054_s1 + $0x58] sm:$0xff] (!%p184_p3)   ;;  %v6583_v10 = vld [vmem:[%s8054_s1 + $0x60] sm:$0xff] (!%p184_p3)   ;;  %v6585_v12 = vld [vmem:[%s8054_s1 + $0x68] sm:$0xff] (!%p184_p3)   ;;  %v301_v14 = vshrl.u32 (!%p184_p3), %v300_v9, 7  ;;  %v6841_v17 = vmov (!%p184_p3), 1983009808  }
   0x9   : > { %6194 = vmatpush3.bf16.msra.mxu0 (!%p184_p3), %v6576_v2  ;;  %5955 = vmatprep.subr.bf16.mxu1 (!%p184_p3), %v6839_v1  ;;  %v6582_v8 = vld [vmem:[%s8054_s1 + $0x318] sm:$0xff] (!%p184_p3)   ;;  %v6584_v11 = vld [vmem:[%s8054_s1 + $0x320] sm:$0xff] (!%p184_p3)   ;;  %v6586_v13 = vld [vmem:[%s8054_s1 + $0x328] sm:$0xff] (!%p184_p3)   ;;  %v298_v18 = vunpack.c.l.s4 (!%p184_p3), %v6841_v17  ;;  %vm553_vm1 = vsmask.f32 (!%p184_p3), 1280  ;;  %vm1005_vm9 = vcmask (!%p184_p3), 1042434  }
   0xa   : > { %6195 = vmatprep.subr.bf16.mxu0 (!%p184_p3), %v6839_v1  ;;  %6209 = vmatprep.mubr.msk.bf16.mxu0 (!%p184_p3), %vm6840_vm0, %v6839_v1  ;;  %vm554_vm2 = vsmask.f32 (!%p184_p3), 3336  ;;  %v6587_v19 = vld [vmem:[%s8054_s1 + $0x70] sm:$0xff] (!%p184_p3)   ;;  %vm556_vm3 = vsmask.f32 (!%p184_p3), 5392  ;;  %v6589_v40 = vld [vmem:[%s8054_s1 + $0x78] sm:$0xff] (!%p184_p3)   ;;  %vm1006_vm10 = vmor (!%p184_p3), %vm1004_vm8, %vm1005_vm9 }
   0xb   : > { %vm558_vm4 = vsmask.f32 (!%p184_p3), 7448  ;;  %v6588_v20 = vld [vmem:[%s8054_s1 + $0x330] sm:$0xff] (!%p184_p3)   ;;  %v299_v21 = vunpack.c.0.s8 (!%p184_p3), %v298_v18  ;;  %vm6958_vm5 = vmor (!%p184_p3), %vm553_vm1, %vm554_vm2  ;;  %v6590_v45 = vld [vmem:[%s8054_s1 + $0x338] sm:$0xff] (!%p184_p3)   ;;  %vm1007_vm11 = vcmask (!%p184_p3), 1044484   ;;  %vm1009_vm13 = vcmask (!%p184_p3), 1046534  }
   0xc   : > { %5956 = vmatpush3.bf16.msra.mxu1 (!%p184_p3), %v6577_v3  ;;  %vm6972_vm6 = vmor (!%p184_p3), %vm6958_vm5, %vm556_vm3  ;;  %v6593_v59 = vld [vmem:[%s8054_s1] sm:$0xff] (!%p184_p3)   ;;  %p228_p5 = scmp.lt.s32.totalorder (!%p184_p3), %s6829_s15, 1 }
   0xd   : > { %6196 = vmatpush3.bf16.msra.mxu0 (!%p184_p3), %v6578_v4  ;;  %5957 = vmatprep.subr.bf16.mxu1 (!%p184_p3), %v6839_v1  ;;  %v6964_v28 = vsub.s32 (!%p184_p3), %v299_v21, %v301_v14  ;;  %vm6989_vm7 = vmor (!%p184_p3), %vm6972_vm6, %vm558_vm4  ;;  %v6594_v17 = vld [vmem:[%s8054_s1 + $0x340] sm:$0xff] (!%p184_p3)  }
   0xe   : > { %s8071_s25 = smov (!%p221_p4, %s4969_s25), 7  ;;  %6197 = vmatprep.subr.bf16.mxu0 %v6839_v1  ;;  %v6601_v21 = vld [vmem:[%s8054_s1 + $0x20] sm:$0xff]   ;;  %vm1008_vm12 = vmor %vm1006_vm10, %vm1007_vm11  ;;  %s8073_s15 = smov (!%p228_p5, %s6829_s15), 1 }
   0xf   : > { %s6547_s10 = smul.u32 24, %s8071_s25  ;;  %vm7168_vm14 = vmor %vm1008_vm12, %vm1009_vm13  ;;  %s8026_s25 = scalar_lea.vmem %s8056_s3, %s8073_s15 }
  0x10   : > { %5958 = vmatpush3.bf16.msra.mxu1 %v6579_v5  ;;  %v6595_v5 = vld [vmem:[%s8054_s1 + $0x8] sm:$0xff]   ;;  %s8031_s28 = scalar_lea.vmem %s8057_s4, %s8073_s15  ;;  %4771 = vst [vmem:[%s8026_s25] sm:$0x1] %v6839_v1  ;;  %s5727_s29 = sshll.u32 %s8073_s15, 3 }
  0x11   : > { %6198 = vmatpush3.bf16.msra.mxu0 %v6580_v6  ;;  %5959 = vmatprep.subr.bf16.mxu1 %v6839_v1  ;;  %s6934_s21 = scalar_lea.vmem %s8053_s0, %s6547_s10  ;;  %4772 = vst [vmem:[%s8031_s28] sm:$0x1] %v6839_v1  ;;  %s235_s6 = scalar_lea.vmem %s8055_s2, %s5727_s29 }
  0x12   : > { %6199 = vmatprep.subr.bf16.mxu0 %v6839_v1  ;;  %v6945_v15 = vld.sshfl [vmem:[%s6934_s21 + $0x18] sm:$0xf pattern:$0x76325410] }
  0x13   : > { %v6948_v16 = vld.sshfl [vmem:[%s6934_s21 + $0x20] sm:$0xf pattern:$0x76325410] }
  0x14   : > { %5960 = vmatpush3.bf16.msra.mxu1 %v6581_v7  ;;  %v5317_v22 = vld.sshfl [vmem:[%s6934_s21 + $0x4] sm:$0x13 pattern:$0x76325410]  ;;  %v311_v46 = vcombine.low %v6945_v15, %v6948_v16  ;;  %v6597_v15 = vld [vmem:[%s8054_s1 + $0x10] sm:$0xff]  }
  0x15   : > { %6200 = vmatpush3.bf16.msra.mxu0 %v6582_v8  ;;  %5961 = vmatprep.subr.bf16.mxu1 %v6839_v1  ;;  %v5318_v24 = vld.sshfl [vmem:[%s6934_s21 + $0x8] sm:$0x13 pattern:$0x76325410]  ;;  %v2342_v25 = vcombine.high %v5317_v22, %v5317_v22  ;;  %v2368_v26 = vshrl.u32 %v5317_v22, 16  ;;  %v2371_v27 = vshll.u32 %v5317_v22, 16 }
  0x16   : > { %6201 = vmatprep.subr.bf16.mxu0 %v6839_v1  ;;  %v5319_v29 = vld.sshfl [vmem:[%s6934_s21 + $0xc] sm:$0x13 pattern:$0x76325410]  ;;  %v2350_v30 = vcombine.high %v5318_v24, %v5318_v24  ;;  %v2382_v31 = vshrl.u32 %v5318_v24, 16  ;;  %v2385_v32 = vshll.u32 %v5318_v24, 16 }
  0x17   : > { %v5320_v33 = vld.sshfl [vmem:[%s6934_s21 + $0x10] sm:$0x13 pattern:$0x76325410]  ;;  %v2358_v34 = vcombine.high %v5319_v29, %v5319_v29  ;;  %v2370_v35 = vrot.slane %v2368_v26, 6  ;;  %v2373_v36 = vrot.slane %v2371_v27, 7 }
  0x18   : > { %5962 = vmatpush3.bf16.msra.mxu1 %v6583_v10  ;;  %v2366_v38 = vcombine.high %v5320_v33, %v5320_v33  ;;  %v2377_v39 = vshll.u32 %v2342_v25, 16  ;;  %v2384_v42 = vrot.slane %v2382_v31, 6  ;;  %v2387_v43 = vrot.slane %v2385_v32, 7 }
  0x19   : > { %6202 = vmatpush3.bf16.msra.mxu0 %v6584_v11  ;;  %5963 = vmatprep.subr.bf16.mxu1 %v6839_v1  ;;  %v2374_v41 = vor.u32 %v2373_v36, %v2370_v35  ;;  %v2391_v44 = vshll.u32 %v2350_v30, 16  ;;  %v2396_v48 = vshrl.u32 %v5319_v29, 16  ;;  %v2399_v49 = vshll.u32 %v5319_v29, 16 }
  0x1a   : > { %6203 = vmatprep.subr.bf16.mxu0 %v6839_v1  ;;  %v2379_v47 = vrot.slane %v2377_v39, 7  ;;  %v2388_v52 = vor.u32 %v2387_v43, %v2384_v42  ;;  %v2405_v54 = vshll.u32 %v2358_v34, 16  ;;  %v2410_v57 = vshrl.u32 %v5320_v33, 16  ;;  %v6598_v39 = vld [vmem:[%s8054_s1 + $0x350] sm:$0xff]  }
  0x1b   : > { %v2375_v51 = vrot.slane %v2374_v41, 2  ;;  %v2393_v53 = vrot.slane %v2391_v44, 7  ;;  %v2398_v55 = vrot.slane %v2396_v48, 6  ;;  %v2401_v56 = vrot.slane %v2399_v49, 7  ;;  %v6600_v49 = vld [vmem:[%s8054_s1 + $0x358] sm:$0xff]  }
  0x1c   : > { %5964 = vmatpush3.bf16.msra.mxu1 %v6585_v12  ;;  %v2413_v58 = vshll.u32 %v5320_v33, 16  ;;  %v2389_v60 = vrot.slane %v2388_v52, 2  ;;  %v2407_v61 = vrot.slane %v2405_v54, 7  ;;  %v2419_v62 = vshll.u32 %v2366_v38, 16 }
  0x1d   : > { %6204 = vmatpush3.bf16.msra.mxu0 %v6586_v13  ;;  %5965 = vmatprep.subr.bf16.mxu1 %v6839_v1  ;;  %v6999_v63 = vsel %vm6989_vm7, %v2375_v51, %v2379_v47  ;;  %v2402_v0 = vor.u32 %v2401_v56, %v2398_v55  ;;  %v2412_v2 = vrot.slane %v2410_v57, 6  ;;  %v5349_v22 = vld.sshfl [vmem:[%s6934_s21 + $0x1c] sm:$0x13 pattern:$0x76325410]  ;;  %v6605_v55 = vld [vmem:[%s8054_s1 + $0x30] sm:$0xff]  }
  0x1e   : > { %6205 = vmatprep.subr.bf16.mxu0 %v6839_v1  ;;  %v2415_v3 = vrot.slane %v2413_v58, 7  ;;  %v7004_v4 = vsel %vm6989_vm7, %v2389_v60, %v2393_v53  ;;  %v2421_v8 = vrot.slane %v2419_v62, 7  ;;  %v5350_v23 = vld.sshfl [vmem:[%s6934_s21 + $0x20] sm:$0x13 pattern:$0x76325410]  ;;  %v2564_v24 = vcombine.high %v5349_v22, %v5349_v22 }
  0x1f   : > { %v2403_v6 = vrot.slane %v2402_v0, 2  ;;  %v2440_v9 = vcombine.low %v6999_v63, %v7004_v4  ;;  %v2590_v25 = vshrl.u32 %v5349_v22, 16  ;;  %v2593_v26 = vshll.u32 %v5349_v22, 16  ;;  %v6613_v22 = vld [vmem:[%s8054_s1 + $0x88] sm:$0xff]  }
  0x20   : > { %5966 = vmatpush3.bf16.msra.mxu1 %v6587_v19  ;;  %v2416_v7 = vor.u32 %v2415_v3, %v2412_v2  ;;  %v6599_v19 = vld [vmem:[%s8054_s1 + $0x18] sm:$0xff]   ;;  %v5351_v27 = vld.sshfl [vmem:[%s6934_s21 + $0x24] sm:$0x13 pattern:$0x76325410]  ;;  %v2572_v29 = vcombine.high %v5350_v23, %v5350_v23  ;;  %v2604_v30 = vshrl.u32 %v5350_v23, 16 }
  0x21   : > { %6206 = vmatpush3.bf16.msra.mxu0 %v6588_v20  ;;  %5967 = vmatprep.subr.bf16.mxu1 %v6839_v1  ;;  %v7015_v10 = vsel %vm6989_vm7, %v2403_v6, %v2407_v61  ;;  %v2448_v14 = vrot.slane %v2440_v9, %v6964_v28  ;;  %v6596_v20 = vld [vmem:[%s8054_s1 + $0x348] sm:$0xff]   ;;  %v2607_v31 = vshll.u32 %v5350_v23, 16  ;;  %v2580_v33 = vcombine.high %v5351_v27, %v5351_v27  ;;  %v6602_v2 = vld [vmem:[%s8054_s1 + $0x360] sm:$0xff]   ;;  %v6607_v9 = vld [vmem:[%s8054_s1 + $0x38] sm:$0xff]  }
  0x22   : > { %6207 = vmatprep.subr.bf16.mxu0 %v6839_v1  ;;  %v2417_v11 = vrot.slane %v2416_v7, 2  ;;  %v5352_v32 = vld.sshfl [vmem:[%s6934_s21 + $0x28] sm:$0x13 pattern:$0x76325410]  ;;  %v2592_v34 = vrot.slane %v2590_v25, 6 }
  0x23   : > { %v2595_v35 = vrot.slane %v2593_v26, 7  ;;  %v2599_v36 = vshll.u32 %v2564_v24, 16  ;;  %v2606_v37 = vrot.slane %v2604_v30, 6  ;;  %v2609_v38 = vrot.slane %v2607_v31, 7  ;;  %v6615_v30 = vld [vmem:[%s8054_s1 + $0x90] sm:$0xff]  }
  0x24   : > { %5968 = vmatpush3.bf16.msra.mxu1 %v6589_v40  ;;  %v2422_v12 = vsel %vm6989_vm7, %v2417_v11, %v2421_v8  ;;  %v6603_v40 = vld [vmem:[%s8054_s1 + $0x28] sm:$0xff]   ;;  %v2588_v41 = vcombine.high %v5352_v32, %v5352_v32  ;;  %v2618_v43 = vshrl.u32 %v5351_v27, 16  ;;  %v2621_v44 = vshll.u32 %v5351_v27, 16 }
  0x25   : > { %6208 = vmatpush3.bf16.msra.mxu0 %v6590_v45  ;;  %5973 = vmatprep.subr.bf16.mxu1 %v6839_v1  ;;  %v2441_v13 = vcombine.low %v7015_v10, %v2422_v12  ;;  %v2596_v42 = vor.u32 %v2595_v35, %v2592_v34  ;;  %v6797_v45 = vld.sshfl [vmem:[%s6934_s21] sm:$0xf pattern:$0x76325410]  ;;  %v2613_v47 = vshll.u32 %v2572_v29, 16  ;;  %v2632_v48 = vshrl.u32 %v5352_v32, 16 }
  0x26   : > { %6213 = vmatprep.subr.bf16.mxu0 %v6839_v1  ;;  %v2610_v51 = vor.u32 %v2609_v38, %v2606_v37  ;;  %v2620_v52 = vrot.slane %v2618_v43, 6  ;;  %v2623_v53 = vrot.slane %v2621_v44, 7  ;;  %v2627_v54 = vshll.u32 %v2580_v33, 16  ;;  %v6608_v29 = vld [vmem:[%s8054_s1 + $0x378] sm:$0xff]   ;;  %v6612_v35 = vld [vmem:[%s8054_s1 + $0x380] sm:$0xff]  }
  0x27   : > { %5970 = vmatmul.mubr.bf16.vlgmr.msra.gmra.mrb[0].mxu1 %v311_v46  ;;  %v2455_v16 = vrot.slane %v2441_v13, %v6964_v28  ;;  %v6798_v46 = vld.sshfl [vmem:[%s6934_s21 + $0x8] sm:$0xf pattern:$0x76325410]  ;;  %v2601_v56 = vrot.slane %v2599_v36, 7  ;;  %v2634_v57 = vrot.slane %v2632_v48, 6 }
  0x28   : > { %5974 = vmatpush3.bf16.msra.mxu1 %v6593_v59  ;;  %5989 = vmatprep.mubr.msk.bf16.mxu1 %vm6840_vm0, %v6839_v1  ;;  %v2635_v58 = vshll.u32 %v5352_v32, 16  ;;  %v2597_v59 = vrot.slane %v2596_v42, 2  ;;  %v2624_v60 = vor.u32 %v2623_v53, %v2620_v52  ;;  %v2641_v61 = vshll.u32 %v2588_v41, 16  ;;  %v6604_v13 = vld [vmem:[%s8054_s1 + $0x368] sm:$0xff]   ;;  %v6617_v36 = vld [vmem:[%s8054_s1 + $0x98] sm:$0xff]  }
  0x29   : > { %5975 = vmatprep.subr.bf16.mxu1 %v6839_v1  ;;  %v2456_v18 = vcombine.low %v2448_v14, %v2455_v16  ;;  %v2615_v62 = vrot.slane %v2613_v47, 7  ;;  %v2611_v3 = vrot.slane %v2610_v51, 2  ;;  %v422_v12 = vcombine.low %v6797_v45, %v6798_v46  ;;  %v5009_v23 = vld.sshfl [vmem:[%s6934_s21] sm:$0x13 pattern:$0x76325410] }
  0x2a   : > { %v2637_v0 = vrot.slane %v2635_v58, 7  ;;  %v2625_v7 = vrot.slane %v2624_v60, 2  ;;  %v2643_v8 = vrot.slane %v2641_v61, 7  ;;  %v7079_v14 = vsel %vm6989_vm7, %v2597_v59, %v2601_v56  ;;  %v6616_v47 = vld [vmem:[%s8054_s1 + $0x390] sm:$0xff]   ;;  %v6621_v48 = vld [vmem:[%s8054_s1 + $0xa8] sm:$0xff]  }
  0x2b   : > { %6210 = vmatmul.mubr.bf16.vlgmr.msra.gmra.mrb[0].mxu0 %v2456_v18  ;;  %v6611_v18 = vld [vmem:[%s8054_s1 + $0x80] sm:$0xff]   ;;  %v561_v24 = vshrl.u32 %v5009_v23, 16  ;;  %v564_v25 = vshll.u32 %v5009_v23, 16  ;;  %v528_v31 = vcombine.high %v5009_v23, %v5009_v23  ;;  %v634_v53 = vcombine.low %v7004_v4, %v7015_v10  ;;  %v6623_v58 = vld [vmem:[%s8054_s1 + $0xb0] sm:$0xff]  }
  0x2c   : > { %5976 = vmatpush3.bf16.msra.mxu1 %v6595_v5  ;;  %6214 = vmatpush3.bf16.msra.mxu0 %v6594_v17  ;;  %v2629_v5 = vrot.slane %v2627_v54, 7  ;;  %v2638_v6 = vor.u32 %v2637_v0, %v2634_v57  ;;  %v5381_v41 = vld.sshfl [vmem:[%s6934_s21 + $0x4] sm:$0x12 pattern:$0x76325410]  ;;  %v6618_v54 = vld [vmem:[%s8054_s1 + $0x398] sm:$0xff]  }
  0x2d   : > { %5977 = vmatprep.subr.bf16.mxu1 %v6839_v1  ;;  %6229 = vmatprep.mubr.msk.bf16.mxu0 %vm6840_vm0, %v6839_v1  ;;  %v563_v32 = vrot.slane %v561_v24, 6  ;;  %v566_v33 = vrot.slane %v564_v25, 7  ;;  %v570_v38 = vshll.u32 %v528_v31, 16  ;;  %v2786_v51 = vcombine.high %v5381_v41, %v5381_v41  ;;  %v6629_v25 = vld [vmem:[%s8054_s1 + $0xc8] sm:$0xff]  }
  0x2e   : > { %6215 = vmatprep.subr.bf16.mxu0 %v6839_v1  ;;  %v2639_v11 = vrot.slane %v2638_v6, 2  ;;  %v7087_v16 = vsel %vm6989_vm7, %v2625_v7, %v2629_v5  ;;  %v5382_v44 = vld.sshfl [vmem:[%s6934_s21 + $0x8] sm:$0x12 pattern:$0x76325410]  ;;  %v5385_v59 = vrot.slane %v5381_v41, 9 }
  0x2f   : > { %v567_v37 = vor.u32 %v566_v33, %v563_v32  ;;  %v572_v43 = vrot.slane %v570_v38, 7  ;;  %v5383_v45 = vld.sshfl [vmem:[%s6934_s21 + $0xc] sm:$0x12 pattern:$0x76325410]  ;;  %v2794_v52 = vcombine.high %v5382_v44, %v5382_v44  ;;  %v2813_v4 = vrot.slane %v2786_v51, 7 }
  0x30   : > { %5978 = vmatpush3.bf16.msra.mxu1 %v6597_v15  ;;  %6216 = vmatpush3.bf16.msra.mxu0 %v6596_v20  ;;  %v7083_v15 = vsel %vm6989_vm7, %v2611_v3, %v2615_v62  ;;  %v2644_v17 = vsel %vm6989_vm7, %v2639_v11, %v2643_v8  ;;  %v5384_v46 = vld.sshfl [vmem:[%s6934_s21 + $0x10] sm:$0x12 pattern:$0x76325410]  ;;  %v2802_v56 = vcombine.high %v5383_v45, %v5383_v45  ;;  %v5386_v10 = vrot.slane %v5382_v44, 9  ;;  %v6620_v62 = vld [vmem:[%s8054_s1 + $0x3a0] sm:$0xff]  }
  0x31   : > { %5979 = vmatprep.subr.bf16.mxu1 %v6839_v1  ;;  %6217 = vmatprep.subr.bf16.mxu0 %v6839_v1  ;;  %v2663_v20 = vcombine.low %v7087_v16, %v2644_v17  ;;  %v568_v42 = vrot.slane %v567_v37, 2  ;;  %v2810_v57 = vcombine.high %v5384_v46, %v5384_v46  ;;  %v2817_v60 = vrot.slane %v2794_v52, 7  ;;  %v6625_v7 = vld [vmem:[%s8054_s1 + $0xb8] sm:$0xff]   ;;  %v6622_v11 = vld [vmem:[%s8054_s1 + $0x3a8] sm:$0xff]   ;;  %v6631_v33 = vld [vmem:[%s8054_s1 + $0xd0] sm:$0xff]  }
  0x32   : > { %v5387_v61 = vrot.slane %v5383_v45, 9  ;;  %v2821_v3 = vrot.slane %v2802_v56, 7  ;;  %v5388_v5 = vrot.slane %v5384_v46, 9  ;;  %v7179_v8 = vsel %vm7168_vm14, %v5385_v59, %v2813_v4  ;;  %v6633_v38 = vld [vmem:[%s8054_s1 + $0xd8] sm:$0xff]   ;;  %v6637_v44 = vld [vmem:[%s8054_s1 + $0xe8] sm:$0xff]   ;;  %v6636_v51 = vld [vmem:[%s8054_s1 + $0x3e0] sm:$0xff]  }
  0x33   : > { %v2677_v27 = vrot.slane %v2663_v20, %v6964_v28  ;;  %v2825_v6 = vrot.slane %v2810_v57, 7  ;;  %v6624_v20 = vld [vmem:[%s8054_s1 + $0x3b0] sm:$0xff]   ;;  %v6634_v46 = vld [vmem:[%s8054_s1 + $0x3d8] sm:$0xff]   ;;  %v6638_v52 = vld [vmem:[%s8054_s1 + $0x3e8] sm:$0xff]  }
  0x34   : > { %5980 = vmatpush3.bf16.msra.mxu1 %v6599_v19  ;;  %6218 = vmatpush3.bf16.msra.mxu0 %v6598_v39  ;;  %v2662_v19 = vcombine.low %v7079_v14, %v7083_v15  ;;  %v6614_v39 = vld [vmem:[%s8054_s1 + $0x388] sm:$0xff]   ;;  %v7191_v17 = vsel %vm7168_vm14, %v5387_v61, %v2821_v3  ;;  %v6800_v56 = vld.sshfl [vmem:[%s6934_s21 + $0x3c] sm:$0xf pattern:$0x76325410]  ;;  %v6640_v57 = vld [vmem:[%s8054_s1 + $0x3f0] sm:$0xff]  }
  0x35   : > { %5981 = vmatprep.subr.bf16.mxu1 %v6839_v1  ;;  %6219 = vmatprep.subr.bf16.mxu0 %v6839_v1  ;;  %v6642_v59 = vld [vmem:[%s8054_s1 + $0x3f8] sm:$0xff]   ;;  %v6649_v4 = vld [vmem:[%s8054_s1 + $0x110] sm:$0xff]   ;;  %v6646_v61 = vld [vmem:[%s8054_s1 + $0x400] sm:$0xff]  }
  0x36   : > { %v2670_v26 = vrot.slane %v2662_v19, %v6964_v28  ;;  %v6627_v19 = vld [vmem:[%s8054_s1 + $0xc0] sm:$0xff]  }
  0x37   : > { %v6653_v3 = vld [vmem:[%s8054_s1 + $0x120] sm:$0xff]  }
  0x38   : > { %5982 = vmatpush3.bf16.msra.mxu1 %v6601_v21  ;;  %6220 = vmatpush3.bf16.msra.mxu0 %v6600_v49  ;;  %v6606_v21 = vld [vmem:[%s8054_s1 + $0x370] sm:$0xff]   ;;  %v2678_v34 = vcombine.low %v2670_v26, %v2677_v27  ;;  %v573_v49 = vsel %vm6989_vm7, %v568_v42, %v572_v43  ;;  %v6626_v26 = vld [vmem:[%s8054_s1 + $0x3b8] sm:$0xff]  }
  0x39   : > { %5983 = vmatprep.subr.bf16.mxu1 %v6839_v1  ;;  %6221 = vmatprep.subr.bf16.mxu0 %v6839_v1  ;;  %v6632_v43 = vld [vmem:[%s8054_s1 + $0x3d0] sm:$0xff]  }
  0x3c   : > { %5984 = vmatpush3.bf16.msra.mxu1 %v6603_v40  ;;  %6222 = vmatpush3.bf16.msra.mxu0 %v6602_v2  ;;  %v6619_v40 = vld [vmem:[%s8054_s1 + $0xa0] sm:$0xff]   ;;  %v6794_v2 = vld [vmem:[%s8054_s1 + $0x638] sm:$0xff]  }
  0x3d   : > { %5985 = vmatprep.subr.bf16.mxu1 %v6839_v1  ;;  %6223 = vmatprep.subr.bf16.mxu0 %v6839_v1 }
  0x40   : > { %5986 = vmatpush3.bf16.msra.mxu1 %v6605_v55  ;;  %6224 = vmatpush3.bf16.msra.mxu0 %v6604_v13  ;;  %v633_v55 = vcombine.low %v573_v49, %v6999_v63  ;;  %v648_v63 = vrot.slane %v634_v53, %v6964_v28  ;;  %v7187_v13 = vsel %vm7168_vm14, %v5386_v10, %v2817_v60  ;;  %v6639_v49 = vld [vmem:[%s8054_s1 + $0xf0] sm:$0xff]   ;;  %v5069_v10 = vld.sshfl [vmem:[%s6934_s21] sm:$0x12 pattern:$0x76325410] }
  0x41   : > { %5987 = vmatprep.subr.bf16.mxu1 %v6839_v1  ;;  %6225 = vmatprep.subr.bf16.mxu0 %v6839_v1 }
  0x42   : > { %v641_v0 = vrot.slane %v633_v55, %v6964_v28  ;;  %v6799_v55 = vld.sshfl [vmem:[%s6934_s21 + $0x34] sm:$0xf pattern:$0x76325410] }
  0x43   : > { %v2997_v60 = vcombine.low %v6799_v55, %v6800_v56  ;;  %v6668_v56 = vld [vmem:[%s8054_s1 + $0x450] sm:$0xff]  }
  0x44   : > { %5988 = vmatpush3.bf16.msra.mxu1 %v6607_v9  ;;  %6226 = vmatpush3.bf16.msra.mxu0 %v6606_v21  ;;  %v5041_v9 = vld.sshfl [vmem:[%s6934_s21 + $0x18] sm:$0x13 pattern:$0x76325410]  ;;  %v2844_v21 = vcombine.low %v7179_v8, %v7187_v13 }
  0x45   : > { %5993 = vmatprep.subr.bf16.mxu1 %v6839_v1  ;;  %6227 = vmatprep.subr.bf16.mxu0 %v6839_v1  ;;  %v783_v23 = vshrl.u32 %v5041_v9, 16  ;;  %v786_v24 = vshll.u32 %v5041_v9, 16 }
  0x46   : > { %v2852_v27 = vrot.slane %v2844_v21, %v6964_v28  ;;  %v6654_v21 = vld [vmem:[%s8054_s1 + $0x420] sm:$0xff]  }
  0x47   : > { %5990 = vmatmul.mubr.bf16.vlgmr.msra.gmra.mrb[0].mxu1 %v422_v12  ;;  %v649_v12 = vcombine.low %v641_v0, %v648_v63  ;;  %v785_v31 = vrot.slane %v783_v23, 6  ;;  %v788_v32 = vrot.slane %v786_v24, 7  ;;  %v6651_v63 = vld [vmem:[%s8054_s1 + $0x118] sm:$0xff]   ;;  %v6648_v0 = vld [vmem:[%s8054_s1 + $0x408] sm:$0xff]   ;;  %v6661_v24 = vld [vmem:[%s8054_s1 + $0x140] sm:$0xff]  }
  0x48   : > { %5994 = vmatpush3.bf16.msra.mxu1 %v6611_v18  ;;  %6009 = vmatprep.mubr.msk.bf16.mxu1 %vm6840_vm0, %v6839_v1  ;;  %v2826_v18 = vsel %vm7168_vm14, %v5388_v5, %v2825_v6  ;;  %v5073_v5 = vrot.slane %v5069_v10, 9 }
  0x49   : > { %5995 = vmatprep.subr.bf16.mxu1 %v6839_v1  ;;  %6228 = vmatpush3.bf16.msra.mxu0 %v6608_v29 }
  0x4a   : > { %6233 = vmatprep.subr.bf16.mxu0 %v6839_v1 }
  0x4c   : > { %5996 = vmatpush3.bf16.msra.mxu1 %v6613_v22  ;;  %6230 = vmatmul.mubr.bf16.vlgmr.msra.gmra.mrb[0].mxu0 %v2678_v34  ;;  %v2845_v22 = vcombine.low %v7191_v17, %v2826_v18 }
  0x4d   : > { %5997 = vmatprep.subr.bf16.mxu1 %v6839_v1  ;;  %6234 = vmatpush3.bf16.msra.mxu0 %v6612_v35  ;;  %v6628_v35 = vld [vmem:[%s8054_s1 + $0x3c0] sm:$0xff]  }
  0x4e   : > { %6249 = vmatprep.mubr.msk.bf16.mxu0 %vm6840_vm0, %v6839_v1  ;;  %6235 = vmatprep.subr.bf16.mxu0 %v6839_v1  ;;  %v2859_v29 = vrot.slane %v2845_v22, %v6964_v28  ;;  %v6656_v22 = vld [vmem:[%s8054_s1 + $0x428] sm:$0xff]  }
  0x50   : > { %5998 = vmatpush3.bf16.msra.mxu1 %v6615_v30  ;;  %v757_v30 = vcombine.high %v5041_v9, %v5041_v9  ;;  %v2860_v34 = vcombine.low %v2852_v27, %v2859_v29  ;;  %v6655_v9 = vld [vmem:[%s8054_s1 + $0x128] sm:$0xff]   ;;  %v6658_v27 = vld [vmem:[%s8054_s1 + $0x430] sm:$0xff]  }
  0x51   : > { %5999 = vmatprep.subr.bf16.mxu1 %v6839_v1  ;;  %6236 = vmatpush3.bf16.msra.mxu0 %v6614_v39  ;;  %v6630_v39 = vld [vmem:[%s8054_s1 + $0x3c8] sm:$0xff]  }
  0x52   : > { %6237 = vmatprep.subr.bf16.mxu0 %v6839_v1  ;;  %v792_v37 = vshll.u32 %v757_v30, 16  ;;  %v6665_v29 = vld [vmem:[%s8054_s1 + $0x148] sm:$0xff]   ;;  %v6660_v30 = vld [vmem:[%s8054_s1 + $0x438] sm:$0xff]  }
  0x54   : > { %6000 = vmatpush3.bf16.msra.mxu1 %v6617_v36  ;;  %v789_v36 = vor.u32 %v788_v32, %v785_v31  ;;  %v794_v42 = vrot.slane %v792_v37, 7  ;;  %v5473_v31 = vld.sshfl [vmem:[%s6934_s21 + $0x34] sm:$0x13 pattern:$0x76325410] }
  0x55   : > { %6001 = vmatprep.subr.bf16.mxu1 %v6839_v1  ;;  %6238 = vmatpush3.bf16.msra.mxu0 %v6616_v47  ;;  %v6667_v32 = vld [vmem:[%s8054_s1 + $0x150] sm:$0xff]   ;;  %v5476_v37 = vld.sshfl [vmem:[%s6934_s21 + $0x40] sm:$0x13 pattern:$0x76325410] }
  0x56   : > { %6239 = vmatprep.subr.bf16.mxu0 %v6839_v1  ;;  %v790_v41 = vrot.slane %v789_v36, 2  ;;  %v6664_v36 = vld [vmem:[%s8054_s1 + $0x440] sm:$0xff]  }
  0x58   : > { %6002 = vmatpush3.bf16.msra.mxu1 %v6619_v40  ;;  %v6635_v40 = vld [vmem:[%s8054_s1 + $0xe0] sm:$0xff]   ;;  %v795_v45 = vsel %vm6989_vm7, %v790_v41, %v794_v42 }
  0x59   : > { %6003 = vmatprep.subr.bf16.mxu1 %v6839_v1  ;;  %6240 = vmatpush3.bf16.msra.mxu0 %v6618_v54  ;;  %v855_v47 = vcombine.low %v795_v45, %v7079_v14  ;;  %v6643_v54 = vld [vmem:[%s8054_s1 + $0x100] sm:$0xff]   ;;  %v6666_v45 = vld [vmem:[%s8054_s1 + $0x448] sm:$0xff]  }
  0x5a   : > { %6241 = vmatprep.subr.bf16.mxu0 %v6839_v1 }
  0x5b   : > { %v863_v14 = vrot.slane %v855_v47, %v6964_v28  ;;  %v3313_v47 = vshll.u32 %v5476_v37, 16 }
  0x5c   : > { %6004 = vmatpush3.bf16.msra.mxu1 %v6621_v48  ;;  %v856_v48 = vcombine.low %v7083_v15, %v7087_v16  ;;  %v6641_v16 = vld [vmem:[%s8054_s1 + $0xf8] sm:$0xff]  }
  0x5d   : > { %6005 = vmatprep.subr.bf16.mxu1 %v6839_v1  ;;  %6242 = vmatpush3.bf16.msra.mxu0 %v6620_v62  ;;  %v979_v62 = vcombine.high %v5069_v10, %v5069_v10  ;;  %v6803_v10 = vld.sshfl [vmem:[%s6934_s21 + $0x30] sm:$0xf pattern:$0x76325410] }
  0x5e   : > { %6243 = vmatprep.subr.bf16.mxu0 %v6839_v1  ;;  %v870_v15 = vrot.slane %v856_v48, %v6964_v28  ;;  %v6671_v48 = vld [vmem:[%s8054_s1 + $0x160] sm:$0xff]  }
  0x5f   : > { %v1013_v6 = vrot.slane %v979_v62, 7 }
  0x60   : > { %6006 = vmatpush3.bf16.msra.mxu1 %v6623_v58  ;;  %v871_v53 = vcombine.low %v863_v14, %v870_v15  ;;  %v6647_v58 = vld [vmem:[%s8054_s1 + $0x108] sm:$0xff]  }
  0x61   : > { %6007 = vmatprep.subr.bf16.mxu1 %v6839_v1  ;;  %6244 = vmatpush3.bf16.msra.mxu0 %v6622_v11  ;;  %v1014_v11 = vsel %vm7168_vm14, %v5073_v5, %v1013_v6 }
  0x62   : > { %6245 = vmatprep.subr.bf16.mxu0 %v6839_v1  ;;  %v1044_v18 = vcombine.low %v1014_v11, %v7179_v8 }
  0x64   : > { %6008 = vmatpush3.bf16.msra.mxu1 %v6625_v7  ;;  %v6650_v7 = vld [vmem:[%s8054_s1 + $0x410] sm:$0xff]   ;;  %v1052_v8 = vrot.slane %v1044_v18, %v6964_v28 }
  0x65   : > { %6013 = vmatprep.subr.bf16.mxu1 %v6839_v1  ;;  %6246 = vmatpush3.bf16.msra.mxu0 %v6624_v20  ;;  %v6657_v20 = vld [vmem:[%s8054_s1 + $0x130] sm:$0xff]  }
  0x66   : > { %6247 = vmatprep.subr.bf16.mxu0 %v6839_v1 }
  0x67   : > { %6010 = vmatmul.mubr.bf16.vlgmr.msra.gmra.mrb[0].mxu1 %v649_v12  ;;  %v6652_v12 = vld [vmem:[%s8054_s1 + $0x418] sm:$0xff]  }
  0x68   : > { %6014 = vmatpush3.bf16.msra.mxu1 %v6627_v19  ;;  %6029 = vmatprep.mubr.msk.bf16.mxu1 %vm6840_vm0, %v6839_v1  ;;  %v1045_v19 = vcombine.low %v7187_v13, %v7191_v17  ;;  %v6659_v17 = vld [vmem:[%s8054_s1 + $0x138] sm:$0xff]  }
  0x69   : > { %6015 = vmatprep.subr.bf16.mxu1 %v6839_v1  ;;  %6248 = vmatpush3.bf16.msra.mxu0 %v6626_v26  ;;  %v6802_v26 = vld.sshfl [vmem:[%s6934_s21 + $0x54] sm:$0xf pattern:$0x76325410] }
  0x6a   : > { %6253 = vmatprep.subr.bf16.mxu0 %v6839_v1  ;;  %v1059_v13 = vrot.slane %v1045_v19, %v6964_v28  ;;  %v6672_v19 = vld [vmem:[%s8054_s1 + $0x460] sm:$0xff]  }
  0x6c   : > { %6016 = vmatpush3.bf16.msra.mxu1 %v6629_v25  ;;  %6250 = vmatmul.mubr.bf16.vlgmr.msra.gmra.mrb[0].mxu0 %v2860_v34  ;;  %v1060_v23 = vcombine.low %v1052_v8, %v1059_v13  ;;  %v6801_v25 = vld.sshfl [vmem:[%s6934_s21 + $0x4c] sm:$0xf pattern:$0x76325410] }
  0x6d   : > { %6017 = vmatprep.subr.bf16.mxu1 %v6839_v1  ;;  %6254 = vmatpush3.bf16.msra.mxu0 %v6628_v35  ;;  %v5475_v34 = vld.sshfl [vmem:[%s6934_s21 + $0x3c] sm:$0x13 pattern:$0x76325410]  ;;  %v3134_v35 = vcombine.low %v6801_v25, %v6802_v26  ;;  %v6674_v25 = vld [vmem:[%s8054_s1 + $0x468] sm:$0xff]  }
  0x6e   : > { %6269 = vmatprep.mubr.msk.bf16.mxu0 %vm6840_vm0, %v6839_v1  ;;  %6255 = vmatprep.subr.bf16.mxu0 %v6839_v1 }
  0x70   : > { %6018 = vmatpush3.bf16.msra.mxu1 %v6631_v33  ;;  %v5474_v33 = vld.sshfl [vmem:[%s6934_s21 + $0x38] sm:$0x13 pattern:$0x76325410] }
  0x71   : > { %6019 = vmatprep.subr.bf16.mxu1 %v6839_v1  ;;  %6256 = vmatpush3.bf16.msra.mxu0 %v6630_v39  ;;  %v3268_v39 = vshrl.u32 %v5473_v31, 16  ;;  %v3282_v41 = vshrl.u32 %v5474_v33, 16  ;;  %v3285_v42 = vshll.u32 %v5474_v33, 16  ;;  %v3250_v15 = vcombine.high %v5474_v33, %v5474_v33 }
  0x72   : > { %6257 = vmatprep.subr.bf16.mxu0 %v6839_v1 }
  0x74   : > { %6020 = vmatpush3.bf16.msra.mxu1 %v6633_v38  ;;  %v6669_v38 = vld [vmem:[%s8054_s1 + $0x158] sm:$0xff]  }
  0x75   : > { %6021 = vmatprep.subr.bf16.mxu1 %v6839_v1  ;;  %6258 = vmatpush3.bf16.msra.mxu0 %v6632_v43  ;;  %v3296_v43 = vshrl.u32 %v5475_v34, 16 }
  0x76   : > { %6259 = vmatprep.subr.bf16.mxu0 %v6839_v1 }
  0x78   : > { %6022 = vmatpush3.bf16.msra.mxu1 %v6635_v40  ;;  %v3271_v40 = vshll.u32 %v5473_v31, 16 }
  0x79   : > { %6023 = vmatprep.subr.bf16.mxu1 %v6839_v1  ;;  %6260 = vmatpush3.bf16.msra.mxu0 %v6634_v46  ;;  %v3310_v46 = vshrl.u32 %v5476_v37, 16 }
  0x7a   : > { %6261 = vmatprep.subr.bf16.mxu0 %v6839_v1  ;;  %v3273_v14 = vrot.slane %v3271_v40, 7  ;;  %v5506_v40 = vld.sshfl [vmem:[%s6934_s21 + $0x50] sm:$0x13 pattern:$0x76325410] }
  0x7c   : > { %6024 = vmatpush3.bf16.msra.mxu1 %v6637_v44  ;;  %v3299_v44 = vshll.u32 %v5475_v34, 16 }
  0x7d   : > { %6025 = vmatprep.subr.bf16.mxu1 %v6839_v1  ;;  %6262 = vmatpush3.bf16.msra.mxu0 %v6636_v51  ;;  %v3270_v51 = vrot.slane %v3268_v39, 6  ;;  %v6678_v39 = vld [vmem:[%s8054_s1 + $0x478] sm:$0xff]  }
  0x7e   : > { %6263 = vmatprep.subr.bf16.mxu0 %v6839_v1  ;;  %v3301_v55 = vrot.slane %v3299_v44, 7 }
  0x80   : > { %6026 = vmatpush3.bf16.msra.mxu1 %v6639_v49  ;;  %v3242_v49 = vcombine.high %v5473_v31, %v5473_v31  ;;  %v6681_v31 = vld [vmem:[%s8054_s1 + $0x180] sm:$0xff]  }
  0x81   : > { %6027 = vmatprep.subr.bf16.mxu1 %v6839_v1  ;;  %6264 = vmatpush3.bf16.msra.mxu0 %v6638_v52  ;;  %v3287_v52 = vrot.slane %v3285_v42, 7  ;;  %v5507_v42 = vld.sshfl [vmem:[%s6934_s21 + $0x54] sm:$0x13 pattern:$0x76325410] }
  0x82   : > { %6265 = vmatprep.subr.bf16.mxu0 %v6839_v1 }
  0x84   : > { %6028 = vmatpush3.bf16.msra.mxu1 %v6641_v16  ;;  %v3284_v16 = vrot.slane %v3282_v41, 6  ;;  %v6685_v41 = vld [vmem:[%s8054_s1 + $0x190] sm:$0xff]  }
  0x85   : > { %6033 = vmatprep.subr.bf16.mxu1 %v6839_v1  ;;  %6266 = vmatpush3.bf16.msra.mxu0 %v6640_v57  ;;  %v3266_v57 = vcombine.high %v5476_v37, %v5476_v37 }
  0x86   : > { %6267 = vmatprep.subr.bf16.mxu0 %v6839_v1  ;;  %v3288_v62 = vor.u32 %v3287_v52, %v3284_v16  ;;  %v3521_v16 = vshll.u32 %v5507_v42, 16  ;;  %v6689_v52 = vld [vmem:[%s8054_s1 + $0x1a0] sm:$0xff]  }
  0x87   : > { %6030 = vmatmul.mubr.bf16.vlgmr.msra.gmra.mrb[0].mxu1 %v871_v53  ;;  %v3258_v53 = vcombine.high %v5475_v34, %v5475_v34  ;;  %v3319_v11 = vshll.u32 %v3266_v57, 16  ;;  %v6676_v34 = vld [vmem:[%s8054_s1 + $0x470] sm:$0xff]  }
  0x88   : > { %6034 = vmatpush3.bf16.msra.mxu1 %v6643_v54  ;;  %6049 = vmatprep.mubr.msk.bf16.mxu1 %vm6840_vm0, %v6839_v1  ;;  %v3298_v54 = vrot.slane %v3296_v43, 6  ;;  %v6682_v43 = vld [vmem:[%s8054_s1 + $0x480] sm:$0xff]  }
  0x89   : > { %6035 = vmatprep.subr.bf16.mxu1 %v6839_v1  ;;  %6268 = vmatpush3.bf16.msra.mxu0 %v6642_v59  ;;  %v3315_v59 = vrot.slane %v3313_v47, 7  ;;  %v3305_v6 = vshll.u32 %v3258_v53, 16 }
  0x8a   : > { %6273 = vmatprep.subr.bf16.mxu0 %v6839_v1  ;;  %v3302_v5 = vor.u32 %v3301_v55, %v3298_v54 }
  0x8b   : > { %v3307_v13 = vrot.slane %v3305_v6, 7 }
  0x8c   : > { %6036 = vmatpush3.bf16.msra.mxu1 %v6647_v58  ;;  %6270 = vmatmul.mubr.bf16.vlgmr.msra.gmra.mrb[0].mxu0 %v2997_v60  ;;  %v3312_v58 = vrot.slane %v3310_v46, 6  ;;  %v6804_v60 = vld.sshfl [vmem:[%s6934_s21 + $0x38] sm:$0xf pattern:$0x76325410]  ;;  %v3303_v8 = vrot.slane %v3302_v5, 2 }
  0x8d   : > { %6037 = vmatprep.subr.bf16.mxu1 %v6839_v1  ;;  %6274 = vmatpush3.bf16.msra.mxu0 %v6646_v61  ;;  %v3274_v61 = vor.u32 %v3273_v14, %v3270_v51  ;;  %v3507_v51 = vshll.u32 %v5506_v40, 16  ;;  %v6684_v14 = vld [vmem:[%s8054_s1 + $0x488] sm:$0xff]  }
  0x8e   : > { %6289 = vmatprep.mubr.msk.bf16.mxu0 %vm6840_vm0, %v6839_v1  ;;  %6275 = vmatprep.subr.bf16.mxu0 %v6839_v1  ;;  %v6691_v5 = vld [vmem:[%s8054_s1 + $0x1a8] sm:$0xff]  }
  0x90   : > { %6038 = vmatpush3.bf16.msra.mxu1 %v6649_v4  ;;  %v6673_v4 = vld [vmem:[%s8054_s1 + $0x168] sm:$0xff]  }
  0x91   : > { %6039 = vmatprep.subr.bf16.mxu1 %v6839_v1  ;;  %6276 = vmatpush3.bf16.msra.mxu0 %v6648_v0  ;;  %v3291_v0 = vshll.u32 %v3250_v15, 16  ;;  %v3518_v15 = vshrl.u32 %v5507_v42, 16 }
  0x92   : > { %6277 = vmatprep.subr.bf16.mxu0 %v6839_v1 }
  0x94   : > { %6040 = vmatpush3.bf16.msra.mxu1 %v6651_v63  ;;  %v3277_v63 = vshll.u32 %v3242_v49, 16  ;;  %v3504_v49 = vshrl.u32 %v5506_v40, 16 }
  0x95   : > { %6041 = vmatprep.subr.bf16.mxu1 %v6839_v1  ;;  %6278 = vmatpush3.bf16.msra.mxu0 %v6650_v7  ;;  %v6675_v7 = vld [vmem:[%s8054_s1 + $0x170] sm:$0xff]  }
  0x96   : > { %6279 = vmatprep.subr.bf16.mxu0 %v6839_v1  ;;  %v3279_v18 = vrot.slane %v3277_v63, 7  ;;  %v6686_v63 = vld [vmem:[%s8054_s1 + $0x490] sm:$0xff]  }
  0x98   : > { %6042 = vmatpush3.bf16.msra.mxu1 %v6653_v3  ;;  %v6670_v3 = vld [vmem:[%s8054_s1 + $0x458] sm:$0xff]  }
  0x99   : > { %6043 = vmatprep.subr.bf16.mxu1 %v6839_v1  ;;  %6280 = vmatpush3.bf16.msra.mxu0 %v6652_v12  ;;  %v3275_v12 = vrot.slane %v3274_v61, 2  ;;  %v3523_v61 = vrot.slane %v3521_v16, 7  ;;  %v6703_v16 = vld [vmem:[%s8054_s1 + $0x1d0] sm:$0xff]  }
  0x9a   : > { %6281 = vmatprep.subr.bf16.mxu0 %v6839_v1 }
  0x9b   : > { %v7431_v26 = vsel %vm6989_vm7, %v3275_v12, %v3279_v18 }
  0x9c   : > { %6044 = vmatpush3.bf16.msra.mxu1 %v6655_v9  ;;  %v3316_v9 = vor.u32 %v3315_v59, %v3312_v58  ;;  %v3506_v58 = vrot.slane %v3504_v49, 6  ;;  %v3509_v59 = vrot.slane %v3507_v51, 7  ;;  %v6696_v51 = vld [vmem:[%s8054_s1 + $0x4b8] sm:$0xff]  }
  0x9d   : > { %6045 = vmatprep.subr.bf16.mxu1 %v6839_v1  ;;  %6282 = vmatpush3.bf16.msra.mxu0 %v6654_v21  ;;  %v3293_v21 = vrot.slane %v3291_v0, 7 }
  0x9e   : > { %6283 = vmatprep.subr.bf16.mxu0 %v6839_v1 }
  0xa0   : > { %6046 = vmatpush3.bf16.msra.mxu1 %v6657_v20  ;;  %v3289_v20 = vrot.slane %v3288_v62, 2 }
  0xa1   : > { %6047 = vmatprep.subr.bf16.mxu1 %v6839_v1  ;;  %6284 = vmatpush3.bf16.msra.mxu0 %v6656_v22  ;;  %v3321_v22 = vrot.slane %v3319_v11, 7  ;;  %v3510_v11 = vor.u32 %v3509_v59, %v3506_v58 }
  0xa2   : > { %6285 = vmatprep.subr.bf16.mxu0 %v6839_v1 }
  0xa4   : > { %6048 = vmatpush3.bf16.msra.mxu1 %v6659_v17  ;;  %v3317_v17 = vrot.slane %v3316_v9, 2  ;;  %v6688_v9 = vld [vmem:[%s8054_s1 + $0x498] sm:$0xff]  }
  0xa5   : > { %6053 = vmatprep.subr.bf16.mxu1 %v6839_v1  ;;  %6286 = vmatpush3.bf16.msra.mxu0 %v6658_v27  ;;  %v7435_v27 = vsel %vm6989_vm7, %v3289_v20, %v3293_v21  ;;  %v6805_v20 = vld.sshfl [vmem:[%s6934_s21 + $0x48] sm:$0xf pattern:$0x76325410] }
  0xa6   : > { %6287 = vmatprep.subr.bf16.mxu0 %v6839_v1  ;;  %v6806_v21 = vld.sshfl [vmem:[%s6934_s21 + $0x50] sm:$0xf pattern:$0x76325410] }
  0xa7   : > { %6050 = vmatmul.mubr.bf16.vlgmr.msra.gmra.mrb[0].mxu1 %v1060_v23  ;;  %v6677_v23 = vld [vmem:[%s8054_s1 + $0x178] sm:$0xff]  }
  0xa8   : > { %6054 = vmatpush3.bf16.msra.mxu1 %v6661_v24  ;;  %6069 = vmatprep.mubr.msk.bf16.mxu1 %vm6840_vm0, %v6839_v1  ;;  %v1197_v24 = vcombine.low %v6803_v10, %v6804_v60  ;;  %v3480_v10 = vcombine.high %v5507_v42, %v5507_v42  ;;  %v3520_v60 = vrot.slane %v3518_v15, 6  ;;  %v5161_v42 = vld.sshfl [vmem:[%s6934_s21 + $0x30] sm:$0x13 pattern:$0x76325410] }
  0xa9   : > { %6055 = vmatprep.subr.bf16.mxu1 %v6839_v1  ;;  %6288 = vmatpush3.bf16.msra.mxu0 %v6660_v30  ;;  %v3322_v30 = vsel %vm6989_vm7, %v3317_v17, %v3321_v22  ;;  %v1471_v49 = vshll.u32 %v5161_v42, 16 }
  0xaa   : > { %6293 = vmatprep.subr.bf16.mxu0 %v6839_v1  ;;  %v3524_v18 = vor.u32 %v3523_v61, %v3520_v60  ;;  %v5538_v60 = vld.sshfl [vmem:[%s6934_s21 + $0x38] sm:$0x12 pattern:$0x76325410] }
  0xab   : > { %v5539_v61 = vld.sshfl [vmem:[%s6934_s21 + $0x3c] sm:$0x12 pattern:$0x76325410] }
  0xac   : > { %6056 = vmatpush3.bf16.msra.mxu1 %v6665_v29  ;;  %6290 = vmatmul.mubr.bf16.vlgmr.msra.gmra.mrb[0].mxu0 %v3134_v35  ;;  %v7439_v29 = vsel %vm6989_vm7, %v3303_v8, %v3307_v13  ;;  %v6683_v35 = vld [vmem:[%s8054_s1 + $0x188] sm:$0xff]   ;;  %v6693_v8 = vld [vmem:[%s8054_s1 + $0x1b0] sm:$0xff]  }
  0xad   : > { %6057 = vmatprep.subr.bf16.mxu1 %v6839_v1  ;;  %6294 = vmatpush3.bf16.msra.mxu0 %v6664_v36  ;;  %v3341_v33 = vcombine.low %v7439_v29, %v3322_v30 }
  0xae   : > { %6309 = vmatprep.mubr.msk.bf16.mxu0 %vm6840_vm0, %v6839_v1  ;;  %6295 = vmatprep.subr.bf16.mxu0 %v6839_v1 }
  0xaf   : > { %v3355_v37 = vrot.slane %v3341_v33, %v6964_v28 }
  0xb0   : > { %6058 = vmatpush3.bf16.msra.mxu1 %v6667_v32  ;;  %v3340_v32 = vcombine.low %v7431_v26, %v7435_v27 }
  0xb1   : > { %6059 = vmatprep.subr.bf16.mxu1 %v6839_v1  ;;  %6296 = vmatpush3.bf16.msra.mxu0 %v6666_v45  ;;  %v5508_v45 = vld.sshfl [vmem:[%s6934_s21 + $0x58] sm:$0x13 pattern:$0x76325410] }
  0xb2   : > { %6297 = vmatprep.subr.bf16.mxu0 %v6839_v1  ;;  %v3348_v36 = vrot.slane %v3340_v32, %v6964_v28  ;;  %v3532_v55 = vshrl.u32 %v5508_v45, 16  ;;  %v3488_v62 = vcombine.high %v5508_v45, %v5508_v45 }
  0xb4   : > { %6060 = vmatpush3.bf16.msra.mxu1 %v6669_v38  ;;  %v5505_v38 = vld.sshfl [vmem:[%s6934_s21 + $0x4c] sm:$0x13 pattern:$0x76325410]  ;;  %v3356_v44 = vcombine.low %v3348_v36, %v3355_v37  ;;  %v3534_v0 = vrot.slane %v3532_v55, 6  ;;  %v3541_v17 = vshll.u32 %v3488_v62, 16  ;;  %v1334_v36 = vcombine.low %v6805_v20, %v6806_v21 }
  0xb5   : > { %6061 = vmatprep.subr.bf16.mxu1 %v6839_v1  ;;  %6298 = vmatpush3.bf16.msra.mxu0 %v6668_v56  ;;  %v3490_v46 = vshrl.u32 %v5505_v38, 16  ;;  %v3493_v47 = vshll.u32 %v5505_v38, 16  ;;  %v3535_v56 = vshll.u32 %v5508_v45, 16  ;;  %v3464_v57 = vcombine.high %v5505_v38, %v5505_v38  ;;  %v6692_v37 = vld [vmem:[%s8054_s1 + $0x4a8] sm:$0xff]   ;;  %v6711_v20 = vld [vmem:[%s8054_s1 + $0x1f0] sm:$0xff]  }
  0xb6   : > { %6299 = vmatprep.subr.bf16.mxu0 %v6839_v1 }
  0xb7   : > { %v3492_v53 = vrot.slane %v3490_v46, 6  ;;  %v3495_v54 = vrot.slane %v3493_v47, 7  ;;  %v6701_v47 = vld [vmem:[%s8054_s1 + $0x1c8] sm:$0xff]  }
  0xb8   : > { %6062 = vmatpush3.bf16.msra.mxu1 %v6671_v48  ;;  %v6687_v48 = vld [vmem:[%s8054_s1 + $0x198] sm:$0xff]  }
  0xb9   : > { %6063 = vmatprep.subr.bf16.mxu1 %v6839_v1  ;;  %6300 = vmatpush3.bf16.msra.mxu0 %v6670_v3  ;;  %v3537_v3 = vrot.slane %v3535_v56, 7  ;;  %v3496_v6 = vor.u32 %v3495_v54, %v3492_v53  ;;  %v1473_v54 = vrot.slane %v1471_v49, 7  ;;  %v6700_v56 = vld [vmem:[%s8054_s1 + $0x4c0] sm:$0xff]  }
  0xba   : > { %6301 = vmatprep.subr.bf16.mxu0 %v6839_v1 }
  0xbb   : > { %v3538_v13 = vor.u32 %v3537_v3, %v3534_v0  ;;  %v3497_v22 = vrot.slane %v3496_v6, 2  ;;  %v5540_v3 = vld.sshfl [vmem:[%s6934_s21 + $0x40] sm:$0x12 pattern:$0x76325410]  ;;  %v6704_v6 = vld [vmem:[%s8054_s1 + $0x4d0] sm:$0xff]  }
  0xbc   : > { %6064 = vmatpush3.bf16.msra.mxu1 %v6673_v4  ;;  %v3472_v4 = vcombine.high %v5506_v40, %v5506_v40 }
  0xbd   : > { %6065 = vmatprep.subr.bf16.mxu1 %v6839_v1  ;;  %6302 = vmatpush3.bf16.msra.mxu0 %v6672_v19  ;;  %v3527_v19 = vshll.u32 %v3480_v10, 16  ;;  %v3539_v33 = vrot.slane %v3538_v13, 2  ;;  %v6702_v10 = vld [vmem:[%s8054_s1 + $0x4c8] sm:$0xff]   ;;  %v5542_v13 = vrot.slane %v5538_v60, 9 }
  0xbe   : > { %6303 = vmatprep.subr.bf16.mxu0 %v6839_v1  ;;  %v3513_v12 = vshll.u32 %v3472_v4, 16  ;;  %v5537_v4 = vld.sshfl [vmem:[%s6934_s21 + $0x34] sm:$0x12 pattern:$0x76325410] }
  0xbf   : > { %v3529_v32 = vrot.slane %v3527_v19, 7  ;;  %v6706_v19 = vld [vmem:[%s8054_s1 + $0x4d8] sm:$0xff]   ;;  %v5541_v21 = vrot.slane %v5537_v4, 9 }
  0xc0   : > { %6066 = vmatpush3.bf16.msra.mxu1 %v6675_v7  ;;  %v3499_v7 = vshll.u32 %v3464_v57, 16  ;;  %v3515_v30 = vrot.slane %v3513_v12, 7  ;;  %v6705_v57 = vld [vmem:[%s8054_s1 + $0x1d8] sm:$0xff]   ;;  %v3702_v12 = vcombine.high %v5539_v61, %v5539_v61 }
  0xc1   : > { %6067 = vmatprep.subr.bf16.mxu1 %v6839_v1  ;;  %6304 = vmatpush3.bf16.msra.mxu0 %v6674_v25  ;;  %v3511_v25 = vrot.slane %v3510_v11, 2 }
  0xc2   : > { %6305 = vmatprep.subr.bf16.mxu0 %v6839_v1 }
  0xc4   : > { %6068 = vmatpush3.bf16.msra.mxu1 %v6677_v23  ;;  %v3501_v23 = vrot.slane %v3499_v7, 7  ;;  %v3694_v7 = vcombine.high %v5538_v60, %v5538_v60 }
  0xc5   : > { %6073 = vmatprep.subr.bf16.mxu1 %v6839_v1  ;;  %6306 = vmatpush3.bf16.msra.mxu0 %v6676_v34  ;;  %v3543_v34 = vrot.slane %v3541_v17, 7  ;;  %v5543_v17 = vrot.slane %v5539_v61, 9 }
  0xc6   : > { %6307 = vmatprep.subr.bf16.mxu0 %v6839_v1  ;;  %v7524_v38 = vsel %vm6989_vm7, %v3497_v22, %v3501_v23  ;;  %v1541_v23 = vcombine.low %v7435_v27, %v7439_v29  ;;  %v6713_v27 = vld [vmem:[%s8054_s1 + $0x1f8] sm:$0xff]   ;;  %v6710_v29 = vld [vmem:[%s8054_s1 + $0x4e8] sm:$0xff]  }
  0xc7   : > { %6070 = vmatmul.mubr.bf16.vlgmr.msra.gmra.mrb[0].mxu1 %v1197_v24  ;;  %v6690_v24 = vld [vmem:[%s8054_s1 + $0x4a0] sm:$0xff]  }
  0xc8   : > { %6074 = vmatpush3.bf16.msra.mxu1 %v6681_v31  ;;  %6089 = vmatprep.mubr.msk.bf16.mxu1 %vm6840_vm0, %v6839_v1  ;;  %v3525_v31 = vrot.slane %v3524_v18, 2  ;;  %v3710_v18 = vcombine.high %v5540_v3, %v5540_v3 }
  0xc9   : > { %6075 = vmatprep.subr.bf16.mxu1 %v6839_v1  ;;  %6308 = vmatpush3.bf16.msra.mxu0 %v6678_v39  ;;  %v7528_v39 = vsel %vm6989_vm7, %v3511_v25, %v3515_v30  ;;  %v3721_v25 = vrot.slane %v3702_v12, 7  ;;  %v5544_v30 = vrot.slane %v5540_v3, 9  ;;  %v6722_v3 = vld [vmem:[%s8054_s1 + $0x518] sm:$0xff]  }
  0xca   : > { %6313 = vmatprep.subr.bf16.mxu0 %v6839_v1  ;;  %v7532_v40 = vsel %vm6989_vm7, %v3525_v31, %v3529_v32  ;;  %v3562_v45 = vcombine.low %v7524_v38, %v7528_v39  ;;  %v3725_v31 = vrot.slane %v3710_v18, 7  ;;  %v6708_v32 = vld [vmem:[%s8054_s1 + $0x4e0] sm:$0xff]  }
  0xcb   : > { %v6731_v18 = vld [vmem:[%s8054_s1 + $0x240] sm:$0xff]  }
  0xcc   : > { %6076 = vmatpush3.bf16.msra.mxu1 %v6683_v35  ;;  %6310 = vmatmul.mubr.bf16.vlgmr.msra.gmra.mrb[0].mxu0 %v3356_v44  ;;  %v6695_v35 = vld [vmem:[%s8054_s1 + $0x1b8] sm:$0xff]   ;;  %v6694_v44 = vld [vmem:[%s8054_s1 + $0x4b0] sm:$0xff]  }
  0xcd   : > { %6077 = vmatprep.subr.bf16.mxu1 %v6839_v1  ;;  %6314 = vmatpush3.bf16.msra.mxu0 %v6682_v43  ;;  %v6699_v43 = vld [vmem:[%s8054_s1 + $0x1c0] sm:$0xff]  }
  0xce   : > { %6329 = vmatprep.mubr.msk.bf16.mxu0 %vm6840_vm0, %v6839_v1  ;;  %6315 = vmatprep.subr.bf16.mxu0 %v6839_v1 }
  0xd0   : > { %6078 = vmatpush3.bf16.msra.mxu1 %v6685_v41  ;;  %v3544_v41 = vsel %vm6989_vm7, %v3539_v33, %v3543_v34 }
  0xd1   : > { %6079 = vmatprep.subr.bf16.mxu1 %v6839_v1  ;;  %6316 = vmatpush3.bf16.msra.mxu0 %v6684_v14  ;;  %v3563_v46 = vcombine.low %v7532_v40, %v3544_v41  ;;  %v3570_v14 = vrot.slane %v3562_v45, %v6964_v28  ;;  %v3726_v41 = vsel %vm7168_vm14, %v5544_v30, %v3725_v31  ;;  %v6736_v31 = vld [vmem:[%s8054_s1 + $0x548] sm:$0xff]  }
  0xd2   : > { %6317 = vmatprep.subr.bf16.mxu0 %v6839_v1 }
  0xd3   : > { %v3577_v15 = vrot.slane %v3563_v46, %v6964_v28  ;;  %v6712_v46 = vld [vmem:[%s8054_s1 + $0x4f0] sm:$0xff]  }
  0xd4   : > { %6080 = vmatpush3.bf16.msra.mxu1 %v6687_v48  ;;  %v1468_v48 = vshrl.u32 %v5161_v42, 16 }
  0xd5   : > { %6081 = vmatprep.subr.bf16.mxu1 %v6839_v1  ;;  %6318 = vmatpush3.bf16.msra.mxu0 %v6686_v63  ;;  %v3578_v55 = vcombine.low %v3570_v14, %v3577_v15  ;;  %v6707_v63 = vld [vmem:[%s8054_s1 + $0x1e0] sm:$0xff]   ;;  %v6714_v15 = vld [vmem:[%s8054_s1 + $0x4f8] sm:$0xff]  }
  0xd6   : > { %6319 = vmatprep.subr.bf16.mxu0 %v6839_v1  ;;  %v1470_v53 = vrot.slane %v1468_v48, 6 }
  0xd8   : > { %6082 = vmatpush3.bf16.msra.mxu1 %v6689_v52  ;;  %v1442_v52 = vcombine.high %v5161_v42, %v5161_v42  ;;  %v1474_v58 = vor.u32 %v1473_v54, %v1470_v53  ;;  %v6715_v42 = vld [vmem:[%s8054_s1 + $0x200] sm:$0xff]  }
  0xd9   : > { %6083 = vmatprep.subr.bf16.mxu1 %v6839_v1  ;;  %6320 = vmatpush3.bf16.msra.mxu0 %v6688_v9  ;;  %v6709_v9 = vld [vmem:[%s8054_s1 + $0x1e8] sm:$0xff]  }
  0xda   : > { %6321 = vmatprep.subr.bf16.mxu0 %v6839_v1  ;;  %v1477_v59 = vshll.u32 %v1442_v52, 16  ;;  %v1475_v62 = vrot.slane %v1474_v58, 2 }
  0xdc   : > { %6084 = vmatpush3.bf16.msra.mxu1 %v6691_v5  ;;  %v1479_v0 = vrot.slane %v1477_v59, 7  ;;  %v3686_v5 = vcombine.high %v5537_v4, %v5537_v4  ;;  %v6718_v4 = vld [vmem:[%s8054_s1 + $0x508] sm:$0xff]  }
  0xdd   : > { %6085 = vmatprep.subr.bf16.mxu1 %v6839_v1  ;;  %6322 = vmatpush3.bf16.msra.mxu0 %v6690_v24  ;;  %v3717_v24 = vrot.slane %v3694_v7, 7  ;;  %v6727_v7 = vld [vmem:[%s8054_s1 + $0x230] sm:$0xff]  }
  0xde   : > { %6323 = vmatprep.subr.bf16.mxu0 %v6839_v1  ;;  %v1480_v11 = vsel %vm6989_vm7, %v1475_v62, %v1479_v0  ;;  %v6725_v62 = vld [vmem:[%s8054_s1 + $0x228] sm:$0xff]  }
  0xdf   : > { %v1540_v22 = vcombine.low %v1480_v11, %v7431_v26  ;;  %v1555_v26 = vrot.slane %v1541_v23, %v6964_v28  ;;  %v6726_v11 = vld [vmem:[%s8054_s1 + $0x528] sm:$0xff]  }
  0xe0   : > { %6086 = vmatpush3.bf16.msra.mxu1 %v6693_v8  ;;  %v3713_v8 = vrot.slane %v3686_v5, 7 }
  0xe1   : > { %6087 = vmatprep.subr.bf16.mxu1 %v6839_v1  ;;  %6324 = vmatpush3.bf16.msra.mxu0 %v6692_v37  ;;  %v1548_v33 = vrot.slane %v1540_v22, %v6964_v28  ;;  %v7631_v37 = vsel %vm7168_vm14, %v5543_v17, %v3721_v25  ;;  %v6737_v17 = vld [vmem:[%s8054_s1 + $0x250] sm:$0xff]   ;;  %v6739_v25 = vld [vmem:[%s8054_s1 + $0x258] sm:$0xff]  }
  0xe2   : > { %6325 = vmatprep.subr.bf16.mxu0 %v6839_v1  ;;  %v7623_v34 = vsel %vm7168_vm14, %v5541_v21, %v3713_v8  ;;  %v3745_v45 = vcombine.low %v7631_v37, %v3726_v41  ;;  %v6728_v21 = vld [vmem:[%s8054_s1 + $0x530] sm:$0xff]   ;;  %v6735_v8 = vld [vmem:[%s8054_s1 + $0x248] sm:$0xff]   ;;  %v6740_v41 = vld [vmem:[%s8054_s1 + $0x558] sm:$0xff]  }
  0xe3   : > { %v5225_v22 = vld.sshfl [vmem:[%s6934_s21 + $0x30] sm:$0x12 pattern:$0x76325410] }
  0xe4   : > { %6088 = vmatpush3.bf16.msra.mxu1 %v6695_v35  ;;  %v1556_v35 = vcombine.low %v1548_v33, %v1555_v26  ;;  %v3759_v14 = vrot.slane %v3745_v45, %v6964_v28  ;;  %v1886_v30 = vcombine.high %v5225_v22, %v5225_v22  ;;  %v5229_v33 = vrot.slane %v5225_v22, 9  ;;  %v6742_v45 = vld [vmem:[%s8054_s1 + $0x560] sm:$0xff]  }
  0xe5   : > { %6093 = vmatprep.subr.bf16.mxu1 %v6839_v1  ;;  %6326 = vmatpush3.bf16.msra.mxu0 %v6694_v44  ;;  %v6811_v22 = vld.sshfl [vmem:[%s6934_s21 + $0x4] sm:$0xf pattern:$0x76325410] }
  0xe6   : > { %6327 = vmatprep.subr.bf16.mxu0 %v6839_v1  ;;  %v1913_v26 = vrot.slane %v1886_v30, 7 }
  0xe7   : > { %6090 = vmatmul.mubr.bf16.vlgmr.msra.gmra.mrb[0].mxu1 %v1334_v36  ;;  %v7627_v36 = vsel %vm7168_vm14, %v5542_v13, %v3717_v24  ;;  %v6730_v13 = vld [vmem:[%s8054_s1 + $0x538] sm:$0xff]   ;;  %v6734_v24 = vld [vmem:[%s8054_s1 + $0x540] sm:$0xff]  }
  0xe8   : > { %6094 = vmatpush3.bf16.msra.mxu1 %v6699_v43  ;;  %6109 = vmatprep.mubr.msk.bf16.mxu1 %vm6840_vm0, %v6839_v1  ;;  %v5193_v43 = vld.sshfl [vmem:[%s6934_s21 + $0x48] sm:$0x13 pattern:$0x76325410]  ;;  %v3744_v44 = vcombine.low %v7623_v34, %v7627_v36 }
  0xe9   : > { %6095 = vmatprep.subr.bf16.mxu1 %v6839_v1  ;;  %6328 = vmatpush3.bf16.msra.mxu0 %v6696_v51  ;;  %v1690_v48 = vshrl.u32 %v5193_v43, 16  ;;  %v1693_v49 = vshll.u32 %v5193_v43, 16  ;;  %v1664_v52 = vcombine.high %v5193_v43, %v5193_v43  ;;  %v1945_v43 = vcombine.low %v7627_v36, %v7631_v37  ;;  %v6747_v37 = vld [vmem:[%s8054_s1 + $0x278] sm:$0xff]  }
  0xea   : > { %6333 = vmatprep.subr.bf16.mxu0 %v6839_v1  ;;  %v3752_v51 = vrot.slane %v3744_v44, %v6964_v28  ;;  %v6745_v44 = vld [vmem:[%s8054_s1 + $0x270] sm:$0xff]  }
  0xeb   : > { %v1692_v53 = vrot.slane %v1690_v48, 6  ;;  %v1695_v54 = vrot.slane %v1693_v49, 7  ;;  %v1699_v59 = vshll.u32 %v1664_v52, 16  ;;  %v1959_v36 = vrot.slane %v1945_v43, %v6964_v28  ;;  %v6749_v48 = vld [vmem:[%s8054_s1 + $0x280] sm:$0xff]   ;;  %v6755_v52 = vld [vmem:[%s8054_s1 + $0x290] sm:$0xff]  }
  0xec   : > { %6096 = vmatpush3.bf16.msra.mxu1 %v6701_v47  ;;  %6330 = vmatmul.mubr.bf16.vlgmr.msra.gmra.mrb[0].mxu0 %v3578_v55  ;;  %v6717_v47 = vld [vmem:[%s8054_s1 + $0x208] sm:$0xff]   ;;  %v3760_v55 = vcombine.low %v3752_v51, %v3759_v14  ;;  %v6809_v49 = vld.sshfl [vmem:[%s6934_s21 + $0x20] sm:$0xf pattern:$0x76325410]  ;;  %v6746_v14 = vld [vmem:[%s8054_s1 + $0x570] sm:$0xff]  }
  0xed   : > { %6097 = vmatprep.subr.bf16.mxu1 %v6839_v1  ;;  %6334 = vmatpush3.bf16.msra.mxu0 %v6700_v56  ;;  %v6716_v56 = vld [vmem:[%s8054_s1 + $0x500] sm:$0xff]   ;;  %v1696_v58 = vor.u32 %v1695_v54, %v1692_v53  ;;  %v1701_v61 = vrot.slane %v1699_v59, 7  ;;  %v6810_v51 = vld.sshfl [vmem:[%s6934_s21 + $0x28] sm:$0xf pattern:$0x76325410] }
  0xee   : > { %6349 = vmatprep.mubr.msk.bf16.mxu0 %vm6840_vm0, %v6839_v1  ;;  %6335 = vmatprep.subr.bf16.mxu0 %v6839_v1  ;;  %v5629_v53 = vld.sshfl [vmem:[%s6934_s21 + $0x8] sm:$0x13 pattern:$0x76325410]  ;;  %v4034_v54 = vcombine.low %v6809_v49, %v6810_v51 }
  0xef   : > { %v1697_v60 = vrot.slane %v1696_v58, 2  ;;  %v6757_v58 = vld [vmem:[%s8054_s1 + $0x298] sm:$0xff]   ;;  %v5632_v59 = vld.sshfl [vmem:[%s6934_s21 + $0x14] sm:$0x13 pattern:$0x76325410] }
  0xf0   : > { %6098 = vmatpush3.bf16.msra.mxu1 %v6703_v16  ;;  %v6719_v16 = vld [vmem:[%s8054_s1 + $0x210] sm:$0xff]   ;;  %v6762_v49 = vld [vmem:[%s8054_s1 + $0x5a8] sm:$0xff]  }
  0xf1   : > { %6099 = vmatprep.subr.bf16.mxu1 %v6839_v1  ;;  %6336 = vmatpush3.bf16.msra.mxu0 %v6702_v10  ;;  %v6723_v10 = vld [vmem:[%s8054_s1 + $0x220] sm:$0xff]   ;;  %v1702_v0 = vsel %vm6989_vm7, %v1697_v60, %v1701_v61 }
  0xf2   : > { %6337 = vmatprep.subr.bf16.mxu0 %v6839_v1  ;;  %v1762_v5 = vcombine.low %v1702_v0, %v7524_v38 }
  0xf4   : > { %6100 = vmatpush3.bf16.msra.mxu1 %v6705_v57  ;;  %v6721_v57 = vld [vmem:[%s8054_s1 + $0x218] sm:$0xff]   ;;  %v1770_v38 = vrot.slane %v1762_v5, %v6964_v28  ;;  %v4213_v5 = vshll.u32 %v5632_v59, 16 }
  0xf5   : > { %6101 = vmatprep.subr.bf16.mxu1 %v6839_v1  ;;  %6338 = vmatpush3.bf16.msra.mxu0 %v6704_v6  ;;  %v1763_v6 = vcombine.low %v7528_v39, %v7532_v40  ;;  %v6729_v40 = vld [vmem:[%s8054_s1 + $0x238] sm:$0xff]  }
  0xf6   : > { %6339 = vmatprep.subr.bf16.mxu0 %v6839_v1 }
  0xf7   : > { %v1777_v39 = vrot.slane %v1763_v6, %v6964_v28  ;;  %v6759_v6 = vld [vmem:[%s8054_s1 + $0x2a0] sm:$0xff]  }
  0xf8   : > { %6102 = vmatpush3.bf16.msra.mxu1 %v6707_v63  ;;  %v6720_v63 = vld [vmem:[%s8054_s1 + $0x510] sm:$0xff]  }
  0xf9   : > { %6103 = vmatprep.subr.bf16.mxu1 %v6839_v1  ;;  %6340 = vmatpush3.bf16.msra.mxu0 %v6706_v19  ;;  %v1778_v12 = vcombine.low %v1770_v38, %v1777_v39  ;;  %v6807_v19 = vld.sshfl [vmem:[%s6934_s21 + $0x8] sm:$0xf pattern:$0x76325410] }
  0xfa   : > { %6341 = vmatprep.subr.bf16.mxu0 %v6839_v1 }
  0xfc   : > { %6104 = vmatpush3.bf16.msra.mxu1 %v6709_v9  ;;  %v6724_v9 = vld [vmem:[%s8054_s1 + $0x520] sm:$0xff]  }
  0xfd   : > { %6105 = vmatprep.subr.bf16.mxu1 %v6839_v1  ;;  %6342 = vmatpush3.bf16.msra.mxu0 %v6708_v32  ;;  %v6741_v32 = vld [vmem:[%s8054_s1 + $0x260] sm:$0xff]  }
  0xfe   : > { %6343 = vmatprep.subr.bf16.mxu0 %v6839_v1 }
 0x100   : > { %6106 = vmatpush3.bf16.msra.mxu1 %v6711_v20  ;;  %v6808_v20 = vld.sshfl [vmem:[%s6934_s21 + $0x10] sm:$0xf pattern:$0x76325410] }
 0x101   : > { %6107 = vmatprep.subr.bf16.mxu1 %v6839_v1  ;;  %6344 = vmatpush3.bf16.msra.mxu0 %v6710_v29  ;;  %v3897_v23 = vcombine.low %v6807_v19, %v6808_v20  ;;  %v6743_v29 = vld [vmem:[%s8054_s1 + $0x268] sm:$0xff]   ;;  %v6756_v19 = vld [vmem:[%s8054_s1 + $0x590] sm:$0xff]  }
 0x102   : > { %6345 = vmatprep.subr.bf16.mxu0 %v6839_v1 }
 0x104   : > { %6108 = vmatpush3.bf16.msra.mxu1 %v6713_v27  ;;  %v6738_v27 = vld [vmem:[%s8054_s1 + $0x550] sm:$0xff]  }
 0x105   : > { %6113 = vmatprep.subr.bf16.mxu1 %v6839_v1  ;;  %6346 = vmatpush3.bf16.msra.mxu0 %v6712_v46  ;;  %v6744_v46 = vld [vmem:[%s8054_s1 + $0x568] sm:$0xff]  }
 0x106   : > { %6347 = vmatprep.subr.bf16.mxu0 %v6839_v1 }
 0x107   : > { %6110 = vmatmul.mubr.bf16.vlgmr.msra.gmra.mrb[0].mxu1 %v1556_v35  ;;  %v1914_v35 = vsel %vm7168_vm14, %v5229_v33, %v1913_v26 }
 0x108   : > { %6114 = vmatpush3.bf16.msra.mxu1 %v6715_v42  ;;  %6129 = vmatprep.mubr.msk.bf16.mxu1 %vm6840_vm0, %v6839_v1  ;;  %v1944_v42 = vcombine.low %v1914_v35, %v7623_v34  ;;  %v6763_v35 = vld [vmem:[%s8054_s1 + $0x2b0] sm:$0xff]  }
 0x109   : > { %6115 = vmatprep.subr.bf16.mxu1 %v6839_v1  ;;  %6348 = vmatpush3.bf16.msra.mxu0 %v6714_v15  ;;  %v6753_v15 = vld [vmem:[%s8054_s1 + $0x288] sm:$0xff]  }
 0x10a   : > { %6353 = vmatprep.subr.bf16.mxu0 %v6839_v1  ;;  %v1952_v34 = vrot.slane %v1944_v42, %v6964_v28 }
 0x10c   : > { %6116 = vmatpush3.bf16.msra.mxu1 %v6717_v47  ;;  %6350 = vmatmul.mubr.bf16.vlgmr.msra.gmra.mrb[0].mxu0 %v3760_v55  ;;  %v1960_v47 = vcombine.low %v1952_v34, %v1959_v36  ;;  %v5630_v55 = vld.sshfl [vmem:[%s6934_s21 + $0xc] sm:$0x13 pattern:$0x76325410] }
 0x10d   : > { %6117 = vmatprep.subr.bf16.mxu1 %v6839_v1  ;;  %6354 = vmatpush3.bf16.msra.mxu0 %v6716_v56  ;;  %v6752_v56 = vld [vmem:[%s8054_s1 + $0x580] sm:$0xff]   ;;  %v4182_v60 = vshrl.u32 %v5630_v55, 16  ;;  %v4185_v61 = vshll.u32 %v5630_v55, 16 }
 0x10e   : > { %6369 = vmatprep.mubr.msk.bf16.mxu0 %vm6840_vm0, %v6839_v1  ;;  %6355 = vmatprep.subr.bf16.mxu0 %v6839_v1 }
 0x110   : > { %6118 = vmatpush3.bf16.msra.mxu1 %v6719_v16  ;;  %v6748_v16 = vld [vmem:[%s8054_s1 + $0x578] sm:$0xff]  }
 0x111   : > { %6119 = vmatprep.subr.bf16.mxu1 %v6839_v1  ;;  %6356 = vmatpush3.bf16.msra.mxu0 %v6718_v4  ;;  %v4168_v4 = vshrl.u32 %v5629_v53, 16 }
 0x112   : > { %6357 = vmatprep.subr.bf16.mxu0 %v6839_v1 }
 0x113   : > { %v4170_v39 = vrot.slane %v4168_v4, 6  ;;  %v6773_v4 = vld [vmem:[%s8054_s1 + $0x2d0] sm:$0xff]  }
 0x114   : > { %6120 = vmatpush3.bf16.msra.mxu1 %v6721_v57  ;;  %v5631_v57 = vld.sshfl [vmem:[%s6934_s21 + $0x10] sm:$0x13 pattern:$0x76325410] }
 0x115   : > { %6121 = vmatprep.subr.bf16.mxu1 %v6839_v1  ;;  %6358 = vmatpush3.bf16.msra.mxu0 %v6720_v63  ;;  %v6754_v63 = vld [vmem:[%s8054_s1 + $0x588] sm:$0xff]   ;;  %v4199_v0 = vshll.u32 %v5631_v57, 16  ;;  %v4158_v38 = vcombine.high %v5631_v57, %v5631_v57 }
 0x116   : > { %6359 = vmatprep.subr.bf16.mxu0 %v6839_v1 }
 0x118   : > { %6122 = vmatpush3.bf16.msra.mxu1 %v6723_v10  ;;  %v4171_v10 = vshll.u32 %v5629_v53, 16 }
 0x119   : > { %6123 = vmatprep.subr.bf16.mxu1 %v6839_v1  ;;  %6360 = vmatpush3.bf16.msra.mxu0 %v6722_v3  ;;  %v4210_v3 = vshrl.u32 %v5632_v59, 16 }
 0x11a   : > { %6361 = vmatprep.subr.bf16.mxu0 %v6839_v1 }
 0x11c   : > { %6124 = vmatpush3.bf16.msra.mxu1 %v6725_v62  ;;  %v4196_v62 = vshrl.u32 %v5631_v57, 16 }
 0x11d   : > { %6125 = vmatprep.subr.bf16.mxu1 %v6839_v1  ;;  %6362 = vmatpush3.bf16.msra.mxu0 %v6724_v9  ;;  %v4150_v9 = vcombine.high %v5630_v55, %v5630_v55  ;;  %v6764_v55 = vld [vmem:[%s8054_s1 + $0x5b0] sm:$0xff]  }
 0x11e   : > { %6363 = vmatprep.subr.bf16.mxu0 %v6839_v1  ;;  %v4198_v20 = vrot.slane %v4196_v62, 6  ;;  %v5663_v62 = vld.sshfl [vmem:[%s6934_s21 + $0x28] sm:$0x13 pattern:$0x76325410] }
 0x11f   : > { %v4191_v30 = vshll.u32 %v4150_v9, 16 }
 0x120   : > { %6126 = vmatpush3.bf16.msra.mxu1 %v6727_v7  ;;  %v4142_v7 = vcombine.high %v5629_v53, %v5629_v53 }
 0x121   : > { %6127 = vmatprep.subr.bf16.mxu1 %v6839_v1  ;;  %6364 = vmatpush3.bf16.msra.mxu0 %v6726_v11  ;;  %v4173_v11 = vrot.slane %v4171_v10, 7  ;;  %v4193_v43 = vrot.slane %v4191_v30, 7  ;;  %v5661_v10 = vld.sshfl [vmem:[%s6934_s21 + $0x20] sm:$0x13 pattern:$0x76325410] }
 0x122   : > { %6365 = vmatprep.subr.bf16.mxu0 %v6839_v1 }
 0x124   : > { %6128 = vmatpush3.bf16.msra.mxu1 %v6729_v40  ;;  %v4166_v40 = vcombine.high %v5632_v59, %v5632_v59  ;;  %v6766_v59 = vld [vmem:[%s8054_s1 + $0x5b8] sm:$0xff]  }
 0x125   : > { %6133 = vmatprep.subr.bf16.mxu1 %v6839_v1  ;;  %6366 = vmatpush3.bf16.msra.mxu0 %v6728_v21  ;;  %v4201_v21 = vrot.slane %v4199_v0, 7  ;;  %v6775_v0 = vld [vmem:[%s8054_s1 + $0x2d8] sm:$0xff]  }
 0x126   : > { %6367 = vmatprep.subr.bf16.mxu0 %v6839_v1 }
 0x127   : > { %6130 = vmatmul.mubr.bf16.vlgmr.msra.gmra.mrb[0].mxu1 %v1778_v12  ;;  %v4184_v12 = vrot.slane %v4182_v60, 6  ;;  %v4202_v26 = vor.u32 %v4201_v21, %v4198_v20 }
 0x128   : > { %6134 = vmatpush3.bf16.msra.mxu1 %v6731_v18  ;;  %6149 = vmatprep.mubr.msk.bf16.mxu1 %vm6840_vm0, %v6839_v1  ;;  %v4187_v18 = vrot.slane %v4185_v61, 7  ;;  %v5662_v61 = vld.sshfl [vmem:[%s6934_s21 + $0x24] sm:$0x13 pattern:$0x76325410] }
 0x129   : > { %6135 = vmatprep.subr.bf16.mxu1 %v6839_v1  ;;  %6368 = vmatpush3.bf16.msra.mxu0 %v6730_v13  ;;  %v4215_v13 = vrot.slane %v4213_v5, 7  ;;  %v4203_v36 = vrot.slane %v4202_v26, 2  ;;  %v4390_v5 = vshrl.u32 %v5661_v10, 16  ;;  %v4407_v9 = vshll.u32 %v5662_v61, 16 }
 0x12a   : > { %6373 = vmatprep.subr.bf16.mxu0 %v6839_v1  ;;  %v4188_v33 = vor.u32 %v4187_v18, %v4184_v12  ;;  %v6777_v18 = vld [vmem:[%s8054_s1 + $0x2e0] sm:$0xff]   ;;  %v4372_v20 = vcombine.high %v5662_v61, %v5662_v61 }
 0x12b   : > { %v4392_v21 = vrot.slane %v4390_v5, 6  ;;  %v5693_v5 = vld.sshfl [vmem:[%s6934_s21 + $0x8] sm:$0x12 pattern:$0x76325410] }
 0x12c   : > { %6136 = vmatpush3.bf16.msra.mxu1 %v6735_v8  ;;  %6370 = vmatmul.mubr.bf16.vlgmr.msra.gmra.mrb[0].mxu0 %v3897_v23  ;;  %v4212_v8 = vrot.slane %v4210_v3, 6  ;;  %v6812_v23 = vld.sshfl [vmem:[%s6934_s21 + $0xc] sm:$0xf pattern:$0x76325410]  ;;  %v4189_v34 = vrot.slane %v4188_v33, 2 }
 0x12d   : > { %6137 = vmatprep.subr.bf16.mxu1 %v6839_v1  ;;  %6374 = vmatpush3.bf16.msra.mxu0 %v6734_v24  ;;  %v4174_v24 = vor.u32 %v4173_v11, %v4170_v39  ;;  %v5664_v3 = vld.sshfl [vmem:[%s6934_s21 + $0x2c] sm:$0x13 pattern:$0x76325410]  ;;  %v4418_v39 = vshrl.u32 %v5663_v62, 16 }
 0x12e   : > { %6389 = vmatprep.mubr.msk.bf16.mxu0 %vm6840_vm0, %v6839_v1  ;;  %6375 = vmatprep.subr.bf16.mxu0 %v6839_v1  ;;  %v4432_v11 = vshrl.u32 %v5664_v3, 16  ;;  %v4435_v12 = vshll.u32 %v5664_v3, 16  ;;  %v6779_v33 = vld [vmem:[%s8054_s1 + $0x2e8] sm:$0xff]  }
 0x130   : > { %6138 = vmatpush3.bf16.msra.mxu1 %v6737_v17  ;;  %v6761_v17 = vld [vmem:[%s8054_s1 + $0x2a8] sm:$0xff]  }
 0x131   : > { %6139 = vmatprep.subr.bf16.mxu1 %v6839_v1  ;;  %6376 = vmatpush3.bf16.msra.mxu0 %v6736_v31  ;;  %v4205_v31 = vshll.u32 %v4158_v38, 16  ;;  %v6772_v38 = vld [vmem:[%s8054_s1 + $0x5c8] sm:$0xff]  }
 0x132   : > { %6377 = vmatprep.subr.bf16.mxu0 %v6839_v1 }
 0x134   : > { %6140 = vmatpush3.bf16.msra.mxu1 %v6739_v25  ;;  %v4177_v25 = vshll.u32 %v4142_v7, 16  ;;  %v4404_v7 = vshrl.u32 %v5662_v61, 16 }
 0x135   : > { %6141 = vmatprep.subr.bf16.mxu1 %v6839_v1  ;;  %6378 = vmatpush3.bf16.msra.mxu0 %v6738_v27  ;;  %v4216_v27 = vor.u32 %v4215_v13, %v4212_v8  ;;  %v4380_v13 = vcombine.high %v5663_v62, %v5663_v62 }
 0x136   : > { %6379 = vmatprep.subr.bf16.mxu0 %v6839_v1  ;;  %v4179_v42 = vrot.slane %v4177_v25, 7  ;;  %v4420_v25 = vrot.slane %v4418_v39, 6  ;;  %v4586_v39 = vcombine.high %v5693_v5, %v5693_v5 }
 0x138   : > { %6142 = vmatpush3.bf16.msra.mxu1 %v6741_v32  ;;  %v6758_v32 = vld [vmem:[%s8054_s1 + $0x598] sm:$0xff]  }
 0x139   : > { %6143 = vmatprep.subr.bf16.mxu1 %v6839_v1  ;;  %6380 = vmatpush3.bf16.msra.mxu0 %v6740_v41  ;;  %v4175_v41 = vrot.slane %v4174_v24, 2  ;;  %v6774_v24 = vld [vmem:[%s8054_s1 + $0x5d0] sm:$0xff]  }
 0x13a   : > { %6381 = vmatprep.subr.bf16.mxu0 %v6839_v1 }
 0x13b   : > { %v4180_v51 = vsel %vm6989_vm7, %v4175_v41, %v4179_v42  ;;  %v4413_v41 = vshll.u32 %v4372_v20, 16  ;;  %v4427_v42 = vshll.u32 %v4380_v13, 16  ;;  %v4613_v20 = vrot.slane %v4586_v39, 7  ;;  %v6791_v13 = vld [vmem:[%s8054_s1 + $0x620] sm:$0xff]  }
 0x13c   : > { %6144 = vmatpush3.bf16.msra.mxu1 %v6743_v29  ;;  %v4219_v29 = vshll.u32 %v4166_v40, 16  ;;  %v4421_v40 = vshll.u32 %v5663_v62, 16 }
 0x13d   : > { %6145 = vmatprep.subr.bf16.mxu1 %v6839_v1  ;;  %6382 = vmatpush3.bf16.msra.mxu0 %v6742_v45  ;;  %v6760_v45 = vld [vmem:[%s8054_s1 + $0x5a0] sm:$0xff]  }
 0x13e   : > { %6383 = vmatprep.subr.bf16.mxu0 %v6839_v1  ;;  %v4423_v30 = vrot.slane %v4421_v40, 7 }
 0x140   : > { %6146 = vmatpush3.bf16.msra.mxu1 %v6745_v44  ;;  %v4207_v44 = vrot.slane %v4205_v31, 7  ;;  %v4434_v31 = vrot.slane %v4432_v11, 6  ;;  %v6790_v11 = vld [vmem:[%s8054_s1 + $0x618] sm:$0xff]  }
 0x141   : > { %6147 = vmatprep.subr.bf16.mxu1 %v6839_v1  ;;  %6384 = vmatpush3.bf16.msra.mxu0 %v6744_v46  ;;  %v4221_v46 = vrot.slane %v4219_v29, 7  ;;  %v6813_v29 = vld.sshfl [vmem:[%s6934_s21 + $0x1c] sm:$0xf pattern:$0x76325410] }
 0x142   : > { %6385 = vmatprep.subr.bf16.mxu0 %v6839_v1 }
 0x144   : > { %6148 = vmatpush3.bf16.msra.mxu1 %v6747_v37  ;;  %v4217_v37 = vrot.slane %v4216_v27, 2 }
 0x145   : > { %6153 = vmatprep.subr.bf16.mxu1 %v6839_v1  ;;  %6386 = vmatpush3.bf16.msra.mxu0 %v6746_v14  ;;  %v4194_v14 = vsel %vm6989_vm7, %v4189_v34, %v4193_v43  ;;  %v6776_v43 = vld [vmem:[%s8054_s1 + $0x5d8] sm:$0xff]  }
 0x146   : > { %6387 = vmatprep.subr.bf16.mxu0 %v6839_v1  ;;  %v4240_v53 = vcombine.low %v4180_v51, %v4194_v14  ;;  %v4429_v51 = vrot.slane %v4427_v42, 7  ;;  %v6778_v14 = vld [vmem:[%s8054_s1 + $0x5e0] sm:$0xff]  }
 0x147   : > { %6150 = vmatmul.mubr.bf16.vlgmr.msra.gmra.mrb[0].mxu1 %v1960_v47  ;;  %v6765_v47 = vld [vmem:[%s8054_s1 + $0x2b8] sm:$0xff]  }
 0x148   : > { %6154 = vmatpush3.bf16.msra.mxu1 %v6749_v48  ;;  %6169 = vmatprep.mubr.msk.bf16.mxu1 %vm6840_vm0, %v6839_v1  ;;  %v2097_v48 = vcombine.low %v6811_v22, %v6812_v23  ;;  %v4248_v57 = vrot.slane %v4240_v53, %v6964_v28  ;;  %v4406_v22 = vrot.slane %v4404_v7, 6  ;;  %v4409_v23 = vrot.slane %v4407_v9, 7  ;;  %v6783_v53 = vld [vmem:[%s8054_s1 + $0x2f8] sm:$0xff]   ;;  %v6789_v7 = vld [vmem:[%s8054_s1 + $0x610] sm:$0xff]  }
 0x149   : > { %6155 = vmatprep.subr.bf16.mxu1 %v6839_v1  ;;  %6388 = vmatpush3.bf16.msra.mxu0 %v6748_v16  ;;  %v4222_v16 = vsel %vm6989_vm7, %v4217_v37, %v4221_v46  ;;  %v6781_v37 = vld [vmem:[%s8054_s1 + $0x2f0] sm:$0xff]  }
 0x14a   : > { %6393 = vmatprep.subr.bf16.mxu0 %v6839_v1  ;;  %v5695_v9 = vld.sshfl [vmem:[%s6934_s21 + $0x10] sm:$0x12 pattern:$0x76325410] }
 0x14c   : > { %6156 = vmatpush3.bf16.msra.mxu1 %v6753_v15  ;;  %6390 = vmatmul.mubr.bf16.vlgmr.msra.gmra.mrb[0].mxu0 %v4034_v54  ;;  %v4208_v15 = vsel %vm6989_vm7, %v4203_v36, %v4207_v44  ;;  %v6814_v44 = vld.sshfl [vmem:[%s6934_s21 + $0x24] sm:$0xf pattern:$0x76325410] }
 0x14d   : > { %6157 = vmatprep.subr.bf16.mxu1 %v6839_v1  ;;  %6394 = vmatpush3.bf16.msra.mxu0 %v6752_v56  ;;  %v4241_v54 = vcombine.low %v4208_v15, %v4222_v16  ;;  %v6771_v56 = vld [vmem:[%s8054_s1 + $0x2c8] sm:$0xff]  }
 0x14e   : > { %6409 = vmatprep.mubr.msk.bf16.mxu0 %vm6840_vm0, %v6839_v1  ;;  %6395 = vmatprep.subr.bf16.mxu0 %v6839_v1 }
 0x150   : > { %6158 = vmatpush3.bf16.msra.mxu1 %v6755_v52  ;;  %v6769_v52 = vld [vmem:[%s8054_s1 + $0x2c0] sm:$0xff]  }
 0x151   : > { %6159 = vmatprep.subr.bf16.mxu1 %v6839_v1  ;;  %6396 = vmatpush3.bf16.msra.mxu0 %v6754_v63  ;;  %v6770_v63 = vld [vmem:[%s8054_s1 + $0x5c0] sm:$0xff]  }
 0x152   : > { %6397 = vmatprep.subr.bf16.mxu0 %v6839_v1 }
 0x154   : > { %6160 = vmatpush3.bf16.msra.mxu1 %v6757_v58  ;;  %v4255_v58 = vrot.slane %v4241_v54, %v6964_v28 }
 0x155   : > { %6161 = vmatprep.subr.bf16.mxu1 %v6839_v1  ;;  %6398 = vmatpush3.bf16.msra.mxu0 %v6756_v19  ;;  %v4364_v19 = vcombine.high %v5661_v10, %v5661_v10 }
 0x156   : > { %6399 = vmatprep.subr.bf16.mxu0 %v6839_v1  ;;  %v4256_v60 = vcombine.low %v4248_v57, %v4255_v58 }
 0x157   : > { %v4399_v27 = vshll.u32 %v4364_v19, 16  ;;  %v5697_v19 = vrot.slane %v5693_v5, 9  ;;  %v4783_v5 = vld [vmem:[%s8031_s28] sm:$0x1] }
 0x158   : > { %6162 = vmatpush3.bf16.msra.mxu1 %v6759_v6  ;;  %v4393_v6 = vshll.u32 %v5661_v10, 16 }
 0x159   : > { %6163 = vmatprep.subr.bf16.mxu1 %v6839_v1  ;;  %6400 = vmatpush3.bf16.msra.mxu0 %v6758_v32  ;;  %v4437_v32 = vrot.slane %v4435_v12, 7  ;;  %v4602_v12 = vcombine.high %v5695_v9, %v5695_v9 }
 0x15a   : > { %6401 = vmatprep.subr.bf16.mxu0 %v6839_v1  ;;  %v4395_v8 = vrot.slane %v4393_v6, 7  ;;  %v5694_v6 = vld.sshfl [vmem:[%s6934_s21 + $0xc] sm:$0x12 pattern:$0x76325410] }
 0x15b   : > { %v4438_v34 = vor.u32 %v4437_v32, %v4434_v31  ;;  %v4594_v40 = vcombine.high %v5694_v6, %v5694_v6 }
 0x15c   : > { %6164 = vmatpush3.bf16.msra.mxu1 %v6761_v17  ;;  %v4388_v17 = vcombine.high %v5664_v3, %v5664_v3  ;;  %v4396_v26 = vor.u32 %v4395_v8, %v4392_v21  ;;  %v6788_v3 = vld [vmem:[%s8054_s1 + $0x608] sm:$0xff]   ;;  %v5698_v21 = vrot.slane %v5694_v6, 9 }
 0x15d   : > { %6165 = vmatprep.subr.bf16.mxu1 %v6839_v1  ;;  %6402 = vmatpush3.bf16.msra.mxu0 %v6760_v45  ;;  %v4424_v45 = vor.u32 %v4423_v30, %v4420_v25  ;;  %v4439_v16 = vrot.slane %v4438_v34, 2  ;;  %v4617_v8 = vrot.slane %v4594_v40, 7  ;;  %v6792_v25 = vld [vmem:[%s8054_s1 + $0x628] sm:$0xff]   ;;  %v4614_v30 = vsel %vm7168_vm14, %v5697_v19, %v4613_v20 }
 0x15e   : > { %6403 = vmatprep.subr.bf16.mxu0 %v6839_v1  ;;  %v4441_v36 = vshll.u32 %v4388_v17, 16  ;;  %v4397_v46 = vrot.slane %v4396_v26, 2  ;;  %v5699_v17 = vrot.slane %v5695_v9, 9 }
 0x15f   : > { %v4425_v15 = vrot.slane %v4424_v45, 2  ;;  %v4618_v31 = vsel %vm7168_vm14, %v5698_v21, %v4617_v8 }
 0x160   : > { %6166 = vmatpush3.bf16.msra.mxu1 %v6763_v35  ;;  %v4410_v35 = vor.u32 %v4409_v23, %v4406_v22  ;;  %v4621_v22 = vrot.slane %v4602_v12, 7  ;;  %v4644_v26 = vcombine.low %v4614_v30, %v4618_v31 }
 0x161   : > { %6167 = vmatprep.subr.bf16.mxu1 %v6839_v1  ;;  %6404 = vmatpush3.bf16.msra.mxu0 %v6762_v49  ;;  %v4415_v49 = vrot.slane %v4413_v41, 7  ;;  %v4430_v58 = vsel %vm6989_vm7, %v4425_v15, %v4429_v51 }
 0x162   : > { %6405 = vmatprep.subr.bf16.mxu0 %v6839_v1  ;;  %v4622_v32 = vsel %vm7168_vm14, %v5699_v17, %v4621_v22 }
 0x164   : > { %6168 = vmatpush3.bf16.msra.mxu1 %v6765_v47  ;;  %v4401_v47 = vrot.slane %v4399_v27, 7 }
 0x165   : > { %6173 = vmatprep.subr.bf16.mxu1 %v6839_v1  ;;  %6406 = vmatpush3.bf16.msra.mxu0 %v6764_v55  ;;  %v6780_v55 = vld [vmem:[%s8054_s1 + $0x5e8] sm:$0xff]  }
 0x166   : > { %6407 = vmatprep.subr.bf16.mxu0 %v6839_v1  ;;  %v4402_v54 = vsel %vm6989_vm7, %v4397_v46, %v4401_v47 }
 0x167   : > { %6170 = vmatmul.mubr.bf16.vlgmr.msra.gmra.mrb[0].mxu1 %v2097_v48  ;;  %v4411_v48 = vrot.slane %v4410_v35, 2  ;;  %v4652_v35 = vrot.slane %v4644_v26, %v6964_v28 }
 0x168   : > { %6174 = vmatpush3.bf16.msra.mxu1 %v6769_v52  ;;  %6189 = vmatprep.mubr.msk.bf16.mxu1 %vm6840_vm0, %v6839_v1  ;;  %v4443_v52 = vrot.slane %v4441_v36, 7 }
 0x169   : > { %6175 = vmatprep.subr.bf16.mxu1 %v6839_v1  ;;  %6408 = vmatpush3.bf16.msra.mxu0 %v6766_v59  ;;  %v4416_v57 = vsel %vm6989_vm7, %v4411_v48, %v4415_v49 }
 0x16a   : > { %6413 = vmatprep.subr.bf16.mxu0 %v6839_v1  ;;  %v4444_v59 = vsel %vm6989_vm7, %v4439_v16, %v4443_v52 }
 0x16b   : > { %v4463_v10 = vcombine.low %v4430_v58, %v4444_v59 }
 0x16c   : > { %6176 = vmatpush3.bf16.msra.mxu1 %v6771_v56  ;;  %6410 = vmatmul.mubr.bf16.vlgmr.msra.gmra.mrb[0].mxu0 %v4256_v60  ;;  %v2234_v56 = vcombine.low %v6813_v29, %v6814_v44  ;;  %v6782_v60 = vld [vmem:[%s8054_s1 + $0x5f0] sm:$0xff]  }
 0x16d   : > { %6177 = vmatprep.subr.bf16.mxu1 %v6839_v1  ;;  %6414 = vmatpush3.bf16.msra.mxu0 %v6770_v63  ;;  %v4477_v50 = vrot.slane %v4463_v10, %v6964_v28  ;;  %v6784_v63 = vld [vmem:[%s8054_s1 + $0x5f8] sm:$0xff]   ;;  %v6793_v29 = vld [vmem:[%s8054_s1 + $0x630] sm:$0xff]  }
 0x16e   : > { %6429 = vmatprep.mubr.msk.bf16.mxu0 %vm6840_vm0, %v6839_v1  ;;  %6415 = vmatprep.subr.bf16.mxu0 %v6839_v1 }
 0x170   : > { %6178 = vmatpush3.bf16.msra.mxu1 %v6773_v4  ;;  %v4462_v4 = vcombine.low %v4402_v54, %v4416_v57 }
 0x171   : > { %6179 = vmatprep.subr.bf16.mxu1 %v6839_v1  ;;  %6416 = vmatpush3.bf16.msra.mxu0 %v6772_v38  ;;  %v5696_v38 = vld.sshfl [vmem:[%s6934_s21 + $0x14] sm:$0x12 pattern:$0x76325410] }
 0x172   : > { %6417 = vmatprep.subr.bf16.mxu0 %v6839_v1  ;;  %v4470_v61 = vrot.slane %v4462_v4, %v6964_v28  ;;  %v5700_v23 = vrot.slane %v5696_v38, 9 }
 0x174   : > { %6180 = vmatpush3.bf16.msra.mxu1 %v6775_v0  ;;  %v4478_v62 = vcombine.low %v4470_v61, %v4477_v50  ;;  %v6787_v0 = vld [vmem:[%s8054_s1 + $0x600] sm:$0xff]  }
 0x175   : > { %6181 = vmatprep.subr.bf16.mxu1 %v6839_v1  ;;  %6418 = vmatpush3.bf16.msra.mxu0 %v6774_v24  ;;  %v4773_v50 = vld [vmem:[%s8026_s25] sm:$0x1] }
 0x176   : > { %6419 = vmatprep.subr.bf16.mxu0 %v6839_v1 }
 0x178   : > { %6182 = vmatpush3.bf16.msra.mxu1 %v6777_v18  ;;  %v4610_v18 = vcombine.high %v5696_v38, %v5696_v38 }
 0x179   : > { %6183 = vmatprep.subr.bf16.mxu1 %v6839_v1  ;;  %6420 = vmatpush3.bf16.msra.mxu0 %v6776_v43 }
 0x17a   : > { %6421 = vmatprep.subr.bf16.mxu0 %v6839_v1  ;;  %v4625_v24 = vrot.slane %v4610_v18, 7 }
 0x17c   : > { %6184 = vmatpush3.bf16.msra.mxu1 %v6779_v33  ;;  %v4626_v33 = vsel %vm7168_vm14, %v5700_v23, %v4625_v24 }
 0x17d   : > { %6185 = vmatprep.subr.bf16.mxu1 %v6839_v1  ;;  %6422 = vmatpush3.bf16.msra.mxu0 %v6778_v14  ;;  %v4645_v27 = vcombine.low %v4622_v32, %v4626_v33 }
 0x17e   : > { %6423 = vmatprep.subr.bf16.mxu0 %v6839_v1 }
 0x17f   : > { %v4659_v41 = vrot.slane %v4645_v27, %v6964_v28 }
 0x180   : > { %6186 = vmatpush3.bf16.msra.mxu1 %v6781_v37 }
 0x181   : > { %6187 = vmatprep.subr.bf16.mxu1 %v6839_v1  ;;  %6424 = vmatpush3.bf16.msra.mxu0 %v6780_v55  ;;  %v4660_v42 = vcombine.low %v4652_v35, %v4659_v41 }
 0x182   : > { %6425 = vmatprep.subr.bf16.mxu0 %v6839_v1 }
 0x184   : > { %6188 = vmatpush3.bf16.msra.mxu1 %v6783_v53 }
 0x185   : > { %6426 = vmatpush3.bf16.msra.mxu0 %v6782_v60 }
 0x186   : > { %6427 = vmatprep.subr.bf16.mxu0 %v6839_v1 }
 0x187   : > { %6190 = vmatmul.mubr.bf16.vlgmr.msra.gmra.mrb[0].mxu1 %v2234_v56 }
 0x189   : > { %6428 = vmatpush3.bf16.msra.mxu0 %v6784_v63 }
 0x18a   : > { %6433 = vmatprep.subr.bf16.mxu0 %v6839_v1 }
 0x18c   : > { %6430 = vmatmul.mubr.bf16.vlgmr.msra.gmra.mrb[0].mxu0 %v4478_v62 }
 0x18d   : > { %6434 = vmatpush3.bf16.msra.mxu0 %v6787_v0  ;;  %6449 = vmatprep.mubr.msk.bf16.mxu0 %vm6840_vm0, %v6839_v1 }
 0x18e   : > { %6435 = vmatprep.subr.bf16.mxu0 %v6839_v1 }
 0x191   : > { %6436 = vmatpush3.bf16.msra.mxu0 %v6788_v3 }
 0x192   : > { %6437 = vmatprep.subr.bf16.mxu0 %v6839_v1 }
 0x195   : > { %6438 = vmatpush3.bf16.msra.mxu0 %v6789_v7 }
 0x196   : > { %6439 = vmatprep.subr.bf16.mxu0 %v6839_v1 }
 0x199   : > { %6440 = vmatpush3.bf16.msra.mxu0 %v6790_v11 }
 0x19a   : > { %6441 = vmatprep.subr.bf16.mxu0 %v6839_v1 }
 0x19d   : > { %6442 = vmatpush3.bf16.msra.mxu0 %v6791_v13 }
 0x19e   : > { %6443 = vmatprep.subr.bf16.mxu0 %v6839_v1 }
 0x1a1   : > { %6444 = vmatpush3.bf16.msra.mxu0 %v6792_v25 }
 0x1a2   : > { %6445 = vmatprep.subr.bf16.mxu0 %v6839_v1 }
 0x1a5   : > { %6446 = vmatpush3.bf16.msra.mxu0 %v6793_v29 }
 0x1a6   : > { %6447 = vmatprep.subr.bf16.mxu0 %v6839_v1 }
 0x1a9   : > { %6448 = vmatpush3.bf16.msra.mxu0 %v6794_v2 }
 0x1ac   : > { %6450 = vmatmul.mubr.bf16.vlgmr.msra.gmra.mrb[0].mxu0 %v4660_v42 }
 0x25a   : > { %v2318_v28 = vpop.f32.mrb[0].mxu1 }
 0x25b   : > { %v6191_v43 = vpop.f32.mrb[1].mxu1 }
 0x25c   : > { %v2321_v44 = vpop.f32.mrb[2].mxu1 }
 0x25d   : > { %v6192_v45 = vpop.f32.mrb[3].mxu1 }
 0x27f   : > { %v4744_v34 = vpop.f32.mrb[0].mxu0 }
 0x280   : > { %v6453_v36 = vadd.f32 %v4744_v34, %v2318_v28  ;;  %v6451_v37 = vpop.f32.mrb[1].mxu0 }
 0x281   : > { %v4747_v46 = vpop.f32.mrb[2].mxu0 }
 0x282   : > { %v4755_v47 = vcombine.high %v6453_v36, %v6453_v36  ;;  %v4759_v48 = vpack.c.bf16 %v6453_v36, %v6453_v36  ;;  %v6454_v49 = vadd.f32 %v4747_v46, %v2321_v44  ;;  %v6452_v51 = vpop.f32.mrb[3].mxu0  ;;  %v4784_v52 = vmul.f32 %v6453_v36, %v6453_v36 }
 0x284   : > { %v4760_v14 = vpack.c.bf16 %v4755_v47, %v4755_v47  ;;  %4763 = vst [vmem:[%s235_s6] sm:$0x3] %v4759_v48  ;;  %v4756_v1 = vcombine.high %v6454_v49, %v6454_v49  ;;  %v4761_v15 = vpack.c.bf16 %v6454_v49, %v6454_v49  ;;  %v4774_v16 = vadd.f32 %v6454_v49, %v6453_v36 }
 0x285   : > { %v4785_v53 = vmul.f32 %v6454_v49, %v6454_v49 }
 0x286   : > { %4764 = vst [vmem:[%s235_s6 + $0x2] sm:$0x3] %v4760_v14  ;;  %v4762_v54 = vpack.c.bf16 %v4756_v1, %v4756_v1  ;;  %4765 = vst [vmem:[%s235_s6 + $0x4] sm:$0x3] %v4761_v15  ;;  %v4775_v55 = vrot.slane %v4774_v16, 4 }
 0x287   : > { %v4786_v56 = vadd.f32 %v4785_v53, %v4784_v52 }
 0x288   : > { %4766 = vst [vmem:[%s235_s6 + $0x6] sm:$0x3] %v4762_v54  ;;  %v4776_v57 = vadd.f32 %v4775_v55, %v4774_v16 }
 0x289   : > { %v4787_v58 = vrot.slane %v4786_v56, 4 }
 0x28a   : > { %v4777_v59 = vrot.slane %v4776_v57, 2 }
 0x28b   : > { %v4788_v4 = vadd.f32 %v4787_v58, %v4786_v56 }
 0x28c   : > { %v4778_v10 = vadd.f32 %v4777_v59, %v4776_v57 }
 0x28d   : > { %v4789_v60 = vrot.slane %v4788_v4, 2 }
 0x28e   : > { %v4779_v61 = vrot.slane %v4778_v10, 1 }
 0x28f   : > { %v4790_v63 = vadd.f32 %v4789_v60, %v4788_v4 }
 0x290   : > { %v4780_v62 = vadd.f32 %v4779_v61, %v4778_v10 }
 0x291   : > { %v4791_v0 = vrot.slane %v4790_v63, 1 }
 0x292   : > { %v4781_v3 = vadd.f32 %v4780_v62, %v4773_v50 }
 0x293   : > { %v4792_v6 = vadd.f32 %v4791_v0, %v4790_v63 }
 0x294   : > { %4782 = vst [vmem:[%s8026_s25] sm:$0x1] %v4781_v3 }
 0x295   : > { %v4793_v7 = vadd.f32 %v4792_v6, %v4783_v5 }
 0x297   : > { %4794 = vst [vmem:[%s8031_s28] sm:$0x1] %v4793_v7 }
 0x298 PF: > { %s15_s17 = sadd.s32 1, %s6837_s17   ;;  %s8066_s15 = smov %s6833_s16 }
 0x299   : > { %p12_p6 = scmp.ge.s32.totalorder %s15_s17, 4   ;;  %s8067_s16 = smov %s8069_s18 }
 0x29b   :  { %14 = sbr.rel (!%p12_p6) target bundleno = 2 (0x2), region = 120 }

</bundles_post_ra>
